<compile_context>
chip_gen: v7x
topology: tpu7x:2x2x1
jax: 0.10.0
libtpu: 0.0.40
codegen_flags: <defaults>
</compile_context>

<pallas_src>
import jax
import jax.numpy as jnp
from jax.experimental import pallas as pl
from jax.experimental.pallas import tpu as pltpu


def _out_len(l, k, s, p):
    return (l + 2 * p - (k - 1) - 1) // s + 1


# --------------------------------------------------------------------------
# Fused forward builder
# --------------------------------------------------------------------------

def build_resnet1d_forward(num_classes, input_length, batch):
    # (C_in, C_out, stride) for layer1 + layer2 blocks (static structure).
    blocks_cfg = [(16, 32, 2), (32, 32, 1), (32, 32, 1),
                  (32, 64, 2), (64, 64, 1), (64, 64, 1)]
    L1 = _out_len(input_length, 7, 2, 3)          # after stem conv
    Lp = _out_len(L1, 3, 2, 1)                    # after maxpool
    lens = [Lp]
    for (_, _, s) in blocks_cfg:
        lens.append(_out_len(lens[-1], 3, s, 1))
    L_last = lens[-1]                             # length entering Flatten

    n_tensors = 2 + sum(
        4 + (2 if (s != 1 or ci != co) else 0) for (ci, co, s) in blocks_cfg) + 6

    # One reusable padded-activation scratch buffer (largest need: stem pad=3).
    pad_rows = -(-(input_length + 6) // 8) * 8
    pad_cols = 64

    def kernel(*args):
        alphas = args[0]                          # SMEM (10,) f32: PReLU slopes
        x_ref = args[1]                           # VMEM (L_in, 1) f32
        t = args[2:2 + n_tensors]                 # folded / packed weights
        o_ref = args[2 + n_tensors]               # (1, 1, num_classes)
        scr = args[3 + n_tensors]                 # VMEM scratch (pad_rows, pad_cols)

        it = iter(t)

        def nxt():
            return next(it)

        def prelu(y, a):
            return jnp.where(y >= 0.0, y, a * y)

        def fill_pad(x, pad, fill):
            # Write `x` (L, C) into scratch rows [pad, pad+L) with `fill` padding.
            L, C = x.shape
            scr[pl.ds(0, L + 2 * pad), pl.ds(0, C)] = jnp.full(
                (L + 2 * pad, C), fill, jnp.float32)
            scr[pl.ds(pad, L), pl.ds(0, C)] = x

        def rows(k, n, stride, C):
            # Strided shifted-slice read from the padded scratch.
            if stride == 1:
                return scr[pl.ds(k, n), pl.ds(0, C)]
            return scr[pl.ds(k, n, stride), pl.ds(0, C)]

        def conv(L_out, C_in, C_out, stride, K, w_ref, b_ref):
            # Conv1d lowered to K accumulated MXU matmuls over shifted slices.
            acc = jnp.zeros((L_out, C_out), jnp.float32)
            for k in range(K):
                lhs = rows(k, L_out, stride, C_in).astype(jnp.bfloat16)
                acc = acc + jnp.dot(lhs, w_ref[k],
                                    preferred_element_type=jnp.float32)
            return acc + b_ref[...]

        # ---- stem: Conv1d(1, 16, k=7, s=2, p=3) + folded BN + PReLU  (C_in=1 -> VPU)
        w_s, b_s = nxt(), nxt()
        fill_pad(x_ref[...], 3, 0.0)
        acc = jnp.zeros((L1, 16), jnp.float32)
        for k in range(7):
            acc = acc + rows(k, L1, 2, 1) * w_s[k]        # (L1,1) * (1,16)
        h = prelu(acc + b_s[...], alphas[0])

        # ---- MaxPool1d(3, 2, 1) fused via strided reads + elementwise max
        fill_pad(h, 1, -1e30)
        h = jnp.maximum(jnp.maximum(rows(0, Lp, 2, 16), rows(1, Lp, 2, 16)),
                        rows(2, Lp, 2, 16))

        # ---- residual blocks (layer1 + layer2)
        L_cur = Lp
        for bi, (C_in, C_out, stride) in enumerate(blocks_cfg):
            a = alphas[1 + bi]
            wA, bA, wB, bB = nxt(), nxt(), nxt(), nxt()
            has_down = (stride != 1 or C_in != C_out)
            if has_down:
                wD, bD = nxt(), nxt()
            L_mid = _out_len(L_cur, 3, stride, 1)

            fill_pad(h, 1, 0.0)                           # padded block input
            out1 = prelu(conv(L_mid, C_in, C_out, stride, 3, wA, bA), a)
            if has_down:                                  # 1x1 strided conv + BN
                xs = rows(1, L_mid, stride, C_in).astype(jnp.bfloat16)
                identity = jnp.dot(xs, wD[0],
                                   preferred_element_type=jnp.float32) + bD[...]
            else:
                identity = h
            fill_pad(out1, 1, 0.0)                        # reuse scratch for conv2
            out2 = conv(L_mid, C_out, C_out, 1, 3, wB, bB)
            h = prelu(out2 + identity, a)
            L_cur = L_mid

        # ---- dense head: Flatten -> 3x (Linear + PReLU) -> Softmax
        w1, b1, w2, b2, w3, b3 = nxt(), nxt(), nxt(), nxt(), nxt(), nxt()
        d = jnp.zeros((1, 128), jnp.float32)
        for l in range(L_last):                           # flatten order folded into w1
            d = d + jnp.dot(h[l:l + 1, :].astype(jnp.bfloat16), w1[l],
                            preferred_element_type=jnp.float32)
        d = prelu(d + b1[...], alphas[7])
        d = prelu(jnp.dot(d.astype(jnp.bfloat16), w2[...],
                          preferred_element_type=jnp.float32) + b2[...], alphas[8])
        d = prelu(jnp.dot(d.astype(jnp.bfloat16), w3[...],
                          preferred_element_type=jnp.float32) + b3[...], alphas[9])

        m = jnp.max(d, axis=-1, keepdims=True)
        e = jnp.exp(d - m)
        probs = e / jnp.sum(e, axis=-1, keepdims=True)
        o_ref[...] = probs[None]                          # (1, 1, num_classes)

    in_specs = [pl.BlockSpec(memory_space=pltpu.MemorySpace.SMEM),           # alphas
                pl.BlockSpec((None, input_length, 1), lambda b: (b, 0, 0))]  # x
    in_specs += [pl.BlockSpec(memory_space=pltpu.MemorySpace.VMEM)] * n_tensors

    fused = pl.pallas_call(
        kernel,
        grid=(batch,),
        in_specs=in_specs,
        out_specs=pl.BlockSpec((1, 1, num_classes), lambda b: (b, 0, 0)),
        out_shape=jax.ShapeDtypeStruct((batch, 1, num_classes), jnp.float32),
        scratch_shapes=[pltpu.VMEM((pad_rows, pad_cols), jnp.float32)],
        compiler_params=pltpu.CompilerParams(
            dimension_semantics=("parallel",),
            vmem_limit_bytes=32 * 1024 * 1024),
    )

    @jax.jit
    def forward(alphas, tensors, x):
        x3 = x.astype(jnp.float32)[:, :, None]            # (B, L) -> (B, L, 1)
        return fused(alphas, x3, *tensors)[:, 0, :]

    return forward


# --------------------------------------------------------------------------
# Parameter building / host-side preparation (BN fold, transposes, bf16 cast)
# --------------------------------------------------------------------------

def _conv_init(key, c_out, c_in, k):
    kw, kb = jax.random.split(key)
    bound = 1.0 / jnp.sqrt(jnp.float32(c_in * k))
    w = jax.random.uniform(kw, (c_out, c_in, k), jnp.float32, -bound, bound)
    b = jax.random.uniform(kb, (c_out,), jnp.float32, -bound, bound)
    return w, b


def _bn_init(key, c):
    k1, k2, k3, k4 = jax.random.split(key, 4)
    gamma = 1.0 + 0.1 * jax.random.normal(k1, (c,), jnp.float32)
    beta = 0.1 * jax.random.normal(k2, (c,), jnp.float32)
    mean = 0.1 * jax.random.normal(k3, (c,), jnp.float32)
    var = 0.5 + jax.random.uniform(k4, (c,), jnp.float32)     # running stats
    return (gamma, beta, mean, var)


def _linear_init(key, in_f, out_f):
    kw, kb = jax.random.split(key)
    bound = 1.0 / jnp.sqrt(jnp.float32(in_f))
    w = jax.random.uniform(kw, (out_f, in_f), jnp.float32, -bound, bound)
    b = jax.random.uniform(kb, (out_f,), jnp.float32, -bound, bound)
    return w, b


def _block_params(key, c_in, c_out, stride):
    keys = jax.random.split(key, 6)
    p = {'stride': stride, 'alpha': jnp.float32(0.25)}
    p['conv1_w'], p['conv1_b'] = _conv_init(keys[0], c_out, c_in, 3)
    p['bn1'] = _bn_init(keys[1], c_out)
    p['conv2_w'], p['conv2_b'] = _conv_init(keys[2], c_out, c_out, 3)
    p['bn2'] = _bn_init(keys[3], c_out)
    if stride != 1 or c_in != c_out:
        p['down_w'], p['down_b'] = _conv_init(keys[4], c_out, c_in, 1)
        p['down_bn'] = _bn_init(keys[5], c_out)
    return p


def init_params(key, num_classes, input_length):
    length = input_length
    for (k, s, p) in [(7, 2, 3), (3, 2, 1), (3, 2, 1), (3, 2, 1)]:
        length = _out_len(length, k, s, p)
    conv_output_size = 64 * length

    keys = jax.random.split(key, 12)
    params = {}
    params['conv1_w'], params['conv1_b'] = _conv_init(keys[0], 16, 1, 7)
    params['bn1'] = _bn_init(keys[1], 16)
    params['prelu'] = jnp.float32(0.25)
    params['layer1'] = [_block_params(keys[2], 16, 32, 2),
                        _block_params(keys[3], 32, 32, 1),
                        _block_params(keys[4], 32, 32, 1)]
    params['layer2'] = [_block_params(keys[5], 32, 64, 2),
                        _block_params(keys[6], 64, 64, 1),
                        _block_params(keys[7], 64, 64, 1)]
    w, b = _linear_init(keys[8], conv_output_size, 128)
    params['dense1'] = {'w': w, 'b': b, 'alpha': jnp.float32(0.25)}
    w, b = _linear_init(keys[9], 128, 64)
    params['dense2'] = {'w': w, 'b': b, 'alpha': jnp.float32(0.25)}
    w, b = _linear_init(keys[10], 64, num_classes)
    params['dense3'] = {'w': w, 'b': b, 'alpha': jnp.float32(0.25)}
    return params


def _fold_bn(w, b, bn):
    gamma, beta, mean, var = bn
    scale = gamma / jnp.sqrt(var + 1e-5)
    return w * scale[:, None, None], (b - mean) * scale + beta


def _pack_conv(w, b, bn, dtype):
    wf, bf = _fold_bn(w, b, bn)
    wk = jnp.transpose(wf, (2, 1, 0)).astype(dtype)     # (K, C_in, C_out)
    return wk, bf.reshape(1, -1).astype(jnp.float32)


def prepare_params(params):
    """Fold BN, pre-transpose / pre-permute weights, cast MXU weights to bf16."""
    tensors = []
    alphas = [params['prelu']]

    # Stem stays f32 (computed on the VPU since C_in == 1).
    wk, bf = _pack_conv(params['conv1_w'], params['conv1_b'], params['bn1'],
                        jnp.float32)
    tensors += [wk, bf]

    for layer in ('layer1', 'layer2'):
        for p in params[layer]:
            alphas.append(p['alpha'])
            wk, bf = _pack_conv(p['conv1_w'], p['conv1_b'], p['bn1'], jnp.bfloat16)
            tensors += [wk, bf]
            wk, bf = _pack_conv(p['conv2_w'], p['conv2_b'], p['bn2'], jnp.bfloat16)
            tensors += [wk, bf]
            if 'down_w' in p:
                wk, bf = _pack_conv(p['down_w'], p['down_b'], p['down_bn'],
                                    jnp.bfloat16)
                tensors += [wk, bf]

    # dense1: fold PyTorch Flatten order (index = c*L + l) into the weight layout.
    d1 = params['dense1']
    W = d1['w']                                           # (128, 64*L_last)
    L_last = W.shape[1] // 64
    W1r = W.reshape(128, 64, L_last).transpose(2, 1, 0)   # (L_last, 64, 128)
    tensors += [W1r.astype(jnp.bfloat16), d1['b'].reshape(1, -1).astype(jnp.float32)]
    d2 = params['dense2']
    tensors += [d2['w'].T.astype(jnp.bfloat16), d2['b'].reshape(1, -1).astype(jnp.float32)]
    d3 = params['dense3']
    tensors += [d3['w'].T.astype(jnp.bfloat16), d3['b'].reshape(1, -1).astype(jnp.float32)]
    alphas += [d1['alpha'], d2['alpha'], d3['alpha']]

    return jnp.stack(alphas).astype(jnp.float32), tuple(tensors)


# --------------------------------------------------------------------------
# Pure-JAX f32 reference (for an in-script sanity check only)
# --------------------------------------------------------------------------

def _reference_forward(params, x):
    def conv1d(h, w, b, stride, pad):
        y = jax.lax.conv_general_dilated(
            h, w, (stride,), [(pad, pad)],
            dimension_numbers=('NCH', 'OIH', 'NCH'))
        return y + b[None, :, None]

    def bn(h, p):
        g, be, m, v = p
        s = g / jnp.sqrt(v + 1e-5)
        return (h - m[None, :, None]) * s[None, :, None] + be[None, :, None]

    def prelu(h, a):
        return jnp.where(h >= 0, h, a * h)

    def maxpool(h):
        _, _, L = h.shape
        L_out = (L + 2 - 3) // 2 + 1
        hp = jnp.pad(h, ((0, 0), (0, 0), (1, 1)), constant_values=-jnp.inf)
        cols = [hp[:, :, k::2][:, :, :L_out] for k in range(3)]
        return jnp.maximum(jnp.maximum(cols[0], cols[1]), cols[2])

    def block(h, p):
        out = prelu(bn(conv1d(h, p['conv1_w'], p['conv1_b'], p['stride'], 1),
                       p['bn1']), p['alpha'])
        out = bn(conv1d(out, p['conv2_w'], p['conv2_b'], 1, 1), p['bn2'])
        if 'down_w' in p:
            idn = bn(conv1d(h, p['down_w'], p['down_b'], p['stride'], 0),
                     p['down_bn'])
        else:
            idn = h
        return prelu(out + idn, p['alpha'])

    h = x[:, None, :]
    h = prelu(bn(conv1d(h, params['conv1_w'], params['conv1_b'], 2, 3),
                 params['bn1']), params['prelu'])
    h = maxpool(h)
    for p in params['layer1'] + params['layer2']:
        h = block(h, p)
    h = h.reshape(h.shape[0], -1)
    for name in ('dense1', 'dense2', 'dense3'):
        d = params[name]
        h = prelu(h @ d['w'].T + d['b'], d['alpha'])
    return jax.nn.softmax(h, axis=1)


# ---------------------------------- main ------------------------------------

if __name__ == "__main__":
    key = jax.random.PRNGKey(0)
    pkey, xkey = jax.random.split(key)

    num_classes = 5
    input_length = 64
    batch = 2

    params = init_params(pkey, num_classes, input_length)
    x = jax.random.normal(xkey, (batch, input_length), jnp.float32)

    alphas, tensors = prepare_params(params)
    forward = build_resnet1d_forward(num_classes, input_length, batch)

    out = forward(alphas, tensors, x)
    out = jax.block_until_ready(out)

    assert out.shape == (batch, num_classes), out.shape
    assert bool(jnp.all(jnp.isfinite(out)))
    assert bool(jnp.allclose(jnp.sum(out, axis=1), 1.0, atol=1e-5))

    # Loose tolerance: kernel feeds the MXU with bf16, reference is pure f32.
    ref = _reference_forward(params, x)
    assert float(jnp.max(jnp.abs(out - ref))) < 0.05

    print("KERNEL_OK")
</pallas_src>

<mosaic_0001>
module attributes {stable_mosaic.version = 11 : i64} {
  func.func @kernel(%arg0: i32, %arg1: memref<10xf32, #tpu.memory_space<smem>>, %arg2: memref<1x64x1xf32, #tpu.memory_space<vmem>>, %arg3: memref<7x1x16xf32, #tpu.memory_space<vmem>>, %arg4: memref<1x16xf32, #tpu.memory_space<vmem>>, %arg5: memref<3x16x32xbf16, #tpu.memory_space<vmem>>, %arg6: memref<1x32xf32, #tpu.memory_space<vmem>>, %arg7: memref<3x32x32xbf16, #tpu.memory_space<vmem>>, %arg8: memref<1x32xf32, #tpu.memory_space<vmem>>, %arg9: memref<1x16x32xbf16, #tpu.memory_space<vmem>>, %arg10: memref<1x32xf32, #tpu.memory_space<vmem>>, %arg11: memref<3x32x32xbf16, #tpu.memory_space<vmem>>, %arg12: memref<1x32xf32, #tpu.memory_space<vmem>>, %arg13: memref<3x32x32xbf16, #tpu.memory_space<vmem>>, %arg14: memref<1x32xf32, #tpu.memory_space<vmem>>, %arg15: memref<3x32x32xbf16, #tpu.memory_space<vmem>>, %arg16: memref<1x32xf32, #tpu.memory_space<vmem>>, %arg17: memref<3x32x32xbf16, #tpu.memory_space<vmem>>, %arg18: memref<1x32xf32, #tpu.memory_space<vmem>>, %arg19: memref<3x32x64xbf16, #tpu.memory_space<vmem>>, %arg20: memref<1x64xf32, #tpu.memory_space<vmem>>, %arg21: memref<3x64x64xbf16, #tpu.memory_space<vmem>>, %arg22: memref<1x64xf32, #tpu.memory_space<vmem>>, %arg23: memref<1x32x64xbf16, #tpu.memory_space<vmem>>, %arg24: memref<1x64xf32, #tpu.memory_space<vmem>>, %arg25: memref<3x64x64xbf16, #tpu.memory_space<vmem>>, %arg26: memref<1x64xf32, #tpu.memory_space<vmem>>, %arg27: memref<3x64x64xbf16, #tpu.memory_space<vmem>>, %arg28: memref<1x64xf32, #tpu.memory_space<vmem>>, %arg29: memref<3x64x64xbf16, #tpu.memory_space<vmem>>, %arg30: memref<1x64xf32, #tpu.memory_space<vmem>>, %arg31: memref<3x64x64xbf16, #tpu.memory_space<vmem>>, %arg32: memref<1x64xf32, #tpu.memory_space<vmem>>, %arg33: memref<4x64x128xbf16, #tpu.memory_space<vmem>>, %arg34: memref<1x128xf32, #tpu.memory_space<vmem>>, %arg35: memref<128x64xbf16, #tpu.memory_space<vmem>>, %arg36: memref<1x64xf32, #tpu.memory_space<vmem>>, %arg37: memref<64x5xbf16, #tpu.memory_space<vmem>>, %arg38: memref<1x5xf32, #tpu.memory_space<vmem>>, %arg39: memref<1x1x5xf32, #tpu.memory_space<vmem>>, %arg40: memref<72x64xf32, #tpu.memory_space<vmem>>) attributes {dimension_semantics = [#tpu.dimension_semantics<parallel>], iteration_bounds = array<i64: 2>, scalar_prefetch = 0 : i64, scratch_operands = 1 : i64, tpu.core_type = #tpu.core_type<tc>, window_params = [{transform_indices = @transform_0, window_bounds = array<i64: 10>}, {transform_indices = @transform_1, window_bounds = array<i64: 1, 64, 1>}, {pipeline_mode = #tpu.pipeline_mode<synchronous>, transform_indices = @transform_2, window_bounds = array<i64: 7, 1, 16>}, {pipeline_mode = #tpu.pipeline_mode<synchronous>, transform_indices = @transform_3, window_bounds = array<i64: 1, 16>}, {pipeline_mode = #tpu.pipeline_mode<synchronous>, transform_indices = @transform_4, window_bounds = array<i64: 3, 16, 32>}, {pipeline_mode = #tpu.pipeline_mode<synchronous>, transform_indices = @transform_5, window_bounds = array<i64: 1, 32>}, {pipeline_mode = #tpu.pipeline_mode<synchronous>, transform_indices = @transform_6, window_bounds = array<i64: 3, 32, 32>}, {pipeline_mode = #tpu.pipeline_mode<synchronous>, transform_indices = @transform_7, window_bounds = array<i64: 1, 32>}, {pipeline_mode = #tpu.pipeline_mode<synchronous>, transform_indices = @transform_8, window_bounds = array<i64: 1, 16, 32>}, {pipeline_mode = #tpu.pipeline_mode<synchronous>, transform_indices = @transform_9, window_bounds = array<i64: 1, 32>}, {pipeline_mode = #tpu.pipeline_mode<synchronous>, transform_indices = @transform_10, window_bounds = array<i64: 3, 32, 32>}, {pipeline_mode = #tpu.pipeline_mode<synchronous>, transform_indices = @transform_11, window_bounds = array<i64: 1, 32>}, {pipeline_mode = #tpu.pipeline_mode<synchronous>, transform_indices = @transform_12, window_bounds = array<i64: 3, 32, 32>}, {pipeline_mode = #tpu.pipeline_mode<synchronous>, transform_indices = @transform_13, window_bounds = array<i64: 1, 32>}, {pipeline_mode = #tpu.pipeline_mode<synchronous>, transform_indices = @transform_14, window_bounds = array<i64: 3, 32, 32>}, {pipeline_mode = #tpu.pipeline_mode<synchronous>, transform_indices = @transform_15, window_bounds = array<i64: 1, 32>}, {pipeline_mode = #tpu.pipeline_mode<synchronous>, transform_indices = @transform_16, window_bounds = array<i64: 3, 32, 32>}, {pipeline_mode = #tpu.pipeline_mode<synchronous>, transform_indices = @transform_17, window_bounds = array<i64: 1, 32>}, {pipeline_mode = #tpu.pipeline_mode<synchronous>, transform_indices = @transform_18, window_bounds = array<i64: 3, 32, 64>}, {pipeline_mode = #tpu.pipeline_mode<synchronous>, transform_indices = @transform_19, window_bounds = array<i64: 1, 64>}, {pipeline_mode = #tpu.pipeline_mode<synchronous>, transform_indices = @transform_20, window_bounds = array<i64: 3, 64, 64>}, {pipeline_mode = #tpu.pipeline_mode<synchronous>, transform_indices = @transform_21, window_bounds = array<i64: 1, 64>}, {pipeline_mode = #tpu.pipeline_mode<synchronous>, transform_indices = @transform_22, window_bounds = array<i64: 1, 32, 64>}, {pipeline_mode = #tpu.pipeline_mode<synchronous>, transform_indices = @transform_23, window_bounds = array<i64: 1, 64>}, {pipeline_mode = #tpu.pipeline_mode<synchronous>, transform_indices = @transform_24, window_bounds = array<i64: 3, 64, 64>}, {pipeline_mode = #tpu.pipeline_mode<synchronous>, transform_indices = @transform_25, window_bounds = array<i64: 1, 64>}, {pipeline_mode = #tpu.pipeline_mode<synchronous>, transform_indices = @transform_26, window_bounds = array<i64: 3, 64, 64>}, {pipeline_mode = #tpu.pipeline_mode<synchronous>, transform_indices = @transform_27, window_bounds = array<i64: 1, 64>}, {pipeline_mode = #tpu.pipeline_mode<synchronous>, transform_indices = @transform_28, window_bounds = array<i64: 3, 64, 64>}, {pipeline_mode = #tpu.pipeline_mode<synchronous>, transform_indices = @transform_29, window_bounds = array<i64: 1, 64>}, {pipeline_mode = #tpu.pipeline_mode<synchronous>, transform_indices = @transform_30, window_bounds = array<i64: 3, 64, 64>}, {pipeline_mode = #tpu.pipeline_mode<synchronous>, transform_indices = @transform_31, window_bounds = array<i64: 1, 64>}, {pipeline_mode = #tpu.pipeline_mode<synchronous>, transform_indices = @transform_32, window_bounds = array<i64: 4, 64, 128>}, {pipeline_mode = #tpu.pipeline_mode<synchronous>, transform_indices = @transform_33, window_bounds = array<i64: 1, 128>}, {pipeline_mode = #tpu.pipeline_mode<synchronous>, transform_indices = @transform_34, window_bounds = array<i64: 128, 64>}, {pipeline_mode = #tpu.pipeline_mode<synchronous>, transform_indices = @transform_35, window_bounds = array<i64: 1, 64>}, {pipeline_mode = #tpu.pipeline_mode<synchronous>, transform_indices = @transform_36, window_bounds = array<i64: 64, 5>}, {pipeline_mode = #tpu.pipeline_mode<synchronous>, transform_indices = @transform_37, window_bounds = array<i64: 1, 5>}, {transform_indices = @transform_38, window_bounds = array<i64: 1, 1, 5>}]} {
    %c0 = arith.constant 0 : index
    %c0_0 = arith.constant 0 : index
    %c0_1 = arith.constant 0 : index
    %0 = vector.load %arg2[%c0, %c0_0, %c0_1] : memref<1x64x1xf32, #tpu.memory_space<vmem>>, vector<1x64x1xf32>
    %1 = vector.shape_cast %0 : vector<1x64x1xf32> to vector<64x1xf32>
    %cst = arith.constant 0.000000e+00 : f32
    %2 = vector.broadcast %cst : f32 to vector<70x1xf32>
    %c0_2 = arith.constant 0 : index
    %c0_3 = arith.constant 0 : index
    %3 = vector.load %arg40[%c0_2, %c0_3] : memref<72x64xf32, #tpu.memory_space<vmem>>, vector<70x1xf32>
    tpu.vector_store %arg40[%c0_2, %c0_3], %2 {strides = array<i32>} : memref<72x64xf32, #tpu.memory_space<vmem>>, vector<70x1xf32>,
    %c3 = arith.constant 3 : index
    %c0_4 = arith.constant 0 : index
    %4 = vector.load %arg40[%c3, %c0_4] : memref<72x64xf32, #tpu.memory_space<vmem>>, vector<64x1xf32>
    tpu.vector_store %arg40[%c3, %c0_4], %1 {strides = array<i32>} : memref<72x64xf32, #tpu.memory_space<vmem>>, vector<64x1xf32>,
    %cst_5 = arith.constant 0.000000e+00 : f32
    %5 = vector.broadcast %cst_5 : f32 to vector<32x16xf32>
    %c0_6 = arith.constant 0 : index
    %c0_7 = arith.constant 0 : index
    %6 = tpu.strided_load %arg40[%c0_6, %c0_7] {strides = array<i32: 2, 1>} : memref<72x64xf32, #tpu.memory_space<vmem>>, vector<32x1xf32>
    %c0_8 = arith.constant 0 : index
    %c0_9 = arith.constant 0 : index
    %c0_10 = arith.constant 0 : index
    %7 = vector.load %arg3[%c0_8, %c0_9, %c0_10] : memref<7x1x16xf32, #tpu.memory_space<vmem>>, vector<1x1x16xf32>
    %8 = vector.shape_cast %7 : vector<1x1x16xf32> to vector<1x16xf32>
    %9 = vector.broadcast %6 : vector<32x1xf32> to vector<32x16xf32>
    %10 = vector.broadcast %8 : vector<1x16xf32> to vector<32x16xf32>
    %11 = arith.mulf %9, %10 : vector<32x16xf32>
    %12 = arith.addf %5, %11 : vector<32x16xf32>
    %c1 = arith.constant 1 : index
    %c0_11 = arith.constant 0 : index
    %13 = tpu.strided_load %arg40[%c1, %c0_11] {strides = array<i32: 2, 1>} : memref<72x64xf32, #tpu.memory_space<vmem>>, vector<32x1xf32>
    %c1_12 = arith.constant 1 : index
    %c0_13 = arith.constant 0 : index
    %c0_14 = arith.constant 0 : index
    %14 = vector.load %arg3[%c1_12, %c0_13, %c0_14] : memref<7x1x16xf32, #tpu.memory_space<vmem>>, vector<1x1x16xf32>
    %15 = vector.shape_cast %14 : vector<1x1x16xf32> to vector<1x16xf32>
    %16 = vector.broadcast %13 : vector<32x1xf32> to vector<32x16xf32>
    %17 = vector.broadcast %15 : vector<1x16xf32> to vector<32x16xf32>
    %18 = arith.mulf %16, %17 : vector<32x16xf32>
    %19 = arith.addf %12, %18 : vector<32x16xf32>
    %c2 = arith.constant 2 : index
    %c0_15 = arith.constant 0 : index
    %20 = tpu.strided_load %arg40[%c2, %c0_15] {strides = array<i32: 2, 1>} : memref<72x64xf32, #tpu.memory_space<vmem>>, vector<32x1xf32>
    %c2_16 = arith.constant 2 : index
    %c0_17 = arith.constant 0 : index
    %c0_18 = arith.constant 0 : index
    %21 = vector.load %arg3[%c2_16, %c0_17, %c0_18] : memref<7x1x16xf32, #tpu.memory_space<vmem>>, vector<1x1x16xf32>
    %22 = vector.shape_cast %21 : vector<1x1x16xf32> to vector<1x16xf32>
    %23 = vector.broadcast %20 : vector<32x1xf32> to vector<32x16xf32>
    %24 = vector.broadcast %22 : vector<1x16xf32> to vector<32x16xf32>
    %25 = arith.mulf %23, %24 : vector<32x16xf32>
    %26 = arith.addf %19, %25 : vector<32x16xf32>
    %c3_19 = arith.constant 3 : index
    %c0_20 = arith.constant 0 : index
    %27 = tpu.strided_load %arg40[%c3_19, %c0_20] {strides = array<i32: 2, 1>} : memref<72x64xf32, #tpu.memory_space<vmem>>, vector<32x1xf32>
    %c3_21 = arith.constant 3 : index
    %c0_22 = arith.constant 0 : index
    %c0_23 = arith.constant 0 : index
    %28 = vector.load %arg3[%c3_21, %c0_22, %c0_23] : memref<7x1x16xf32, #tpu.memory_space<vmem>>, vector<1x1x16xf32>
    %29 = vector.shape_cast %28 : vector<1x1x16xf32> to vector<1x16xf32>
    %30 = vector.broadcast %27 : vector<32x1xf32> to vector<32x16xf32>
    %31 = vector.broadcast %29 : vector<1x16xf32> to vector<32x16xf32>
    %32 = arith.mulf %30, %31 : vector<32x16xf32>
    %33 = arith.addf %26, %32 : vector<32x16xf32>
    %c4 = arith.constant 4 : index
    %c0_24 = arith.constant 0 : index
    %34 = tpu.strided_load %arg40[%c4, %c0_24] {strides = array<i32: 2, 1>} : memref<72x64xf32, #tpu.memory_space<vmem>>, vector<32x1xf32>
    %c4_25 = arith.constant 4 : index
    %c0_26 = arith.constant 0 : index
    %c0_27 = arith.constant 0 : index
    %35 = vector.load %arg3[%c4_25, %c0_26, %c0_27] : memref<7x1x16xf32, #tpu.memory_space<vmem>>, vector<1x1x16xf32>
    %36 = vector.shape_cast %35 : vector<1x1x16xf32> to vector<1x16xf32>
    %37 = vector.broadcast %34 : vector<32x1xf32> to vector<32x16xf32>
    %38 = vector.broadcast %36 : vector<1x16xf32> to vector<32x16xf32>
    %39 = arith.mulf %37, %38 : vector<32x16xf32>
    %40 = arith.addf %33, %39 : vector<32x16xf32>
    %c5 = arith.constant 5 : index
    %c0_28 = arith.constant 0 : index
    %41 = tpu.strided_load %arg40[%c5, %c0_28] {strides = array<i32: 2, 1>} : memref<72x64xf32, #tpu.memory_space<vmem>>, vector<32x1xf32>
    %c5_29 = arith.constant 5 : index
    %c0_30 = arith.constant 0 : index
    %c0_31 = arith.constant 0 : index
    %42 = vector.load %arg3[%c5_29, %c0_30, %c0_31] : memref<7x1x16xf32, #tpu.memory_space<vmem>>, vector<1x1x16xf32>
    %43 = vector.shape_cast %42 : vector<1x1x16xf32> to vector<1x16xf32>
    %44 = vector.broadcast %41 : vector<32x1xf32> to vector<32x16xf32>
    %45 = vector.broadcast %43 : vector<1x16xf32> to vector<32x16xf32>
    %46 = arith.mulf %44, %45 : vector<32x16xf32>
    %47 = arith.addf %40, %46 : vector<32x16xf32>
    %c6 = arith.constant 6 : index
    %c0_32 = arith.constant 0 : index
    %48 = tpu.strided_load %arg40[%c6, %c0_32] {strides = array<i32: 2, 1>} : memref<72x64xf32, #tpu.memory_space<vmem>>, vector<32x1xf32>
    %c6_33 = arith.constant 6 : index
    %c0_34 = arith.constant 0 : index
    %c0_35 = arith.constant 0 : index
    %49 = vector.load %arg3[%c6_33, %c0_34, %c0_35] : memref<7x1x16xf32, #tpu.memory_space<vmem>>, vector<1x1x16xf32>
    %50 = vector.shape_cast %49 : vector<1x1x16xf32> to vector<1x16xf32>
    %51 = vector.broadcast %48 : vector<32x1xf32> to vector<32x16xf32>
    %52 = vector.broadcast %50 : vector<1x16xf32> to vector<32x16xf32>
    %53 = arith.mulf %51, %52 : vector<32x16xf32>
    %54 = arith.addf %47, %53 : vector<32x16xf32>
    %c0_36 = arith.constant 0 : index
    %c0_37 = arith.constant 0 : index
    %55 = vector.load %arg4[%c0_36, %c0_37] : memref<1x16xf32, #tpu.memory_space<vmem>>, vector<1x16xf32>
    %56 = vector.broadcast %55 : vector<1x16xf32> to vector<32x16xf32>
    %57 = arith.addf %54, %56 : vector<32x16xf32>
    %c0_38 = arith.constant 0 : index
    %58 = memref.load %arg1[%c0_38] : memref<10xf32, #tpu.memory_space<smem>>
    %cst_39 = arith.constant 0.000000e+00 : f32
    %59 = vector.broadcast %cst_39 : f32 to vector<32x16xf32>
    %60 = arith.cmpf oge, %57, %59 : vector<32x16xf32>
    %61 = vector.broadcast %58 : f32 to vector<32x16xf32>
    %62 = arith.mulf %61, %57 : vector<32x16xf32>
    %63 = arith.select %60, %57, %62 : vector<32x16xi1>, vector<32x16xf32>
    %cst_40 = arith.constant -1.000000e+30 : f32
    %64 = vector.broadcast %cst_40 : f32 to vector<34x16xf32>
    %c0_41 = arith.constant 0 : index
    %c0_42 = arith.constant 0 : index
    %65 = vector.load %arg40[%c0_41, %c0_42] : memref<72x64xf32, #tpu.memory_space<vmem>>, vector<34x16xf32>
    tpu.vector_store %arg40[%c0_41, %c0_42], %64 {strides = array<i32>} : memref<72x64xf32, #tpu.memory_space<vmem>>, vector<34x16xf32>,
    %c1_43 = arith.constant 1 : index
    %c0_44 = arith.constant 0 : index
    %66 = vector.load %arg40[%c1_43, %c0_44] : memref<72x64xf32, #tpu.memory_space<vmem>>, vector<32x16xf32>
    tpu.vector_store %arg40[%c1_43, %c0_44], %63 {strides = array<i32>} : memref<72x64xf32, #tpu.memory_space<vmem>>, vector<32x16xf32>,
    %c0_45 = arith.constant 0 : index
    %c0_46 = arith.constant 0 : index
    %67 = tpu.strided_load %arg40[%c0_45, %c0_46] {strides = array<i32: 2, 1>} : memref<72x64xf32, #tpu.memory_space<vmem>>, vector<16x16xf32>
    %c1_47 = arith.constant 1 : index
    %c0_48 = arith.constant 0 : index
    %68 = tpu.strided_load %arg40[%c1_47, %c0_48] {strides = array<i32: 2, 1>} : memref<72x64xf32, #tpu.memory_space<vmem>>, vector<16x16xf32>
    %69 = arith.maximumf %67, %68 : vector<16x16xf32>
    %c2_49 = arith.constant 2 : index
    %c0_50 = arith.constant 0 : index
    %70 = tpu.strided_load %arg40[%c2_49, %c0_50] {strides = array<i32: 2, 1>} : memref<72x64xf32, #tpu.memory_space<vmem>>, vector<16x16xf32>
    %71 = arith.maximumf %69, %70 : vector<16x16xf32>
    %c1_51 = arith.constant 1 : index
    %72 = memref.load %arg1[%c1_51] : memref<10xf32, #tpu.memory_space<smem>>
    %cst_52 = arith.constant 0.000000e+00 : f32
    %73 = vector.broadcast %cst_52 : f32 to vector<18x16xf32>
    %c0_53 = arith.constant 0 : index
    %c0_54 = arith.constant 0 : index
    %74 = vector.load %arg40[%c0_53, %c0_54] : memref<72x64xf32, #tpu.memory_space<vmem>>, vector<18x16xf32>
    tpu.vector_store %arg40[%c0_53, %c0_54], %73 {strides = array<i32>} : memref<72x64xf32, #tpu.memory_space<vmem>>, vector<18x16xf32>,
    %c1_55 = arith.constant 1 : index
    %c0_56 = arith.constant 0 : index
    %75 = vector.load %arg40[%c1_55, %c0_56] : memref<72x64xf32, #tpu.memory_space<vmem>>, vector<16x16xf32>
    tpu.vector_store %arg40[%c1_55, %c0_56], %71 {strides = array<i32>} : memref<72x64xf32, #tpu.memory_space<vmem>>, vector<16x16xf32>,
    %cst_57 = arith.constant 0.000000e+00 : f32
    %76 = vector.broadcast %cst_57 : f32 to vector<8x32xf32>
    %c0_58 = arith.constant 0 : index
    %c0_59 = arith.constant 0 : index
    %77 = tpu.strided_load %arg40[%c0_58, %c0_59] {strides = array<i32: 2, 1>} : memref<72x64xf32, #tpu.memory_space<vmem>>, vector<8x16xf32>
    %78 = arith.truncf %77 : vector<8x16xf32> to vector<8x16xbf16>
    %c0_60 = arith.constant 0 : index
    %c0_61 = arith.constant 0 : index
    %c0_62 = arith.constant 0 : index
    %79 = vector.load %arg5[%c0_60, %c0_61, %c0_62] : memref<3x16x32xbf16, #tpu.memory_space<vmem>>, vector<1x16x32xbf16>
    %80 = vector.shape_cast %79 : vector<1x16x32xbf16> to vector<16x32xbf16>
    %cst_63 = arith.constant dense<0.000000e+00> : vector<8x32xf32>
    %81 = tpu.matmul %78, %80, %cst_63 {dimension_numbers = #tpu.dot_dimension_numbers<[1], [0], [0], [1], [0, 0, 1, 1], [], []>} : vector<8x16xbf16>, vector<16x32xbf16>, vector<8x32xf32> -> vector<8x32xf32>
    %82 = arith.addf %76, %81 : vector<8x32xf32>
    %c1_64 = arith.constant 1 : index
    %c0_65 = arith.constant 0 : index
    %83 = tpu.strided_load %arg40[%c1_64, %c0_65] {strides = array<i32: 2, 1>} : memref<72x64xf32, #tpu.memory_space<vmem>>, vector<8x16xf32>
    %84 = arith.truncf %83 : vector<8x16xf32> to vector<8x16xbf16>
    %c1_66 = arith.constant 1 : index
    %c0_67 = arith.constant 0 : index
    %c0_68 = arith.constant 0 : index
    %85 = vector.load %arg5[%c1_66, %c0_67, %c0_68] : memref<3x16x32xbf16, #tpu.memory_space<vmem>>, vector<1x16x32xbf16>
    %86 = vector.shape_cast %85 : vector<1x16x32xbf16> to vector<16x32xbf16>
    %cst_69 = arith.constant dense<0.000000e+00> : vector<8x32xf32>
    %87 = tpu.matmul %84, %86, %cst_69 {dimension_numbers = #tpu.dot_dimension_numbers<[1], [0], [0], [1], [0, 0, 1, 1], [], []>} : vector<8x16xbf16>, vector<16x32xbf16>, vector<8x32xf32> -> vector<8x32xf32>
    %88 = arith.addf %82, %87 : vector<8x32xf32>
    %c2_70 = arith.constant 2 : index
    %c0_71 = arith.constant 0 : index
    %89 = tpu.strided_load %arg40[%c2_70, %c0_71] {strides = array<i32: 2, 1>} : memref<72x64xf32, #tpu.memory_space<vmem>>, vector<8x16xf32>
    %90 = arith.truncf %89 : vector<8x16xf32> to vector<8x16xbf16>
    %c2_72 = arith.constant 2 : index
    %c0_73 = arith.constant 0 : index
    %c0_74 = arith.constant 0 : index
    %91 = vector.load %arg5[%c2_72, %c0_73, %c0_74] : memref<3x16x32xbf16, #tpu.memory_space<vmem>>, vector<1x16x32xbf16>
    %92 = vector.shape_cast %91 : vector<1x16x32xbf16> to vector<16x32xbf16>
    %cst_75 = arith.constant dense<0.000000e+00> : vector<8x32xf32>
    %93 = tpu.matmul %90, %92, %cst_75 {dimension_numbers = #tpu.dot_dimension_numbers<[1], [0], [0], [1], [0, 0, 1, 1], [], []>} : vector<8x16xbf16>, vector<16x32xbf16>, vector<8x32xf32> -> vector<8x32xf32>
    %94 = arith.addf %88, %93 : vector<8x32xf32>
    %c0_76 = arith.constant 0 : index
    %c0_77 = arith.constant 0 : index
    %95 = vector.load %arg6[%c0_76, %c0_77] : memref<1x32xf32, #tpu.memory_space<vmem>>, vector<1x32xf32>
    %96 = vector.broadcast %95 : vector<1x32xf32> to vector<8x32xf32>
    %97 = arith.addf %94, %96 : vector<8x32xf32>
    %cst_78 = arith.constant 0.000000e+00 : f32
    %98 = vector.broadcast %cst_78 : f32 to vector<8x32xf32>
    %99 = arith.cmpf oge, %97, %98 : vector<8x32xf32>
    %100 = vector.broadcast %72 : f32 to vector<8x32xf32>
    %101 = arith.mulf %100, %97 : vector<8x32xf32>
    %102 = arith.select %99, %97, %101 : vector<8x32xi1>, vector<8x32xf32>
    %c1_79 = arith.constant 1 : index
    %c0_80 = arith.constant 0 : index
    %103 = tpu.strided_load %arg40[%c1_79, %c0_80] {strides = array<i32: 2, 1>} : memref<72x64xf32, #tpu.memory_space<vmem>>, vector<8x16xf32>
    %104 = arith.truncf %103 : vector<8x16xf32> to vector<8x16xbf16>
    %c0_81 = arith.constant 0 : index
    %c0_82 = arith.constant 0 : index
    %c0_83 = arith.constant 0 : index
    %105 = vector.load %arg9[%c0_81, %c0_82, %c0_83] : memref<1x16x32xbf16, #tpu.memory_space<vmem>>, vector<1x16x32xbf16>
    %106 = vector.shape_cast %105 : vector<1x16x32xbf16> to vector<16x32xbf16>
    %cst_84 = arith.constant dense<0.000000e+00> : vector<8x32xf32>
    %107 = tpu.matmul %104, %106, %cst_84 {dimension_numbers = #tpu.dot_dimension_numbers<[1], [0], [0], [1], [0, 0, 1, 1], [], []>} : vector<8x16xbf16>, vector<16x32xbf16>, vector<8x32xf32> -> vector<8x32xf32>
    %c0_85 = arith.constant 0 : index
    %c0_86 = arith.constant 0 : index
    %108 = vector.load %arg10[%c0_85, %c0_86] : memref<1x32xf32, #tpu.memory_space<vmem>>, vector<1x32xf32>
    %109 = vector.broadcast %108 : vector<1x32xf32> to vector<8x32xf32>
    %110 = arith.addf %107, %109 : vector<8x32xf32>
    %cst_87 = arith.constant 0.000000e+00 : f32
    %111 = vector.broadcast %cst_87 : f32 to vector<10x32xf32>
    %c0_88 = arith.constant 0 : index
    %c0_89 = arith.constant 0 : index
    %112 = vector.load %arg40[%c0_88, %c0_89] : memref<72x64xf32, #tpu.memory_space<vmem>>, vector<10x32xf32>
    tpu.vector_store %arg40[%c0_88, %c0_89], %111 {strides = array<i32>} : memref<72x64xf32, #tpu.memory_space<vmem>>, vector<10x32xf32>,
    %c1_90 = arith.constant 1 : index
    %c0_91 = arith.constant 0 : index
    %113 = vector.load %arg40[%c1_90, %c0_91] : memref<72x64xf32, #tpu.memory_space<vmem>>, vector<8x32xf32>
    tpu.vector_store %arg40[%c1_90, %c0_91], %102 {strides = array<i32>} : memref<72x64xf32, #tpu.memory_space<vmem>>, vector<8x32xf32>,
    %cst_92 = arith.constant 0.000000e+00 : f32
    %114 = vector.broadcast %cst_92 : f32 to vector<8x32xf32>
    %c0_93 = arith.constant 0 : index
    %c0_94 = arith.constant 0 : index
    %115 = vector.load %arg40[%c0_93, %c0_94] : memref<72x64xf32, #tpu.memory_space<vmem>>, vector<8x32xf32>
    %116 = arith.truncf %115 : vector<8x32xf32> to vector<8x32xbf16>
    %c0_95 = arith.constant 0 : index
    %c0_96 = arith.constant 0 : index
    %c0_97 = arith.constant 0 : index
    %117 = vector.load %arg7[%c0_95, %c0_96, %c0_97] : memref<3x32x32xbf16, #tpu.memory_space<vmem>>, vector<1x32x32xbf16>
    %118 = vector.shape_cast %117 : vector<1x32x32xbf16> to vector<32x32xbf16>
    %cst_98 = arith.constant dense<0.000000e+00> : vector<8x32xf32>
    %119 = tpu.matmul %116, %118, %cst_98 {dimension_numbers = #tpu.dot_dimension_numbers<[1], [0], [0], [1], [0, 0, 1, 1], [], []>} : vector<8x32xbf16>, vector<32x32xbf16>, vector<8x32xf32> -> vector<8x32xf32>
    %120 = arith.addf %114, %119 : vector<8x32xf32>
    %c1_99 = arith.constant 1 : index
    %c0_100 = arith.constant 0 : index
    %121 = vector.load %arg40[%c1_99, %c0_100] : memref<72x64xf32, #tpu.memory_space<vmem>>, vector<8x32xf32>
    %122 = arith.truncf %121 : vector<8x32xf32> to vector<8x32xbf16>
    %c1_101 = arith.constant 1 : index
    %c0_102 = arith.constant 0 : index
    %c0_103 = arith.constant 0 : index
    %123 = vector.load %arg7[%c1_101, %c0_102, %c0_103] : memref<3x32x32xbf16, #tpu.memory_space<vmem>>, vector<1x32x32xbf16>
    %124 = vector.shape_cast %123 : vector<1x32x32xbf16> to vector<32x32xbf16>
    %cst_104 = arith.constant dense<0.000000e+00> : vector<8x32xf32>
    %125 = tpu.matmul %122, %124, %cst_104 {dimension_numbers = #tpu.dot_dimension_numbers<[1], [0], [0], [1], [0, 0, 1, 1], [], []>} : vector<8x32xbf16>, vector<32x32xbf16>, vector<8x32xf32> -> vector<8x32xf32>
    %126 = arith.addf %120, %125 : vector<8x32xf32>
    %c2_105 = arith.constant 2 : index
    %c0_106 = arith.constant 0 : index
    %127 = vector.load %arg40[%c2_105, %c0_106] : memref<72x64xf32, #tpu.memory_space<vmem>>, vector<8x32xf32>
    %128 = arith.truncf %127 : vector<8x32xf32> to vector<8x32xbf16>
    %c2_107 = arith.constant 2 : index
    %c0_108 = arith.constant 0 : index
    %c0_109 = arith.constant 0 : index
    %129 = vector.load %arg7[%c2_107, %c0_108, %c0_109] : memref<3x32x32xbf16, #tpu.memory_space<vmem>>, vector<1x32x32xbf16>
    %130 = vector.shape_cast %129 : vector<1x32x32xbf16> to vector<32x32xbf16>
    %cst_110 = arith.constant dense<0.000000e+00> : vector<8x32xf32>
    %131 = tpu.matmul %128, %130, %cst_110 {dimension_numbers = #tpu.dot_dimension_numbers<[1], [0], [0], [1], [0, 0, 1, 1], [], []>} : vector<8x32xbf16>, vector<32x32xbf16>, vector<8x32xf32> -> vector<8x32xf32>
    %132 = arith.addf %126, %131 : vector<8x32xf32>
    %c0_111 = arith.constant 0 : index
    %c0_112 = arith.constant 0 : index
    %133 = vector.load %arg8[%c0_111, %c0_112] : memref<1x32xf32, #tpu.memory_space<vmem>>, vector<1x32xf32>
    %134 = vector.broadcast %133 : vector<1x32xf32> to vector<8x32xf32>
    %135 = arith.addf %132, %134 : vector<8x32xf32>
    %136 = arith.addf %135, %110 : vector<8x32xf32>
    %cst_113 = arith.constant 0.000000e+00 : f32
    %137 = vector.broadcast %cst_113 : f32 to vector<8x32xf32>
    %138 = arith.cmpf oge, %136, %137 : vector<8x32xf32>
    %139 = vector.broadcast %72 : f32 to vector<8x32xf32>
    %140 = arith.mulf %139, %136 : vector<8x32xf32>
    %141 = arith.select %138, %136, %140 : vector<8x32xi1>, vector<8x32xf32>
    %c2_114 = arith.constant 2 : index
    %142 = memref.load %arg1[%c2_114] : memref<10xf32, #tpu.memory_space<smem>>
    %cst_115 = arith.constant 0.000000e+00 : f32
    %143 = vector.broadcast %cst_115 : f32 to vector<10x32xf32>
    %c0_116 = arith.constant 0 : index
    %c0_117 = arith.constant 0 : index
    %144 = vector.load %arg40[%c0_116, %c0_117] : memref<72x64xf32, #tpu.memory_space<vmem>>, vector<10x32xf32>
    tpu.vector_store %arg40[%c0_116, %c0_117], %143 {strides = array<i32>} : memref<72x64xf32, #tpu.memory_space<vmem>>, vector<10x32xf32>,
    %c1_118 = arith.constant 1 : index
    %c0_119 = arith.constant 0 : index
    %145 = vector.load %arg40[%c1_118, %c0_119] : memref<72x64xf32, #tpu.memory_space<vmem>>, vector<8x32xf32>
    tpu.vector_store %arg40[%c1_118, %c0_119], %141 {strides = array<i32>} : memref<72x64xf32, #tpu.memory_space<vmem>>, vector<8x32xf32>,
    %cst_120 = arith.constant 0.000000e+00 : f32
    %146 = vector.broadcast %cst_120 : f32 to vector<8x32xf32>
    %c0_121 = arith.constant 0 : index
    %c0_122 = arith.constant 0 : index
    %147 = vector.load %arg40[%c0_121, %c0_122] : memref<72x64xf32, #tpu.memory_space<vmem>>, vector<8x32xf32>
    %148 = arith.truncf %147 : vector<8x32xf32> to vector<8x32xbf16>
    %c0_123 = arith.constant 0 : index
    %c0_124 = arith.constant 0 : index
    %c0_125 = arith.constant 0 : index
    %149 = vector.load %arg11[%c0_123, %c0_124, %c0_125] : memref<3x32x32xbf16, #tpu.memory_space<vmem>>, vector<1x32x32xbf16>
    %150 = vector.shape_cast %149 : vector<1x32x32xbf16> to vector<32x32xbf16>
    %cst_126 = arith.constant dense<0.000000e+00> : vector<8x32xf32>
    %151 = tpu.matmul %148, %150, %cst_126 {dimension_numbers = #tpu.dot_dimension_numbers<[1], [0], [0], [1], [0, 0, 1, 1], [], []>} : vector<8x32xbf16>, vector<32x32xbf16>, vector<8x32xf32> -> vector<8x32xf32>
    %152 = arith.addf %146, %151 : vector<8x32xf32>
    %c1_127 = arith.constant 1 : index
    %c0_128 = arith.constant 0 : index
    %153 = vector.load %arg40[%c1_127, %c0_128] : memref<72x64xf32, #tpu.memory_space<vmem>>, vector<8x32xf32>
    %154 = arith.truncf %153 : vector<8x32xf32> to vector<8x32xbf16>
    %c1_129 = arith.constant 1 : index
    %c0_130 = arith.constant 0 : index
    %c0_131 = arith.constant 0 : index
    %155 = vector.load %arg11[%c1_129, %c0_130, %c0_131] : memref<3x32x32xbf16, #tpu.memory_space<vmem>>, vector<1x32x32xbf16>
    %156 = vector.shape_cast %155 : vector<1x32x32xbf16> to vector<32x32xbf16>
    %cst_132 = arith.constant dense<0.000000e+00> : vector<8x32xf32>
    %157 = tpu.matmul %154, %156, %cst_132 {dimension_numbers = #tpu.dot_dimension_numbers<[1], [0], [0], [1], [0, 0, 1, 1], [], []>} : vector<8x32xbf16>, vector<32x32xbf16>, vector<8x32xf32> -> vector<8x32xf32>
    %158 = arith.addf %152, %157 : vector<8x32xf32>
    %c2_133 = arith.constant 2 : index
    %c0_134 = arith.constant 0 : index
    %159 = vector.load %arg40[%c2_133, %c0_134] : memref<72x64xf32, #tpu.memory_space<vmem>>, vector<8x32xf32>
    %160 = arith.truncf %159 : vector<8x32xf32> to vector<8x32xbf16>
    %c2_135 = arith.constant 2 : index
    %c0_136 = arith.constant 0 : index
    %c0_137 = arith.constant 0 : index
    %161 = vector.load %arg11[%c2_135, %c0_136, %c0_137] : memref<3x32x32xbf16, #tpu.memory_space<vmem>>, vector<1x32x32xbf16>
    %162 = vector.shape_cast %161 : vector<1x32x32xbf16> to vector<32x32xbf16>
    %cst_138 = arith.constant dense<0.000000e+00> : vector<8x32xf32>
    %163 = tpu.matmul %160, %162, %cst_138 {dimension_numbers = #tpu.dot_dimension_numbers<[1], [0], [0], [1], [0, 0, 1, 1], [], []>} : vector<8x32xbf16>, vector<32x32xbf16>, vector<8x32xf32> -> vector<8x32xf32>
    %164 = arith.addf %158, %163 : vector<8x32xf32>
    %c0_139 = arith.constant 0 : index
    %c0_140 = arith.constant 0 : index
    %165 = vector.load %arg12[%c0_139, %c0_140] : memref<1x32xf32, #tpu.memory_space<vmem>>, vector<1x32xf32>
    %166 = vector.broadcast %165 : vector<1x32xf32> to vector<8x32xf32>
    %167 = arith.addf %164, %166 : vector<8x32xf32>
    %cst_141 = arith.constant 0.000000e+00 : f32
    %168 = vector.broadcast %cst_141 : f32 to vector<8x32xf32>
    %169 = arith.cmpf oge, %167, %168 : vector<8x32xf32>
    %170 = vector.broadcast %142 : f32 to vector<8x32xf32>
    %171 = arith.mulf %170, %167 : vector<8x32xf32>
    %172 = arith.select %169, %167, %171 : vector<8x32xi1>, vector<8x32xf32>
    %cst_142 = arith.constant 0.000000e+00 : f32
    %173 = vector.broadcast %cst_142 : f32 to vector<10x32xf32>
    %c0_143 = arith.constant 0 : index
    %c0_144 = arith.constant 0 : index
    %174 = vector.load %arg40[%c0_143, %c0_144] : memref<72x64xf32, #tpu.memory_space<vmem>>, vector<10x32xf32>
    tpu.vector_store %arg40[%c0_143, %c0_144], %173 {strides = array<i32>} : memref<72x64xf32, #tpu.memory_space<vmem>>, vector<10x32xf32>,
    %c1_145 = arith.constant 1 : index
    %c0_146 = arith.constant 0 : index
    %175 = vector.load %arg40[%c1_145, %c0_146] : memref<72x64xf32, #tpu.memory_space<vmem>>, vector<8x32xf32>
    tpu.vector_store %arg40[%c1_145, %c0_146], %172 {strides = array<i32>} : memref<72x64xf32, #tpu.memory_space<vmem>>, vector<8x32xf32>,
    %cst_147 = arith.constant 0.000000e+00 : f32
    %176 = vector.broadcast %cst_147 : f32 to vector<8x32xf32>
    %c0_148 = arith.constant 0 : index
    %c0_149 = arith.constant 0 : index
    %177 = vector.load %arg40[%c0_148, %c0_149] : memref<72x64xf32, #tpu.memory_space<vmem>>, vector<8x32xf32>
    %178 = arith.truncf %177 : vector<8x32xf32> to vector<8x32xbf16>
    %c0_150 = arith.constant 0 : index
    %c0_151 = arith.constant 0 : index
    %c0_152 = arith.constant 0 : index
    %179 = vector.load %arg13[%c0_150, %c0_151, %c0_152] : memref<3x32x32xbf16, #tpu.memory_space<vmem>>, vector<1x32x32xbf16>
    %180 = vector.shape_cast %179 : vector<1x32x32xbf16> to vector<32x32xbf16>
    %cst_153 = arith.constant dense<0.000000e+00> : vector<8x32xf32>
    %181 = tpu.matmul %178, %180, %cst_153 {dimension_numbers = #tpu.dot_dimension_numbers<[1], [0], [0], [1], [0, 0, 1, 1], [], []>} : vector<8x32xbf16>, vector<32x32xbf16>, vector<8x32xf32> -> vector<8x32xf32>
    %182 = arith.addf %176, %181 : vector<8x32xf32>
    %c1_154 = arith.constant 1 : index
    %c0_155 = arith.constant 0 : index
    %183 = vector.load %arg40[%c1_154, %c0_155] : memref<72x64xf32, #tpu.memory_space<vmem>>, vector<8x32xf32>
    %184 = arith.truncf %183 : vector<8x32xf32> to vector<8x32xbf16>
    %c1_156 = arith.constant 1 : index
    %c0_157 = arith.constant 0 : index
    %c0_158 = arith.constant 0 : index
    %185 = vector.load %arg13[%c1_156, %c0_157, %c0_158] : memref<3x32x32xbf16, #tpu.memory_space<vmem>>, vector<1x32x32xbf16>
    %186 = vector.shape_cast %185 : vector<1x32x32xbf16> to vector<32x32xbf16>
    %cst_159 = arith.constant dense<0.000000e+00> : vector<8x32xf32>
    %187 = tpu.matmul %184, %186, %cst_159 {dimension_numbers = #tpu.dot_dimension_numbers<[1], [0], [0], [1], [0, 0, 1, 1], [], []>} : vector<8x32xbf16>, vector<32x32xbf16>, vector<8x32xf32> -> vector<8x32xf32>
    %188 = arith.addf %182, %187 : vector<8x32xf32>
    %c2_160 = arith.constant 2 : index
    %c0_161 = arith.constant 0 : index
    %189 = vector.load %arg40[%c2_160, %c0_161] : memref<72x64xf32, #tpu.memory_space<vmem>>, vector<8x32xf32>
    %190 = arith.truncf %189 : vector<8x32xf32> to vector<8x32xbf16>
    %c2_162 = arith.constant 2 : index
    %c0_163 = arith.constant 0 : index
    %c0_164 = arith.constant 0 : index
    %191 = vector.load %arg13[%c2_162, %c0_163, %c0_164] : memref<3x32x32xbf16, #tpu.memory_space<vmem>>, vector<1x32x32xbf16>
    %192 = vector.shape_cast %191 : vector<1x32x32xbf16> to vector<32x32xbf16>
    %cst_165 = arith.constant dense<0.000000e+00> : vector<8x32xf32>
    %193 = tpu.matmul %190, %192, %cst_165 {dimension_numbers = #tpu.dot_dimension_numbers<[1], [0], [0], [1], [0, 0, 1, 1], [], []>} : vector<8x32xbf16>, vector<32x32xbf16>, vector<8x32xf32> -> vector<8x32xf32>
    %194 = arith.addf %188, %193 : vector<8x32xf32>
    %c0_166 = arith.constant 0 : index
    %c0_167 = arith.constant 0 : index
    %195 = vector.load %arg14[%c0_166, %c0_167] : memref<1x32xf32, #tpu.memory_space<vmem>>, vector<1x32xf32>
    %196 = vector.broadcast %195 : vector<1x32xf32> to vector<8x32xf32>
    %197 = arith.addf %194, %196 : vector<8x32xf32>
    %198 = arith.addf %197, %141 : vector<8x32xf32>
    %cst_168 = arith.constant 0.000000e+00 : f32
    %199 = vector.broadcast %cst_168 : f32 to vector<8x32xf32>
    %200 = arith.cmpf oge, %198, %199 : vector<8x32xf32>
    %201 = vector.broadcast %142 : f32 to vector<8x32xf32>
    %202 = arith.mulf %201, %198 : vector<8x32xf32>
    %203 = arith.select %200, %198, %202 : vector<8x32xi1>, vector<8x32xf32>
    %c3_169 = arith.constant 3 : index
    %204 = memref.load %arg1[%c3_169] : memref<10xf32, #tpu.memory_space<smem>>
    %cst_170 = arith.constant 0.000000e+00 : f32
    %205 = vector.broadcast %cst_170 : f32 to vector<10x32xf32>
    %c0_171 = arith.constant 0 : index
    %c0_172 = arith.constant 0 : index
    %206 = vector.load %arg40[%c0_171, %c0_172] : memref<72x64xf32, #tpu.memory_space<vmem>>, vector<10x32xf32>
    tpu.vector_store %arg40[%c0_171, %c0_172], %205 {strides = array<i32>} : memref<72x64xf32, #tpu.memory_space<vmem>>, vector<10x32xf32>,
    %c1_173 = arith.constant 1 : index
    %c0_174 = arith.constant 0 : index
    %207 = vector.load %arg40[%c1_173, %c0_174] : memref<72x64xf32, #tpu.memory_space<vmem>>, vector<8x32xf32>
    tpu.vector_store %arg40[%c1_173, %c0_174], %203 {strides = array<i32>} : memref<72x64xf32, #tpu.memory_space<vmem>>, vector<8x32xf32>,
    %cst_175 = arith.constant 0.000000e+00 : f32
    %208 = vector.broadcast %cst_175 : f32 to vector<8x32xf32>
    %c0_176 = arith.constant 0 : index
    %c0_177 = arith.constant 0 : index
    %209 = vector.load %arg40[%c0_176, %c0_177] : memref<72x64xf32, #tpu.memory_space<vmem>>, vector<8x32xf32>
    %210 = arith.truncf %209 : vector<8x32xf32> to vector<8x32xbf16>
    %c0_178 = arith.constant 0 : index
    %c0_179 = arith.constant 0 : index
    %c0_180 = arith.constant 0 : index
    %211 = vector.load %arg15[%c0_178, %c0_179, %c0_180] : memref<3x32x32xbf16, #tpu.memory_space<vmem>>, vector<1x32x32xbf16>
    %212 = vector.shape_cast %211 : vector<1x32x32xbf16> to vector<32x32xbf16>
    %cst_181 = arith.constant dense<0.000000e+00> : vector<8x32xf32>
    %213 = tpu.matmul %210, %212, %cst_181 {dimension_numbers = #tpu.dot_dimension_numbers<[1], [0], [0], [1], [0, 0, 1, 1], [], []>} : vector<8x32xbf16>, vector<32x32xbf16>, vector<8x32xf32> -> vector<8x32xf32>
    %214 = arith.addf %208, %213 : vector<8x32xf32>
    %c1_182 = arith.constant 1 : index
    %c0_183 = arith.constant 0 : index
    %215 = vector.load %arg40[%c1_182, %c0_183] : memref<72x64xf32, #tpu.memory_space<vmem>>, vector<8x32xf32>
    %216 = arith.truncf %215 : vector<8x32xf32> to vector<8x32xbf16>
    %c1_184 = arith.constant 1 : index
    %c0_185 = arith.constant 0 : index
    %c0_186 = arith.constant 0 : index
    %217 = vector.load %arg15[%c1_184, %c0_185, %c0_186] : memref<3x32x32xbf16, #tpu.memory_space<vmem>>, vector<1x32x32xbf16>
    %218 = vector.shape_cast %217 : vector<1x32x32xbf16> to vector<32x32xbf16>
    %cst_187 = arith.constant dense<0.000000e+00> : vector<8x32xf32>
    %219 = tpu.matmul %216, %218, %cst_187 {dimension_numbers = #tpu.dot_dimension_numbers<[1], [0], [0], [1], [0, 0, 1, 1], [], []>} : vector<8x32xbf16>, vector<32x32xbf16>, vector<8x32xf32> -> vector<8x32xf32>
    %220 = arith.addf %214, %219 : vector<8x32xf32>
    %c2_188 = arith.constant 2 : index
    %c0_189 = arith.constant 0 : index
    %221 = vector.load %arg40[%c2_188, %c0_189] : memref<72x64xf32, #tpu.memory_space<vmem>>, vector<8x32xf32>
    %222 = arith.truncf %221 : vector<8x32xf32> to vector<8x32xbf16>
    %c2_190 = arith.constant 2 : index
    %c0_191 = arith.constant 0 : index
    %c0_192 = arith.constant 0 : index
    %223 = vector.load %arg15[%c2_190, %c0_191, %c0_192] : memref<3x32x32xbf16, #tpu.memory_space<vmem>>, vector<1x32x32xbf16>
    %224 = vector.shape_cast %223 : vector<1x32x32xbf16> to vector<32x32xbf16>
    %cst_193 = arith.constant dense<0.000000e+00> : vector<8x32xf32>
    %225 = tpu.matmul %222, %224, %cst_193 {dimension_numbers = #tpu.dot_dimension_numbers<[1], [0], [0], [1], [0, 0, 1, 1], [], []>} : vector<8x32xbf16>, vector<32x32xbf16>, vector<8x32xf32> -> vector<8x32xf32>
    %226 = arith.addf %220, %225 : vector<8x32xf32>
    %c0_194 = arith.constant 0 : index
    %c0_195 = arith.constant 0 : index
    %227 = vector.load %arg16[%c0_194, %c0_195] : memref<1x32xf32, #tpu.memory_space<vmem>>, vector<1x32xf32>
    %228 = vector.broadcast %227 : vector<1x32xf32> to vector<8x32xf32>
    %229 = arith.addf %226, %228 : vector<8x32xf32>
    %cst_196 = arith.constant 0.000000e+00 : f32
    %230 = vector.broadcast %cst_196 : f32 to vector<8x32xf32>
    %231 = arith.cmpf oge, %229, %230 : vector<8x32xf32>
    %232 = vector.broadcast %204 : f32 to vector<8x32xf32>
    %233 = arith.mulf %232, %229 : vector<8x32xf32>
    %234 = arith.select %231, %229, %233 : vector<8x32xi1>, vector<8x32xf32>
    %cst_197 = arith.constant 0.000000e+00 : f32
    %235 = vector.broadcast %cst_197 : f32 to vector<10x32xf32>
    %c0_198 = arith.constant 0 : index
    %c0_199 = arith.constant 0 : index
    %236 = vector.load %arg40[%c0_198, %c0_199] : memref<72x64xf32, #tpu.memory_space<vmem>>, vector<10x32xf32>
    tpu.vector_store %arg40[%c0_198, %c0_199], %235 {strides = array<i32>} : memref<72x64xf32, #tpu.memory_space<vmem>>, vector<10x32xf32>,
    %c1_200 = arith.constant 1 : index
    %c0_201 = arith.constant 0 : index
    %237 = vector.load %arg40[%c1_200, %c0_201] : memref<72x64xf32, #tpu.memory_space<vmem>>, vector<8x32xf32>
    tpu.vector_store %arg40[%c1_200, %c0_201], %234 {strides = array<i32>} : memref<72x64xf32, #tpu.memory_space<vmem>>, vector<8x32xf32>,
    %cst_202 = arith.constant 0.000000e+00 : f32
    %238 = vector.broadcast %cst_202 : f32 to vector<8x32xf32>
    %c0_203 = arith.constant 0 : index
    %c0_204 = arith.constant 0 : index
    %239 = vector.load %arg40[%c0_203, %c0_204] : memref<72x64xf32, #tpu.memory_space<vmem>>, vector<8x32xf32>
    %240 = arith.truncf %239 : vector<8x32xf32> to vector<8x32xbf16>
    %c0_205 = arith.constant 0 : index
    %c0_206 = arith.constant 0 : index
    %c0_207 = arith.constant 0 : index
    %241 = vector.load %arg17[%c0_205, %c0_206, %c0_207] : memref<3x32x32xbf16, #tpu.memory_space<vmem>>, vector<1x32x32xbf16>
    %242 = vector.shape_cast %241 : vector<1x32x32xbf16> to vector<32x32xbf16>
    %cst_208 = arith.constant dense<0.000000e+00> : vector<8x32xf32>
    %243 = tpu.matmul %240, %242, %cst_208 {dimension_numbers = #tpu.dot_dimension_numbers<[1], [0], [0], [1], [0, 0, 1, 1], [], []>} : vector<8x32xbf16>, vector<32x32xbf16>, vector<8x32xf32> -> vector<8x32xf32>
    %244 = arith.addf %238, %243 : vector<8x32xf32>
    %c1_209 = arith.constant 1 : index
    %c0_210 = arith.constant 0 : index
    %245 = vector.load %arg40[%c1_209, %c0_210] : memref<72x64xf32, #tpu.memory_space<vmem>>, vector<8x32xf32>
    %246 = arith.truncf %245 : vector<8x32xf32> to vector<8x32xbf16>
    %c1_211 = arith.constant 1 : index
    %c0_212 = arith.constant 0 : index
    %c0_213 = arith.constant 0 : index
    %247 = vector.load %arg17[%c1_211, %c0_212, %c0_213] : memref<3x32x32xbf16, #tpu.memory_space<vmem>>, vector<1x32x32xbf16>
    %248 = vector.shape_cast %247 : vector<1x32x32xbf16> to vector<32x32xbf16>
    %cst_214 = arith.constant dense<0.000000e+00> : vector<8x32xf32>
    %249 = tpu.matmul %246, %248, %cst_214 {dimension_numbers = #tpu.dot_dimension_numbers<[1], [0], [0], [1], [0, 0, 1, 1], [], []>} : vector<8x32xbf16>, vector<32x32xbf16>, vector<8x32xf32> -> vector<8x32xf32>
    %250 = arith.addf %244, %249 : vector<8x32xf32>
    %c2_215 = arith.constant 2 : index
    %c0_216 = arith.constant 0 : index
    %251 = vector.load %arg40[%c2_215, %c0_216] : memref<72x64xf32, #tpu.memory_space<vmem>>, vector<8x32xf32>
    %252 = arith.truncf %251 : vector<8x32xf32> to vector<8x32xbf16>
    %c2_217 = arith.constant 2 : index
    %c0_218 = arith.constant 0 : index
    %c0_219 = arith.constant 0 : index
    %253 = vector.load %arg17[%c2_217, %c0_218, %c0_219] : memref<3x32x32xbf16, #tpu.memory_space<vmem>>, vector<1x32x32xbf16>
    %254 = vector.shape_cast %253 : vector<1x32x32xbf16> to vector<32x32xbf16>
    %cst_220 = arith.constant dense<0.000000e+00> : vector<8x32xf32>
    %255 = tpu.matmul %252, %254, %cst_220 {dimension_numbers = #tpu.dot_dimension_numbers<[1], [0], [0], [1], [0, 0, 1, 1], [], []>} : vector<8x32xbf16>, vector<32x32xbf16>, vector<8x32xf32> -> vector<8x32xf32>
    %256 = arith.addf %250, %255 : vector<8x32xf32>
    %c0_221 = arith.constant 0 : index
    %c0_222 = arith.constant 0 : index
    %257 = vector.load %arg18[%c0_221, %c0_222] : memref<1x32xf32, #tpu.memory_space<vmem>>, vector<1x32xf32>
    %258 = vector.broadcast %257 : vector<1x32xf32> to vector<8x32xf32>
    %259 = arith.addf %256, %258 : vector<8x32xf32>
    %260 = arith.addf %259, %203 : vector<8x32xf32>
    %cst_223 = arith.constant 0.000000e+00 : f32
    %261 = vector.broadcast %cst_223 : f32 to vector<8x32xf32>
    %262 = arith.cmpf oge, %260, %261 : vector<8x32xf32>
    %263 = vector.broadcast %204 : f32 to vector<8x32xf32>
    %264 = arith.mulf %263, %260 : vector<8x32xf32>
    %265 = arith.select %262, %260, %264 : vector<8x32xi1>, vector<8x32xf32>
    %c4_224 = arith.constant 4 : index
    %266 = memref.load %arg1[%c4_224] : memref<10xf32, #tpu.memory_space<smem>>
    %cst_225 = arith.constant 0.000000e+00 : f32
    %267 = vector.broadcast %cst_225 : f32 to vector<10x32xf32>
    %c0_226 = arith.constant 0 : index
    %c0_227 = arith.constant 0 : index
    %268 = vector.load %arg40[%c0_226, %c0_227] : memref<72x64xf32, #tpu.memory_space<vmem>>, vector<10x32xf32>
    tpu.vector_store %arg40[%c0_226, %c0_227], %267 {strides = array<i32>} : memref<72x64xf32, #tpu.memory_space<vmem>>, vector<10x32xf32>,
    %c1_228 = arith.constant 1 : index
    %c0_229 = arith.constant 0 : index
    %269 = vector.load %arg40[%c1_228, %c0_229] : memref<72x64xf32, #tpu.memory_space<vmem>>, vector<8x32xf32>
    tpu.vector_store %arg40[%c1_228, %c0_229], %265 {strides = array<i32>} : memref<72x64xf32, #tpu.memory_space<vmem>>, vector<8x32xf32>,
    %cst_230 = arith.constant 0.000000e+00 : f32
    %270 = vector.broadcast %cst_230 : f32 to vector<4x64xf32>
    %c0_231 = arith.constant 0 : index
    %c0_232 = arith.constant 0 : index
    %271 = tpu.strided_load %arg40[%c0_231, %c0_232] {strides = array<i32: 2, 1>} : memref<72x64xf32, #tpu.memory_space<vmem>>, vector<4x32xf32>
    %272 = arith.truncf %271 : vector<4x32xf32> to vector<4x32xbf16>
    %c0_233 = arith.constant 0 : index
    %c0_234 = arith.constant 0 : index
    %c0_235 = arith.constant 0 : index
    %273 = vector.load %arg19[%c0_233, %c0_234, %c0_235] : memref<3x32x64xbf16, #tpu.memory_space<vmem>>, vector<1x32x64xbf16>
    %274 = vector.shape_cast %273 : vector<1x32x64xbf16> to vector<32x64xbf16>
    %cst_236 = arith.constant dense<0.000000e+00> : vector<4x64xf32>
    %275 = tpu.matmul %272, %274, %cst_236 {dimension_numbers = #tpu.dot_dimension_numbers<[1], [0], [0], [1], [0, 0, 1, 1], [], []>} : vector<4x32xbf16>, vector<32x64xbf16>, vector<4x64xf32> -> vector<4x64xf32>
    %276 = arith.addf %270, %275 : vector<4x64xf32>
    %c1_237 = arith.constant 1 : index
    %c0_238 = arith.constant 0 : index
    %277 = tpu.strided_load %arg40[%c1_237, %c0_238] {strides = array<i32: 2, 1>} : memref<72x64xf32, #tpu.memory_space<vmem>>, vector<4x32xf32>
    %278 = arith.truncf %277 : vector<4x32xf32> to vector<4x32xbf16>
    %c1_239 = arith.constant 1 : index
    %c0_240 = arith.constant 0 : index
    %c0_241 = arith.constant 0 : index
    %279 = vector.load %arg19[%c1_239, %c0_240, %c0_241] : memref<3x32x64xbf16, #tpu.memory_space<vmem>>, vector<1x32x64xbf16>
    %280 = vector.shape_cast %279 : vector<1x32x64xbf16> to vector<32x64xbf16>
    %cst_242 = arith.constant dense<0.000000e+00> : vector<4x64xf32>
    %281 = tpu.matmul %278, %280, %cst_242 {dimension_numbers = #tpu.dot_dimension_numbers<[1], [0], [0], [1], [0, 0, 1, 1], [], []>} : vector<4x32xbf16>, vector<32x64xbf16>, vector<4x64xf32> -> vector<4x64xf32>
    %282 = arith.addf %276, %281 : vector<4x64xf32>
    %c2_243 = arith.constant 2 : index
    %c0_244 = arith.constant 0 : index
    %283 = tpu.strided_load %arg40[%c2_243, %c0_244] {strides = array<i32: 2, 1>} : memref<72x64xf32, #tpu.memory_space<vmem>>, vector<4x32xf32>
    %284 = arith.truncf %283 : vector<4x32xf32> to vector<4x32xbf16>
    %c2_245 = arith.constant 2 : index
    %c0_246 = arith.constant 0 : index
    %c0_247 = arith.constant 0 : index
    %285 = vector.load %arg19[%c2_245, %c0_246, %c0_247] : memref<3x32x64xbf16, #tpu.memory_space<vmem>>, vector<1x32x64xbf16>
    %286 = vector.shape_cast %285 : vector<1x32x64xbf16> to vector<32x64xbf16>
    %cst_248 = arith.constant dense<0.000000e+00> : vector<4x64xf32>
    %287 = tpu.matmul %284, %286, %cst_248 {dimension_numbers = #tpu.dot_dimension_numbers<[1], [0], [0], [1], [0, 0, 1, 1], [], []>} : vector<4x32xbf16>, vector<32x64xbf16>, vector<4x64xf32> -> vector<4x64xf32>
    %288 = arith.addf %282, %287 : vector<4x64xf32>
    %c0_249 = arith.constant 0 : index
    %c0_250 = arith.constant 0 : index
    %289 = vector.load %arg20[%c0_249, %c0_250] : memref<1x64xf32, #tpu.memory_space<vmem>>, vector<1x64xf32>
    %290 = vector.broadcast %289 : vector<1x64xf32> to vector<4x64xf32>
    %291 = arith.addf %288, %290 : vector<4x64xf32>
    %cst_251 = arith.constant 0.000000e+00 : f32
    %292 = vector.broadcast %cst_251 : f32 to vector<4x64xf32>
    %293 = arith.cmpf oge, %291, %292 : vector<4x64xf32>
    %294 = vector.broadcast %266 : f32 to vector<4x64xf32>
    %295 = arith.mulf %294, %291 : vector<4x64xf32>
    %296 = arith.select %293, %291, %295 : vector<4x64xi1>, vector<4x64xf32>
    %c1_252 = arith.constant 1 : index
    %c0_253 = arith.constant 0 : index
    %297 = tpu.strided_load %arg40[%c1_252, %c0_253] {strides = array<i32: 2, 1>} : memref<72x64xf32, #tpu.memory_space<vmem>>, vector<4x32xf32>
    %298 = arith.truncf %297 : vector<4x32xf32> to vector<4x32xbf16>
    %c0_254 = arith.constant 0 : index
    %c0_255 = arith.constant 0 : index
    %c0_256 = arith.constant 0 : index
    %299 = vector.load %arg23[%c0_254, %c0_255, %c0_256] : memref<1x32x64xbf16, #tpu.memory_space<vmem>>, vector<1x32x64xbf16>
    %300 = vector.shape_cast %299 : vector<1x32x64xbf16> to vector<32x64xbf16>
    %cst_257 = arith.constant dense<0.000000e+00> : vector<4x64xf32>
    %301 = tpu.matmul %298, %300, %cst_257 {dimension_numbers = #tpu.dot_dimension_numbers<[1], [0], [0], [1], [0, 0, 1, 1], [], []>} : vector<4x32xbf16>, vector<32x64xbf16>, vector<4x64xf32> -> vector<4x64xf32>
    %c0_258 = arith.constant 0 : index
    %c0_259 = arith.constant 0 : index
    %302 = vector.load %arg24[%c0_258, %c0_259] : memref<1x64xf32, #tpu.memory_space<vmem>>, vector<1x64xf32>
    %303 = vector.broadcast %302 : vector<1x64xf32> to vector<4x64xf32>
    %304 = arith.addf %301, %303 : vector<4x64xf32>
    %cst_260 = arith.constant 0.000000e+00 : f32
    %305 = vector.broadcast %cst_260 : f32 to vector<6x64xf32>
    %c0_261 = arith.constant 0 : index
    %c0_262 = arith.constant 0 : index
    %306 = vector.load %arg40[%c0_261, %c0_262] : memref<72x64xf32, #tpu.memory_space<vmem>>, vector<6x64xf32>
    tpu.vector_store %arg40[%c0_261, %c0_262], %305 {strides = array<i32>} : memref<72x64xf32, #tpu.memory_space<vmem>>, vector<6x64xf32>,
    %c1_263 = arith.constant 1 : index
    %c0_264 = arith.constant 0 : index
    %307 = vector.load %arg40[%c1_263, %c0_264] : memref<72x64xf32, #tpu.memory_space<vmem>>, vector<4x64xf32>
    tpu.vector_store %arg40[%c1_263, %c0_264], %296 {strides = array<i32>} : memref<72x64xf32, #tpu.memory_space<vmem>>, vector<4x64xf32>,
    %cst_265 = arith.constant 0.000000e+00 : f32
    %308 = vector.broadcast %cst_265 : f32 to vector<4x64xf32>
    %c0_266 = arith.constant 0 : index
    %c0_267 = arith.constant 0 : index
    %309 = vector.load %arg40[%c0_266, %c0_267] : memref<72x64xf32, #tpu.memory_space<vmem>>, vector<4x64xf32>
    %310 = arith.truncf %309 : vector<4x64xf32> to vector<4x64xbf16>
    %c0_268 = arith.constant 0 : index
    %c0_269 = arith.constant 0 : index
    %c0_270 = arith.constant 0 : index
    %311 = vector.load %arg21[%c0_268, %c0_269, %c0_270] : memref<3x64x64xbf16, #tpu.memory_space<vmem>>, vector<1x64x64xbf16>
    %312 = vector.shape_cast %311 : vector<1x64x64xbf16> to vector<64x64xbf16>
    %cst_271 = arith.constant dense<0.000000e+00> : vector<4x64xf32>
    %313 = tpu.matmul %310, %312, %cst_271 {dimension_numbers = #tpu.dot_dimension_numbers<[1], [0], [0], [1], [0, 0, 1, 1], [], []>} : vector<4x64xbf16>, vector<64x64xbf16>, vector<4x64xf32> -> vector<4x64xf32>
    %314 = arith.addf %308, %313 : vector<4x64xf32>
    %c1_272 = arith.constant 1 : index
    %c0_273 = arith.constant 0 : index
    %315 = vector.load %arg40[%c1_272, %c0_273] : memref<72x64xf32, #tpu.memory_space<vmem>>, vector<4x64xf32>
    %316 = arith.truncf %315 : vector<4x64xf32> to vector<4x64xbf16>
    %c1_274 = arith.constant 1 : index
    %c0_275 = arith.constant 0 : index
    %c0_276 = arith.constant 0 : index
    %317 = vector.load %arg21[%c1_274, %c0_275, %c0_276] : memref<3x64x64xbf16, #tpu.memory_space<vmem>>, vector<1x64x64xbf16>
    %318 = vector.shape_cast %317 : vector<1x64x64xbf16> to vector<64x64xbf16>
    %cst_277 = arith.constant dense<0.000000e+00> : vector<4x64xf32>
    %319 = tpu.matmul %316, %318, %cst_277 {dimension_numbers = #tpu.dot_dimension_numbers<[1], [0], [0], [1], [0, 0, 1, 1], [], []>} : vector<4x64xbf16>, vector<64x64xbf16>, vector<4x64xf32> -> vector<4x64xf32>
    %320 = arith.addf %314, %319 : vector<4x64xf32>
    %c2_278 = arith.constant 2 : index
    %c0_279 = arith.constant 0 : index
    %321 = vector.load %arg40[%c2_278, %c0_279] : memref<72x64xf32, #tpu.memory_space<vmem>>, vector<4x64xf32>
    %322 = arith.truncf %321 : vector<4x64xf32> to vector<4x64xbf16>
    %c2_280 = arith.constant 2 : index
    %c0_281 = arith.constant 0 : index
    %c0_282 = arith.constant 0 : index
    %323 = vector.load %arg21[%c2_280, %c0_281, %c0_282] : memref<3x64x64xbf16, #tpu.memory_space<vmem>>, vector<1x64x64xbf16>
    %324 = vector.shape_cast %323 : vector<1x64x64xbf16> to vector<64x64xbf16>
    %cst_283 = arith.constant dense<0.000000e+00> : vector<4x64xf32>
    %325 = tpu.matmul %322, %324, %cst_283 {dimension_numbers = #tpu.dot_dimension_numbers<[1], [0], [0], [1], [0, 0, 1, 1], [], []>} : vector<4x64xbf16>, vector<64x64xbf16>, vector<4x64xf32> -> vector<4x64xf32>
    %326 = arith.addf %320, %325 : vector<4x64xf32>
    %c0_284 = arith.constant 0 : index
    %c0_285 = arith.constant 0 : index
    %327 = vector.load %arg22[%c0_284, %c0_285] : memref<1x64xf32, #tpu.memory_space<vmem>>, vector<1x64xf32>
    %328 = vector.broadcast %327 : vector<1x64xf32> to vector<4x64xf32>
    %329 = arith.addf %326, %328 : vector<4x64xf32>
    %330 = arith.addf %329, %304 : vector<4x64xf32>
    %cst_286 = arith.constant 0.000000e+00 : f32
    %331 = vector.broadcast %cst_286 : f32 to vector<4x64xf32>
    %332 = arith.cmpf oge, %330, %331 : vector<4x64xf32>
    %333 = vector.broadcast %266 : f32 to vector<4x64xf32>
    %334 = arith.mulf %333, %330 : vector<4x64xf32>
    %335 = arith.select %332, %330, %334 : vector<4x64xi1>, vector<4x64xf32>
    %c5_287 = arith.constant 5 : index
    %336 = memref.load %arg1[%c5_287] : memref<10xf32, #tpu.memory_space<smem>>
    %cst_288 = arith.constant 0.000000e+00 : f32
    %337 = vector.broadcast %cst_288 : f32 to vector<6x64xf32>
    %c0_289 = arith.constant 0 : index
    %c0_290 = arith.constant 0 : index
    %338 = vector.load %arg40[%c0_289, %c0_290] : memref<72x64xf32, #tpu.memory_space<vmem>>, vector<6x64xf32>
    tpu.vector_store %arg40[%c0_289, %c0_290], %337 {strides = array<i32>} : memref<72x64xf32, #tpu.memory_space<vmem>>, vector<6x64xf32>,
    %c1_291 = arith.constant 1 : index
    %c0_292 = arith.constant 0 : index
    %339 = vector.load %arg40[%c1_291, %c0_292] : memref<72x64xf32, #tpu.memory_space<vmem>>, vector<4x64xf32>
    tpu.vector_store %arg40[%c1_291, %c0_292], %335 {strides = array<i32>} : memref<72x64xf32, #tpu.memory_space<vmem>>, vector<4x64xf32>,
    %cst_293 = arith.constant 0.000000e+00 : f32
    %340 = vector.broadcast %cst_293 : f32 to vector<4x64xf32>
    %c0_294 = arith.constant 0 : index
    %c0_295 = arith.constant 0 : index
    %341 = vector.load %arg40[%c0_294, %c0_295] : memref<72x64xf32, #tpu.memory_space<vmem>>, vector<4x64xf32>
    %342 = arith.truncf %341 : vector<4x64xf32> to vector<4x64xbf16>
    %c0_296 = arith.constant 0 : index
    %c0_297 = arith.constant 0 : index
    %c0_298 = arith.constant 0 : index
    %343 = vector.load %arg25[%c0_296, %c0_297, %c0_298] : memref<3x64x64xbf16, #tpu.memory_space<vmem>>, vector<1x64x64xbf16>
    %344 = vector.shape_cast %343 : vector<1x64x64xbf16> to vector<64x64xbf16>
    %cst_299 = arith.constant dense<0.000000e+00> : vector<4x64xf32>
    %345 = tpu.matmul %342, %344, %cst_299 {dimension_numbers = #tpu.dot_dimension_numbers<[1], [0], [0], [1], [0, 0, 1, 1], [], []>} : vector<4x64xbf16>, vector<64x64xbf16>, vector<4x64xf32> -> vector<4x64xf32>
    %346 = arith.addf %340, %345 : vector<4x64xf32>
    %c1_300 = arith.constant 1 : index
    %c0_301 = arith.constant 0 : index
    %347 = vector.load %arg40[%c1_300, %c0_301] : memref<72x64xf32, #tpu.memory_space<vmem>>, vector<4x64xf32>
    %348 = arith.truncf %347 : vector<4x64xf32> to vector<4x64xbf16>
    %c1_302 = arith.constant 1 : index
    %c0_303 = arith.constant 0 : index
    %c0_304 = arith.constant 0 : index
    %349 = vector.load %arg25[%c1_302, %c0_303, %c0_304] : memref<3x64x64xbf16, #tpu.memory_space<vmem>>, vector<1x64x64xbf16>
    %350 = vector.shape_cast %349 : vector<1x64x64xbf16> to vector<64x64xbf16>
    %cst_305 = arith.constant dense<0.000000e+00> : vector<4x64xf32>
    %351 = tpu.matmul %348, %350, %cst_305 {dimension_numbers = #tpu.dot_dimension_numbers<[1], [0], [0], [1], [0, 0, 1, 1], [], []>} : vector<4x64xbf16>, vector<64x64xbf16>, vector<4x64xf32> -> vector<4x64xf32>
    %352 = arith.addf %346, %351 : vector<4x64xf32>
    %c2_306 = arith.constant 2 : index
    %c0_307 = arith.constant 0 : index
    %353 = vector.load %arg40[%c2_306, %c0_307] : memref<72x64xf32, #tpu.memory_space<vmem>>, vector<4x64xf32>
    %354 = arith.truncf %353 : vector<4x64xf32> to vector<4x64xbf16>
    %c2_308 = arith.constant 2 : index
    %c0_309 = arith.constant 0 : index
    %c0_310 = arith.constant 0 : index
    %355 = vector.load %arg25[%c2_308, %c0_309, %c0_310] : memref<3x64x64xbf16, #tpu.memory_space<vmem>>, vector<1x64x64xbf16>
    %356 = vector.shape_cast %355 : vector<1x64x64xbf16> to vector<64x64xbf16>
    %cst_311 = arith.constant dense<0.000000e+00> : vector<4x64xf32>
    %357 = tpu.matmul %354, %356, %cst_311 {dimension_numbers = #tpu.dot_dimension_numbers<[1], [0], [0], [1], [0, 0, 1, 1], [], []>} : vector<4x64xbf16>, vector<64x64xbf16>, vector<4x64xf32> -> vector<4x64xf32>
    %358 = arith.addf %352, %357 : vector<4x64xf32>
    %c0_312 = arith.constant 0 : index
    %c0_313 = arith.constant 0 : index
    %359 = vector.load %arg26[%c0_312, %c0_313] : memref<1x64xf32, #tpu.memory_space<vmem>>, vector<1x64xf32>
    %360 = vector.broadcast %359 : vector<1x64xf32> to vector<4x64xf32>
    %361 = arith.addf %358, %360 : vector<4x64xf32>
    %cst_314 = arith.constant 0.000000e+00 : f32
    %362 = vector.broadcast %cst_314 : f32 to vector<4x64xf32>
    %363 = arith.cmpf oge, %361, %362 : vector<4x64xf32>
    %364 = vector.broadcast %336 : f32 to vector<4x64xf32>
    %365 = arith.mulf %364, %361 : vector<4x64xf32>
    %366 = arith.select %363, %361, %365 : vector<4x64xi1>, vector<4x64xf32>
    %cst_315 = arith.constant 0.000000e+00 : f32
    %367 = vector.broadcast %cst_315 : f32 to vector<6x64xf32>
    %c0_316 = arith.constant 0 : index
    %c0_317 = arith.constant 0 : index
    %368 = vector.load %arg40[%c0_316, %c0_317] : memref<72x64xf32, #tpu.memory_space<vmem>>, vector<6x64xf32>
    tpu.vector_store %arg40[%c0_316, %c0_317], %367 {strides = array<i32>} : memref<72x64xf32, #tpu.memory_space<vmem>>, vector<6x64xf32>,
    %c1_318 = arith.constant 1 : index
    %c0_319 = arith.constant 0 : index
    %369 = vector.load %arg40[%c1_318, %c0_319] : memref<72x64xf32, #tpu.memory_space<vmem>>, vector<4x64xf32>
    tpu.vector_store %arg40[%c1_318, %c0_319], %366 {strides = array<i32>} : memref<72x64xf32, #tpu.memory_space<vmem>>, vector<4x64xf32>,
    %cst_320 = arith.constant 0.000000e+00 : f32
    %370 = vector.broadcast %cst_320 : f32 to vector<4x64xf32>
    %c0_321 = arith.constant 0 : index
    %c0_322 = arith.constant 0 : index
    %371 = vector.load %arg40[%c0_321, %c0_322] : memref<72x64xf32, #tpu.memory_space<vmem>>, vector<4x64xf32>
    %372 = arith.truncf %371 : vector<4x64xf32> to vector<4x64xbf16>
    %c0_323 = arith.constant 0 : index
    %c0_324 = arith.constant 0 : index
    %c0_325 = arith.constant 0 : index
    %373 = vector.load %arg27[%c0_323, %c0_324, %c0_325] : memref<3x64x64xbf16, #tpu.memory_space<vmem>>, vector<1x64x64xbf16>
    %374 = vector.shape_cast %373 : vector<1x64x64xbf16> to vector<64x64xbf16>
    %cst_326 = arith.constant dense<0.000000e+00> : vector<4x64xf32>
    %375 = tpu.matmul %372, %374, %cst_326 {dimension_numbers = #tpu.dot_dimension_numbers<[1], [0], [0], [1], [0, 0, 1, 1], [], []>} : vector<4x64xbf16>, vector<64x64xbf16>, vector<4x64xf32> -> vector<4x64xf32>
    %376 = arith.addf %370, %375 : vector<4x64xf32>
    %c1_327 = arith.constant 1 : index
    %c0_328 = arith.constant 0 : index
    %377 = vector.load %arg40[%c1_327, %c0_328] : memref<72x64xf32, #tpu.memory_space<vmem>>, vector<4x64xf32>
    %378 = arith.truncf %377 : vector<4x64xf32> to vector<4x64xbf16>
    %c1_329 = arith.constant 1 : index
    %c0_330 = arith.constant 0 : index
    %c0_331 = arith.constant 0 : index
    %379 = vector.load %arg27[%c1_329, %c0_330, %c0_331] : memref<3x64x64xbf16, #tpu.memory_space<vmem>>, vector<1x64x64xbf16>
    %380 = vector.shape_cast %379 : vector<1x64x64xbf16> to vector<64x64xbf16>
    %cst_332 = arith.constant dense<0.000000e+00> : vector<4x64xf32>
    %381 = tpu.matmul %378, %380, %cst_332 {dimension_numbers = #tpu.dot_dimension_numbers<[1], [0], [0], [1], [0, 0, 1, 1], [], []>} : vector<4x64xbf16>, vector<64x64xbf16>, vector<4x64xf32> -> vector<4x64xf32>
    %382 = arith.addf %376, %381 : vector<4x64xf32>
    %c2_333 = arith.constant 2 : index
    %c0_334 = arith.constant 0 : index
    %383 = vector.load %arg40[%c2_333, %c0_334] : memref<72x64xf32, #tpu.memory_space<vmem>>, vector<4x64xf32>
    %384 = arith.truncf %383 : vector<4x64xf32> to vector<4x64xbf16>
    %c2_335 = arith.constant 2 : index
    %c0_336 = arith.constant 0 : index
    %c0_337 = arith.constant 0 : index
    %385 = vector.load %arg27[%c2_335, %c0_336, %c0_337] : memref<3x64x64xbf16, #tpu.memory_space<vmem>>, vector<1x64x64xbf16>
    %386 = vector.shape_cast %385 : vector<1x64x64xbf16> to vector<64x64xbf16>
    %cst_338 = arith.constant dense<0.000000e+00> : vector<4x64xf32>
    %387 = tpu.matmul %384, %386, %cst_338 {dimension_numbers = #tpu.dot_dimension_numbers<[1], [0], [0], [1], [0, 0, 1, 1], [], []>} : vector<4x64xbf16>, vector<64x64xbf16>, vector<4x64xf32> -> vector<4x64xf32>
    %388 = arith.addf %382, %387 : vector<4x64xf32>
    %c0_339 = arith.constant 0 : index
    %c0_340 = arith.constant 0 : index
    %389 = vector.load %arg28[%c0_339, %c0_340] : memref<1x64xf32, #tpu.memory_space<vmem>>, vector<1x64xf32>
    %390 = vector.broadcast %389 : vector<1x64xf32> to vector<4x64xf32>
    %391 = arith.addf %388, %390 : vector<4x64xf32>
    %392 = arith.addf %391, %335 : vector<4x64xf32>
    %cst_341 = arith.constant 0.000000e+00 : f32
    %393 = vector.broadcast %cst_341 : f32 to vector<4x64xf32>
    %394 = arith.cmpf oge, %392, %393 : vector<4x64xf32>
    %395 = vector.broadcast %336 : f32 to vector<4x64xf32>
    %396 = arith.mulf %395, %392 : vector<4x64xf32>
    %397 = arith.select %394, %392, %396 : vector<4x64xi1>, vector<4x64xf32>
    %c6_342 = arith.constant 6 : index
    %398 = memref.load %arg1[%c6_342] : memref<10xf32, #tpu.memory_space<smem>>
    %cst_343 = arith.constant 0.000000e+00 : f32
    %399 = vector.broadcast %cst_343 : f32 to vector<6x64xf32>
    %c0_344 = arith.constant 0 : index
    %c0_345 = arith.constant 0 : index
    %400 = vector.load %arg40[%c0_344, %c0_345] : memref<72x64xf32, #tpu.memory_space<vmem>>, vector<6x64xf32>
    tpu.vector_store %arg40[%c0_344, %c0_345], %399 {strides = array<i32>} : memref<72x64xf32, #tpu.memory_space<vmem>>, vector<6x64xf32>,
    %c1_346 = arith.constant 1 : index
    %c0_347 = arith.constant 0 : index
    %401 = vector.load %arg40[%c1_346, %c0_347] : memref<72x64xf32, #tpu.memory_space<vmem>>, vector<4x64xf32>
    tpu.vector_store %arg40[%c1_346, %c0_347], %397 {strides = array<i32>} : memref<72x64xf32, #tpu.memory_space<vmem>>, vector<4x64xf32>,
    %cst_348 = arith.constant 0.000000e+00 : f32
    %402 = vector.broadcast %cst_348 : f32 to vector<4x64xf32>
    %c0_349 = arith.constant 0 : index
    %c0_350 = arith.constant 0 : index
    %403 = vector.load %arg40[%c0_349, %c0_350] : memref<72x64xf32, #tpu.memory_space<vmem>>, vector<4x64xf32>
    %404 = arith.truncf %403 : vector<4x64xf32> to vector<4x64xbf16>
    %c0_351 = arith.constant 0 : index
    %c0_352 = arith.constant 0 : index
    %c0_353 = arith.constant 0 : index
    %405 = vector.load %arg29[%c0_351, %c0_352, %c0_353] : memref<3x64x64xbf16, #tpu.memory_space<vmem>>, vector<1x64x64xbf16>
    %406 = vector.shape_cast %405 : vector<1x64x64xbf16> to vector<64x64xbf16>
    %cst_354 = arith.constant dense<0.000000e+00> : vector<4x64xf32>
    %407 = tpu.matmul %404, %406, %cst_354 {dimension_numbers = #tpu.dot_dimension_numbers<[1], [0], [0], [1], [0, 0, 1, 1], [], []>} : vector<4x64xbf16>, vector<64x64xbf16>, vector<4x64xf32> -> vector<4x64xf32>
    %408 = arith.addf %402, %407 : vector<4x64xf32>
    %c1_355 = arith.constant 1 : index
    %c0_356 = arith.constant 0 : index
    %409 = vector.load %arg40[%c1_355, %c0_356] : memref<72x64xf32, #tpu.memory_space<vmem>>, vector<4x64xf32>
    %410 = arith.truncf %409 : vector<4x64xf32> to vector<4x64xbf16>
    %c1_357 = arith.constant 1 : index
    %c0_358 = arith.constant 0 : index
    %c0_359 = arith.constant 0 : index
    %411 = vector.load %arg29[%c1_357, %c0_358, %c0_359] : memref<3x64x64xbf16, #tpu.memory_space<vmem>>, vector<1x64x64xbf16>
    %412 = vector.shape_cast %411 : vector<1x64x64xbf16> to vector<64x64xbf16>
    %cst_360 = arith.constant dense<0.000000e+00> : vector<4x64xf32>
    %413 = tpu.matmul %410, %412, %cst_360 {dimension_numbers = #tpu.dot_dimension_numbers<[1], [0], [0], [1], [0, 0, 1, 1], [], []>} : vector<4x64xbf16>, vector<64x64xbf16>, vector<4x64xf32> -> vector<4x64xf32>
    %414 = arith.addf %408, %413 : vector<4x64xf32>
    %c2_361 = arith.constant 2 : index
    %c0_362 = arith.constant 0 : index
    %415 = vector.load %arg40[%c2_361, %c0_362] : memref<72x64xf32, #tpu.memory_space<vmem>>, vector<4x64xf32>
    %416 = arith.truncf %415 : vector<4x64xf32> to vector<4x64xbf16>
    %c2_363 = arith.constant 2 : index
    %c0_364 = arith.constant 0 : index
    %c0_365 = arith.constant 0 : index
    %417 = vector.load %arg29[%c2_363, %c0_364, %c0_365] : memref<3x64x64xbf16, #tpu.memory_space<vmem>>, vector<1x64x64xbf16>
    %418 = vector.shape_cast %417 : vector<1x64x64xbf16> to vector<64x64xbf16>
    %cst_366 = arith.constant dense<0.000000e+00> : vector<4x64xf32>
    %419 = tpu.matmul %416, %418, %cst_366 {dimension_numbers = #tpu.dot_dimension_numbers<[1], [0], [0], [1], [0, 0, 1, 1], [], []>} : vector<4x64xbf16>, vector<64x64xbf16>, vector<4x64xf32> -> vector<4x64xf32>
    %420 = arith.addf %414, %419 : vector<4x64xf32>
    %c0_367 = arith.constant 0 : index
    %c0_368 = arith.constant 0 : index
    %421 = vector.load %arg30[%c0_367, %c0_368] : memref<1x64xf32, #tpu.memory_space<vmem>>, vector<1x64xf32>
    %422 = vector.broadcast %421 : vector<1x64xf32> to vector<4x64xf32>
    %423 = arith.addf %420, %422 : vector<4x64xf32>
    %cst_369 = arith.constant 0.000000e+00 : f32
    %424 = vector.broadcast %cst_369 : f32 to vector<4x64xf32>
    %425 = arith.cmpf oge, %423, %424 : vector<4x64xf32>
    %426 = vector.broadcast %398 : f32 to vector<4x64xf32>
    %427 = arith.mulf %426, %423 : vector<4x64xf32>
    %428 = arith.select %425, %423, %427 : vector<4x64xi1>, vector<4x64xf32>
    %cst_370 = arith.constant 0.000000e+00 : f32
    %429 = vector.broadcast %cst_370 : f32 to vector<6x64xf32>
    %c0_371 = arith.constant 0 : index
    %c0_372 = arith.constant 0 : index
    %430 = vector.load %arg40[%c0_371, %c0_372] : memref<72x64xf32, #tpu.memory_space<vmem>>, vector<6x64xf32>
    tpu.vector_store %arg40[%c0_371, %c0_372], %429 {strides = array<i32>} : memref<72x64xf32, #tpu.memory_space<vmem>>, vector<6x64xf32>,
    %c1_373 = arith.constant 1 : index
    %c0_374 = arith.constant 0 : index
    %431 = vector.load %arg40[%c1_373, %c0_374] : memref<72x64xf32, #tpu.memory_space<vmem>>, vector<4x64xf32>
    tpu.vector_store %arg40[%c1_373, %c0_374], %428 {strides = array<i32>} : memref<72x64xf32, #tpu.memory_space<vmem>>, vector<4x64xf32>,
    %cst_375 = arith.constant 0.000000e+00 : f32
    %432 = vector.broadcast %cst_375 : f32 to vector<4x64xf32>
    %c0_376 = arith.constant 0 : index
    %c0_377 = arith.constant 0 : index
    %433 = vector.load %arg40[%c0_376, %c0_377] : memref<72x64xf32, #tpu.memory_space<vmem>>, vector<4x64xf32>
    %434 = arith.truncf %433 : vector<4x64xf32> to vector<4x64xbf16>
    %c0_378 = arith.constant 0 : index
    %c0_379 = arith.constant 0 : index
    %c0_380 = arith.constant 0 : index
    %435 = vector.load %arg31[%c0_378, %c0_379, %c0_380] : memref<3x64x64xbf16, #tpu.memory_space<vmem>>, vector<1x64x64xbf16>
    %436 = vector.shape_cast %435 : vector<1x64x64xbf16> to vector<64x64xbf16>
    %cst_381 = arith.constant dense<0.000000e+00> : vector<4x64xf32>
    %437 = tpu.matmul %434, %436, %cst_381 {dimension_numbers = #tpu.dot_dimension_numbers<[1], [0], [0], [1], [0, 0, 1, 1], [], []>} : vector<4x64xbf16>, vector<64x64xbf16>, vector<4x64xf32> -> vector<4x64xf32>
    %438 = arith.addf %432, %437 : vector<4x64xf32>
    %c1_382 = arith.constant 1 : index
    %c0_383 = arith.constant 0 : index
    %439 = vector.load %arg40[%c1_382, %c0_383] : memref<72x64xf32, #tpu.memory_space<vmem>>, vector<4x64xf32>
    %440 = arith.truncf %439 : vector<4x64xf32> to vector<4x64xbf16>
    %c1_384 = arith.constant 1 : index
    %c0_385 = arith.constant 0 : index
    %c0_386 = arith.constant 0 : index
    %441 = vector.load %arg31[%c1_384, %c0_385, %c0_386] : memref<3x64x64xbf16, #tpu.memory_space<vmem>>, vector<1x64x64xbf16>
    %442 = vector.shape_cast %441 : vector<1x64x64xbf16> to vector<64x64xbf16>
    %cst_387 = arith.constant dense<0.000000e+00> : vector<4x64xf32>
    %443 = tpu.matmul %440, %442, %cst_387 {dimension_numbers = #tpu.dot_dimension_numbers<[1], [0], [0], [1], [0, 0, 1, 1], [], []>} : vector<4x64xbf16>, vector<64x64xbf16>, vector<4x64xf32> -> vector<4x64xf32>
    %444 = arith.addf %438, %443 : vector<4x64xf32>
    %c2_388 = arith.constant 2 : index
    %c0_389 = arith.constant 0 : index
    %445 = vector.load %arg40[%c2_388, %c0_389] : memref<72x64xf32, #tpu.memory_space<vmem>>, vector<4x64xf32>
    %446 = arith.truncf %445 : vector<4x64xf32> to vector<4x64xbf16>
    %c2_390 = arith.constant 2 : index
    %c0_391 = arith.constant 0 : index
    %c0_392 = arith.constant 0 : index
    %447 = vector.load %arg31[%c2_390, %c0_391, %c0_392] : memref<3x64x64xbf16, #tpu.memory_space<vmem>>, vector<1x64x64xbf16>
    %448 = vector.shape_cast %447 : vector<1x64x64xbf16> to vector<64x64xbf16>
    %cst_393 = arith.constant dense<0.000000e+00> : vector<4x64xf32>
    %449 = tpu.matmul %446, %448, %cst_393 {dimension_numbers = #tpu.dot_dimension_numbers<[1], [0], [0], [1], [0, 0, 1, 1], [], []>} : vector<4x64xbf16>, vector<64x64xbf16>, vector<4x64xf32> -> vector<4x64xf32>
    %450 = arith.addf %444, %449 : vector<4x64xf32>
    %c0_394 = arith.constant 0 : index
    %c0_395 = arith.constant 0 : index
    %451 = vector.load %arg32[%c0_394, %c0_395] : memref<1x64xf32, #tpu.memory_space<vmem>>, vector<1x64xf32>
    %452 = vector.broadcast %451 : vector<1x64xf32> to vector<4x64xf32>
    %453 = arith.addf %450, %452 : vector<4x64xf32>
    %454 = arith.addf %453, %397 : vector<4x64xf32>
    %cst_396 = arith.constant 0.000000e+00 : f32
    %455 = vector.broadcast %cst_396 : f32 to vector<4x64xf32>
    %456 = arith.cmpf oge, %454, %455 : vector<4x64xf32>
    %457 = vector.broadcast %398 : f32 to vector<4x64xf32>
    %458 = arith.mulf %457, %454 : vector<4x64xf32>
    %459 = arith.select %456, %454, %458 : vector<4x64xi1>, vector<4x64xf32>
    %cst_397 = arith.constant 0.000000e+00 : f32
    %460 = vector.broadcast %cst_397 : f32 to vector<1x128xf32>
    %461 = vector.extract_strided_slice %459 {offsets = [0, 0], sizes = [1, 64], strides = [1, 1]} : vector<4x64xf32> to vector<1x64xf32>
    %462 = arith.truncf %461 : vector<1x64xf32> to vector<1x64xbf16>
    %c0_398 = arith.constant 0 : index
    %c0_399 = arith.constant 0 : index
    %c0_400 = arith.constant 0 : index
    %463 = vector.load %arg33[%c0_398, %c0_399, %c0_400] : memref<4x64x128xbf16, #tpu.memory_space<vmem>>, vector<1x64x128xbf16>
    %464 = vector.shape_cast %463 : vector<1x64x128xbf16> to vector<64x128xbf16>
    %cst_401 = arith.constant dense<0.000000e+00> : vector<1x128xf32>
    %465 = tpu.matmul %462, %464, %cst_401 {dimension_numbers = #tpu.dot_dimension_numbers<[1], [0], [0], [1], [0, 0, 1, 1], [], []>} : vector<1x64xbf16>, vector<64x128xbf16>, vector<1x128xf32> -> vector<1x128xf32>
    %466 = arith.addf %460, %465 : vector<1x128xf32>
    %467 = vector.extract_strided_slice %459 {offsets = [1, 0], sizes = [1, 64], strides = [1, 1]} : vector<4x64xf32> to vector<1x64xf32>
    %468 = arith.truncf %467 : vector<1x64xf32> to vector<1x64xbf16>
    %c1_402 = arith.constant 1 : index
    %c0_403 = arith.constant 0 : index
    %c0_404 = arith.constant 0 : index
    %469 = vector.load %arg33[%c1_402, %c0_403, %c0_404] : memref<4x64x128xbf16, #tpu.memory_space<vmem>>, vector<1x64x128xbf16>
    %470 = vector.shape_cast %469 : vector<1x64x128xbf16> to vector<64x128xbf16>
    %cst_405 = arith.constant dense<0.000000e+00> : vector<1x128xf32>
    %471 = tpu.matmul %468, %470, %cst_405 {dimension_numbers = #tpu.dot_dimension_numbers<[1], [0], [0], [1], [0, 0, 1, 1], [], []>} : vector<1x64xbf16>, vector<64x128xbf16>, vector<1x128xf32> -> vector<1x128xf32>
    %472 = arith.addf %466, %471 : vector<1x128xf32>
    %473 = vector.extract_strided_slice %459 {offsets = [2, 0], sizes = [1, 64], strides = [1, 1]} : vector<4x64xf32> to vector<1x64xf32>
    %474 = arith.truncf %473 : vector<1x64xf32> to vector<1x64xbf16>
    %c2_406 = arith.constant 2 : index
    %c0_407 = arith.constant 0 : index
    %c0_408 = arith.constant 0 : index
    %475 = vector.load %arg33[%c2_406, %c0_407, %c0_408] : memref<4x64x128xbf16, #tpu.memory_space<vmem>>, vector<1x64x128xbf16>
    %476 = vector.shape_cast %475 : vector<1x64x128xbf16> to vector<64x128xbf16>
    %cst_409 = arith.constant dense<0.000000e+00> : vector<1x128xf32>
    %477 = tpu.matmul %474, %476, %cst_409 {dimension_numbers = #tpu.dot_dimension_numbers<[1], [0], [0], [1], [0, 0, 1, 1], [], []>} : vector<1x64xbf16>, vector<64x128xbf16>, vector<1x128xf32> -> vector<1x128xf32>
    %478 = arith.addf %472, %477 : vector<1x128xf32>
    %479 = vector.extract_strided_slice %459 {offsets = [3, 0], sizes = [1, 64], strides = [1, 1]} : vector<4x64xf32> to vector<1x64xf32>
    %480 = arith.truncf %479 : vector<1x64xf32> to vector<1x64xbf16>
    %c3_410 = arith.constant 3 : index
    %c0_411 = arith.constant 0 : index
    %c0_412 = arith.constant 0 : index
    %481 = vector.load %arg33[%c3_410, %c0_411, %c0_412] : memref<4x64x128xbf16, #tpu.memory_space<vmem>>, vector<1x64x128xbf16>
    %482 = vector.shape_cast %481 : vector<1x64x128xbf16> to vector<64x128xbf16>
    %cst_413 = arith.constant dense<0.000000e+00> : vector<1x128xf32>
    %483 = tpu.matmul %480, %482, %cst_413 {dimension_numbers = #tpu.dot_dimension_numbers<[1], [0], [0], [1], [0, 0, 1, 1], [], []>} : vector<1x64xbf16>, vector<64x128xbf16>, vector<1x128xf32> -> vector<1x128xf32>
    %484 = arith.addf %478, %483 : vector<1x128xf32>
    %c0_414 = arith.constant 0 : index
    %c0_415 = arith.constant 0 : index
    %485 = vector.load %arg34[%c0_414, %c0_415] : memref<1x128xf32, #tpu.memory_space<vmem>>, vector<1x128xf32>
    %486 = arith.addf %484, %485 : vector<1x128xf32>
    %c7 = arith.constant 7 : index
    %487 = memref.load %arg1[%c7] : memref<10xf32, #tpu.memory_space<smem>>
    %cst_416 = arith.constant 0.000000e+00 : f32
    %488 = vector.broadcast %cst_416 : f32 to vector<1x128xf32>
    %489 = arith.cmpf oge, %486, %488 : vector<1x128xf32>
    %490 = vector.broadcast %487 : f32 to vector<1x128xf32>
    %491 = arith.mulf %490, %486 : vector<1x128xf32>
    %492 = arith.select %489, %486, %491 : vector<1x128xi1>, vector<1x128xf32>
    %493 = arith.truncf %492 : vector<1x128xf32> to vector<1x128xbf16>
    %c0_417 = arith.constant 0 : index
    %c0_418 = arith.constant 0 : index
    %494 = vector.load %arg35[%c0_417, %c0_418] : memref<128x64xbf16, #tpu.memory_space<vmem>>, vector<128x64xbf16>
    %cst_419 = arith.constant dense<0.000000e+00> : vector<1x64xf32>
    %495 = tpu.matmul %493, %494, %cst_419 {dimension_numbers = #tpu.dot_dimension_numbers<[1], [0], [0], [1], [0, 0, 1, 1], [], []>} : vector<1x128xbf16>, vector<128x64xbf16>, vector<1x64xf32> -> vector<1x64xf32>
    %c0_420 = arith.constant 0 : index
    %c0_421 = arith.constant 0 : index
    %496 = vector.load %arg36[%c0_420, %c0_421] : memref<1x64xf32, #tpu.memory_space<vmem>>, vector<1x64xf32>
    %497 = arith.addf %495, %496 : vector<1x64xf32>
    %c8 = arith.constant 8 : index
    %498 = memref.load %arg1[%c8] : memref<10xf32, #tpu.memory_space<smem>>
    %cst_422 = arith.constant 0.000000e+00 : f32
    %499 = vector.broadcast %cst_422 : f32 to vector<1x64xf32>
    %500 = arith.cmpf oge, %497, %499 : vector<1x64xf32>
    %501 = vector.broadcast %498 : f32 to vector<1x64xf32>
    %502 = arith.mulf %501, %497 : vector<1x64xf32>
    %503 = arith.select %500, %497, %502 : vector<1x64xi1>, vector<1x64xf32>
    %504 = arith.truncf %503 : vector<1x64xf32> to vector<1x64xbf16>
    %c0_423 = arith.constant 0 : index
    %c0_424 = arith.constant 0 : index
    %505 = vector.load %arg37[%c0_423, %c0_424] : memref<64x5xbf16, #tpu.memory_space<vmem>>, vector<64x5xbf16>
    %cst_425 = arith.constant dense<0.000000e+00> : vector<1x5xf32>
    %506 = tpu.matmul %504, %505, %cst_425 {dimension_numbers = #tpu.dot_dimension_numbers<[1], [0], [0], [1], [0, 0, 1, 1], [], []>} : vector<1x64xbf16>, vector<64x5xbf16>, vector<1x5xf32> -> vector<1x5xf32>
    %c0_426 = arith.constant 0 : index
    %c0_427 = arith.constant 0 : index
    %507 = vector.load %arg38[%c0_426, %c0_427] : memref<1x5xf32, #tpu.memory_space<vmem>>, vector<1x5xf32>
    %508 = arith.addf %506, %507 : vector<1x5xf32>
    %c9 = arith.constant 9 : index
    %509 = memref.load %arg1[%c9] : memref<10xf32, #tpu.memory_space<smem>>
    %cst_428 = arith.constant 0.000000e+00 : f32
    %510 = vector.broadcast %cst_428 : f32 to vector<1x5xf32>
    %511 = arith.cmpf oge, %508, %510 : vector<1x5xf32>
    %512 = vector.broadcast %509 : f32 to vector<1x5xf32>
    %513 = arith.mulf %512, %508 : vector<1x5xf32>
    %514 = arith.select %511, %508, %513 : vector<1x5xi1>, vector<1x5xf32>
    %cst_429 = arith.constant dense<0xFF800000> : vector<1xf32>
    %515 = vector.multi_reduction <maximumf>, %514, %cst_429 [1] : vector<1x5xf32> to vector<1xf32>
    %516 = vector.shape_cast %515 : vector<1xf32> to vector<1x1xf32>
    %517 = vector.broadcast %516 : vector<1x1xf32> to vector<1x5xf32>
    %518 = arith.subf %514, %517 : vector<1x5xf32>
    %519 = math.exp %518 : vector<1x5xf32>
    %cst_430 = arith.constant dense<0.000000e+00> : vector<1xf32>
    %520 = vector.multi_reduction <add>, %519, %cst_430 [1] : vector<1x5xf32> to vector<1xf32>
    %521 = vector.shape_cast %520 : vector<1xf32> to vector<1x1xf32>
    %522 = vector.broadcast %521 : vector<1x1xf32> to vector<1x5xf32>
    %523 = arith.divf %519, %522 : vector<1x5xf32>
    %524 = vector.shape_cast %523 : vector<1x5xf32> to vector<1x1x5xf32>
    %c0_431 = arith.constant 0 : index
    %c0_432 = arith.constant 0 : index
    %c0_433 = arith.constant 0 : index
    %525 = vector.load %arg39[%c0_431, %c0_432, %c0_433] : memref<1x1x5xf32, #tpu.memory_space<vmem>>, vector<1x1x5xf32>
    tpu.vector_store %arg39[%c0_431, %c0_432, %c0_433], %524 {strides = array<i32>} : memref<1x1x5xf32, #tpu.memory_space<vmem>>, vector<1x1x5xf32>,
    return
  }
  func.func @transform_0(%arg0: i32) -> i32 {
    %c0_i32 = arith.constant 0 : i32
    %c0_i32_0 = arith.constant 0 : i32
    return %c0_i32 : i32
  }
  func.func @transform_1(%arg0: i32) -> (i32, i32, i32) {
    %c0_i32 = arith.constant 0 : i32
    %c0_i32_0 = arith.constant 0 : i32
    %c0_i32_1 = arith.constant 0 : i32
    return %arg0, %c0_i32, %c0_i32_0 : i32, i32, i32
  }
  func.func @transform_2(%arg0: i32) -> (i32, i32, i32) {
    %c0_i32 = arith.constant 0 : i32
    %c0_i32_0 = arith.constant 0 : i32
    %c0_i32_1 = arith.constant 0 : i32
    %c0_i32_2 = arith.constant 0 : i32
    return %c0_i32, %c0_i32_0, %c0_i32_1 : i32, i32, i32
  }
  func.func @transform_3(%arg0: i32) -> (i32, i32) {
    %c0_i32 = arith.constant 0 : i32
    %c0_i32_0 = arith.constant 0 : i32
    %c0_i32_1 = arith.constant 0 : i32
    return %c0_i32, %c0_i32_0 : i32, i32
  }
  func.func @transform_4(%arg0: i32) -> (i32, i32, i32) {
    %c0_i32 = arith.constant 0 : i32
    %c0_i32_0 = arith.constant 0 : i32
    %c0_i32_1 = arith.constant 0 : i32
    %c0_i32_2 = arith.constant 0 : i32
    return %c0_i32, %c0_i32_0, %c0_i32_1 : i32, i32, i32
  }
  func.func @transform_5(%arg0: i32) -> (i32, i32) {
    %c0_i32 = arith.constant 0 : i32
    %c0_i32_0 = arith.constant 0 : i32
    %c0_i32_1 = arith.constant 0 : i32
    return %c0_i32, %c0_i32_0 : i32, i32
  }
  func.func @transform_6(%arg0: i32) -> (i32, i32, i32) {
    %c0_i32 = arith.constant 0 : i32
    %c0_i32_0 = arith.constant 0 : i32
    %c0_i32_1 = arith.constant 0 : i32
    %c0_i32_2 = arith.constant 0 : i32
    return %c0_i32, %c0_i32_0, %c0_i32_1 : i32, i32, i32
  }
  func.func @transform_7(%arg0: i32) -> (i32, i32) {
    %c0_i32 = arith.constant 0 : i32
    %c0_i32_0 = arith.constant 0 : i32
    %c0_i32_1 = arith.constant 0 : i32
    return %c0_i32, %c0_i32_0 : i32, i32
  }
  func.func @transform_8(%arg0: i32) -> (i32, i32, i32) {
    %c0_i32 = arith.constant 0 : i32
    %c0_i32_0 = arith.constant 0 : i32
    %c0_i32_1 = arith.constant 0 : i32
    %c0_i32_2 = arith.constant 0 : i32
    return %c0_i32, %c0_i32_0, %c0_i32_1 : i32, i32, i32
  }
  func.func @transform_9(%arg0: i32) -> (i32, i32) {
    %c0_i32 = arith.constant 0 : i32
    %c0_i32_0 = arith.constant 0 : i32
    %c0_i32_1 = arith.constant 0 : i32
    return %c0_i32, %c0_i32_0 : i32, i32
  }
  func.func @transform_10(%arg0: i32) -> (i32, i32, i32) {
    %c0_i32 = arith.constant 0 : i32
    %c0_i32_0 = arith.constant 0 : i32
    %c0_i32_1 = arith.constant 0 : i32
    %c0_i32_2 = arith.constant 0 : i32
    return %c0_i32, %c0_i32_0, %c0_i32_1 : i32, i32, i32
  }
  func.func @transform_11(%arg0: i32) -> (i32, i32) {
    %c0_i32 = arith.constant 0 : i32
    %c0_i32_0 = arith.constant 0 : i32
    %c0_i32_1 = arith.constant 0 : i32
    return %c0_i32, %c0_i32_0 : i32, i32
  }
  func.func @transform_12(%arg0: i32) -> (i32, i32, i32) {
    %c0_i32 = arith.constant 0 : i32
    %c0_i32_0 = arith.constant 0 : i32
    %c0_i32_1 = arith.constant 0 : i32
    %c0_i32_2 = arith.constant 0 : i32
    return %c0_i32, %c0_i32_0, %c0_i32_1 : i32, i32, i32
  }
  func.func @transform_13(%arg0: i32) -> (i32, i32) {
    %c0_i32 = arith.constant 0 : i32
    %c0_i32_0 = arith.constant 0 : i32
    %c0_i32_1 = arith.constant 0 : i32
    return %c0_i32, %c0_i32_0 : i32, i32
  }
  func.func @transform_14(%arg0: i32) -> (i32, i32, i32) {
    %c0_i32 = arith.constant 0 : i32
    %c0_i32_0 = arith.constant 0 : i32
    %c0_i32_1 = arith.constant 0 : i32
    %c0_i32_2 = arith.constant 0 : i32
    return %c0_i32, %c0_i32_0, %c0_i32_1 : i32, i32, i32
  }
  func.func @transform_15(%arg0: i32) -> (i32, i32) {
    %c0_i32 = arith.constant 0 : i32
    %c0_i32_0 = arith.constant 0 : i32
    %c0_i32_1 = arith.constant 0 : i32
    return %c0_i32, %c0_i32_0 : i32, i32
  }
  func.func @transform_16(%arg0: i32) -> (i32, i32, i32) {
    %c0_i32 = arith.constant 0 : i32
    %c0_i32_0 = arith.constant 0 : i32
    %c0_i32_1 = arith.constant 0 : i32
    %c0_i32_2 = arith.constant 0 : i32
    return %c0_i32, %c0_i32_0, %c0_i32_1 : i32, i32, i32
  }
  func.func @transform_17(%arg0: i32) -> (i32, i32) {
    %c0_i32 = arith.constant 0 : i32
    %c0_i32_0 = arith.constant 0 : i32
    %c0_i32_1 = arith.constant 0 : i32
    return %c0_i32, %c0_i32_0 : i32, i32
  }
  func.func @transform_18(%arg0: i32) -> (i32, i32, i32) {
    %c0_i32 = arith.constant 0 : i32
    %c0_i32_0 = arith.constant 0 : i32
    %c0_i32_1 = arith.constant 0 : i32
    %c0_i32_2 = arith.constant 0 : i32
    return %c0_i32, %c0_i32_0, %c0_i32_1 : i32, i32, i32
  }
  func.func @transform_19(%arg0: i32) -> (i32, i32) {
    %c0_i32 = arith.constant 0 : i32
    %c0_i32_0 = arith.constant 0 : i32
    %c0_i32_1 = arith.constant 0 : i32
    return %c0_i32, %c0_i32_0 : i32, i32
  }
  func.func @transform_20(%arg0: i32) -> (i32, i32, i32) {
    %c0_i32 = arith.constant 0 : i32
    %c0_i32_0 = arith.constant 0 : i32
    %c0_i32_1 = arith.constant 0 : i32
    %c0_i32_2 = arith.constant 0 : i32
    return %c0_i32, %c0_i32_0, %c0_i32_1 : i32, i32, i32
  }
  func.func @transform_21(%arg0: i32) -> (i32, i32) {
    %c0_i32 = arith.constant 0 : i32
    %c0_i32_0 = arith.constant 0 : i32
    %c0_i32_1 = arith.constant 0 : i32
    return %c0_i32, %c0_i32_0 : i32, i32
  }
  func.func @transform_22(%arg0: i32) -> (i32, i32, i32) {
    %c0_i32 = arith.constant 0 : i32
    %c0_i32_0 = arith.constant 0 : i32
    %c0_i32_1 = arith.constant 0 : i32
    %c0_i32_2 = arith.constant 0 : i32
    return %c0_i32, %c0_i32_0, %c0_i32_1 : i32, i32, i32
  }
  func.func @transform_23(%arg0: i32) -> (i32, i32) {
    %c0_i32 = arith.constant 0 : i32
    %c0_i32_0 = arith.constant 0 : i32
    %c0_i32_1 = arith.constant 0 : i32
    return %c0_i32, %c0_i32_0 : i32, i32
  }
  func.func @transform_24(%arg0: i32) -> (i32, i32, i32) {
    %c0_i32 = arith.constant 0 : i32
    %c0_i32_0 = arith.constant 0 : i32
    %c0_i32_1 = arith.constant 0 : i32
    %c0_i32_2 = arith.constant 0 : i32
    return %c0_i32, %c0_i32_0, %c0_i32_1 : i32, i32, i32
  }
  func.func @transform_25(%arg0: i32) -> (i32, i32) {
    %c0_i32 = arith.constant 0 : i32
    %c0_i32_0 = arith.constant 0 : i32
    %c0_i32_1 = arith.constant 0 : i32
    return %c0_i32, %c0_i32_0 : i32, i32
  }
  func.func @transform_26(%arg0: i32) -> (i32, i32, i32) {
    %c0_i32 = arith.constant 0 : i32
    %c0_i32_0 = arith.constant 0 : i32
    %c0_i32_1 = arith.constant 0 : i32
    %c0_i32_2 = arith.constant 0 : i32
    return %c0_i32, %c0_i32_0, %c0_i32_1 : i32, i32, i32
  }
  func.func @transform_27(%arg0: i32) -> (i32, i32) {
    %c0_i32 = arith.constant 0 : i32
    %c0_i32_0 = arith.constant 0 : i32
    %c0_i32_1 = arith.constant 0 : i32
    return %c0_i32, %c0_i32_0 : i32, i32
  }
  func.func @transform_28(%arg0: i32) -> (i32, i32, i32) {
    %c0_i32 = arith.constant 0 : i32
    %c0_i32_0 = arith.constant 0 : i32
    %c0_i32_1 = arith.constant 0 : i32
    %c0_i32_2 = arith.constant 0 : i32
    return %c0_i32, %c0_i32_0, %c0_i32_1 : i32, i32, i32
  }
  func.func @transform_29(%arg0: i32) -> (i32, i32) {
    %c0_i32 = arith.constant 0 : i32
    %c0_i32_0 = arith.constant 0 : i32
    %c0_i32_1 = arith.constant 0 : i32
    return %c0_i32, %c0_i32_0 : i32, i32
  }
  func.func @transform_30(%arg0: i32) -> (i32, i32, i32) {
    %c0_i32 = arith.constant 0 : i32
    %c0_i32_0 = arith.constant 0 : i32
    %c0_i32_1 = arith.constant 0 : i32
    %c0_i32_2 = arith.constant 0 : i32
    return %c0_i32, %c0_i32_0, %c0_i32_1 : i32, i32, i32
  }
  func.func @transform_31(%arg0: i32) -> (i32, i32) {
    %c0_i32 = arith.constant 0 : i32
    %c0_i32_0 = arith.constant 0 : i32
    %c0_i32_1 = arith.constant 0 : i32
    return %c0_i32, %c0_i32_0 : i32, i32
  }
  func.func @transform_32(%arg0: i32) -> (i32, i32, i32) {
    %c0_i32 = arith.constant 0 : i32
    %c0_i32_0 = arith.constant 0 : i32
    %c0_i32_1 = arith.constant 0 : i32
    %c0_i32_2 = arith.constant 0 : i32
    return %c0_i32, %c0_i32_0, %c0_i32_1 : i32, i32, i32
  }
  func.func @transform_33(%arg0: i32) -> (i32, i32) {
    %c0_i32 = arith.constant 0 : i32
    %c0_i32_0 = arith.constant 0 : i32
    %c0_i32_1 = arith.constant 0 : i32
    return %c0_i32, %c0_i32_0 : i32, i32
  }
  func.func @transform_34(%arg0: i32) -> (i32, i32) {
    %c0_i32 = arith.constant 0 : i32
    %c0_i32_0 = arith.constant 0 : i32
    %c0_i32_1 = arith.constant 0 : i32
    return %c0_i32, %c0_i32_0 : i32, i32
  }
  func.func @transform_35(%arg0: i32) -> (i32, i32) {
    %c0_i32 = arith.constant 0 : i32
    %c0_i32_0 = arith.constant 0 : i32
    %c0_i32_1 = arith.constant 0 : i32
    return %c0_i32, %c0_i32_0 : i32, i32
  }
  func.func @transform_36(%arg0: i32) -> (i32, i32) {
    %c0_i32 = arith.constant 0 : i32
    %c0_i32_0 = arith.constant 0 : i32
    %c0_i32_1 = arith.constant 0 : i32
    return %c0_i32, %c0_i32_0 : i32, i32
  }
  func.func @transform_37(%arg0: i32) -> (i32, i32) {
    %c0_i32 = arith.constant 0 : i32
    %c0_i32_0 = arith.constant 0 : i32
    %c0_i32_1 = arith.constant 0 : i32
    return %c0_i32, %c0_i32_0 : i32, i32
  }
  func.func @transform_38(%arg0: i32) -> (i32, i32, i32) {
    %c0_i32 = arith.constant 0 : i32
    %c0_i32_0 = arith.constant 0 : i32
    %c0_i32_1 = arith.constant 0 : i32
    return %arg0, %c0_i32, %c0_i32_0 : i32, i32, i32
  }
}

</mosaic_0001>

<bundles_post_ra>
// kernel: forward.1
= control target key start
LH: loop header
LB: loop body
LE: loop exit
PB: predicated region body
PF: predicated region fallthrough
CT: control target
= control target key end

     0   :  { %s7794_s6 = smov 1   ;;  %s7795_s10 = smov 2   ;;  %s9049_s0 = inlined_call_operand.smem [shape: u32[39], index: -1, kind: input, shape index: {}] }
   0x1   :  { %s7875_s5 = sld [smem:[%s9049_s0]]   ;;  %s7796_s14 = smov 3  }
   0x2   :  { %s7880_s9 = sld [smem:[%s9049_s0 + %s7794_s6]]   ;;  %s7797_s18 = smov 4  }
   0x3   :  { %s7885_s13 = sld [smem:[%s9049_s0 + %s7795_s10]]   ;;  %s7798_s22 = smov 5  }
   0x4   :  { %s7890_s17 = sld [smem:[%s9049_s0 + %s7796_s14]]   ;;  %s7799_s26 = smov 6  }
   0x5   :  { %s7895_s21 = sld [smem:[%s9049_s0 + %s7797_s18]]   ;;  %s7800_s30 = smov 7  }
   0x6   :  { %s7900_s25 = sld [smem:[%s9049_s0 + %s7798_s22]]   ;;  %s7801_s4 = smov 8  }
   0x7   :  { %9094 = sst [smem:[#allocation60_spill]] %s7875_s5  ;;  %s7802_s10 = smov 9  }
   0x8   :  { %9095 = sst [smem:[#allocation61_spill]] %s7880_s9  ;;  %s7803_s15 = smov 10  }
   0x9   :  { %s7905_s29 = sld [smem:[%s9049_s0 + %s7799_s26]]   ;;  %s7804_s20 = smov 11  }
   0xa   :  { %9096 = sst [smem:[#allocation62_spill]] %s7890_s17  ;;  %s7805_s26 = smov 12  }
   0xb   :  { %9097 = sst [smem:[#allocation63_spill]] %s7895_s21  ;;  %s7806_s1 = smov 13  }
   0xc   :  { %9098 = sst [smem:[#allocation64_spill]] %s7900_s25  ;;  %s7807_s7 = smov 14  }
   0xd   :  { %s7910_s3 = sld [smem:[%s9049_s0 + %s7800_s30]]   ;;  %s7809_s22 = smov 16  }
   0xe   :  { %s7915_s8 = sld [smem:[%s9049_s0 + %s7801_s4]]   ;;  %s7810_s28 = smov 17  }
   0xf   :  { %9099 = sst [smem:[#allocation65_spill]] %s7905_s29 }
  0x10   :  { %s7920_s14 = sld [smem:[%s9049_s0 + %s7802_s10]]  }
  0x11   :  { %s7925_s19 = sld [smem:[%s9049_s0 + %s7803_s15]]   ;;  %s7808_s15 = smov 15  }
  0x12   :  { %s7930_s24 = sld [smem:[%s9049_s0 + %s7804_s20]]  }
  0x13   :  { %9100 = sst [smem:[#allocation66_spill]] %s7910_s3 }
  0x14   :  { %9101 = sst [smem:[#allocation67_spill]] %s7915_s8 }
  0x15   :  { %s7935_s30 = sld [smem:[%s9049_s0 + %s7805_s26]]  }
  0x16   :  { %s7940_s6 = sld [smem:[%s9049_s0 + %s7806_s1]]  }
  0x17   :  { %9102 = sst [smem:[#allocation68_spill]] %s7925_s19 }
  0x18   :  { %s7945_s12 = sld [smem:[%s9049_s0 + %s7807_s7]]   ;;  %s7811_s7 = smov 18  }
  0x19   :  { %s7950_s20 = sld [smem:[%s9049_s0 + %s7808_s15]]   ;;  %s7812_s15 = smov 19  }
  0x1a   :  { %s7955_s27 = sld [smem:[%s9049_s0 + %s7809_s22]]   ;;  %s7813_s22 = smov 20  }
  0x1b   :  { %9103 = sst [smem:[#allocation69_spill]] %s7935_s30 }
  0x1c   :  { %9104 = sst [smem:[#allocation70_spill]] %s7940_s6 }
  0x1d   :  { %s7960_s4 = sld [smem:[%s9049_s0 + %s7810_s28]]   ;;  %s7814_s28 = smov 21  }
  0x1e   :  { %9105 = sst [smem:[#allocation71_spill]] %s7945_s12 }
  0x1f   :  { %s7965_s9 = sld [smem:[%s9049_s0 + %s7811_s7]]   ;;  %s7815_s7 = smov 22  }
  0x20   :  { %9106 = sst [smem:[#allocation72_spill]] %s7955_s27 }
  0x21   :  { %s7970_s12 = sld [smem:[%s9049_s0 + %s7812_s15]]   ;;  %s7816_s15 = smov 23  }
  0x22   :  { %s7975_s27 = sld [smem:[%s9049_s0 + %s7813_s22]]   ;;  %s7817_s22 = smov 24  }
  0x23   :  { %9107 = sst [smem:[#allocation73_spill]] %s7960_s4 }
  0x24   :  { %s7980_s30 = sld [smem:[%s9049_s0 + %s7814_s28]]   ;;  %s7818_s28 = smov 25  }
  0x25   :  { %9108 = sst [smem:[#allocation74_spill]] %s7965_s9 }
  0x26   :  { %s7985_s9 = sld [smem:[%s9049_s0 + %s7815_s7]]   ;;  %s7819_s7 = smov 26  }
  0x27   :  { %s7990_s19 = sld [smem:[%s9049_s0 + %s7816_s15]]   ;;  %s7820_s15 = smov 27  }
  0x28   :  { %9109 = sst [smem:[#allocation75_spill]] %s7975_s27 }
  0x29   :  { %s7995_s27 = sld [smem:[%s9049_s0 + %s7817_s22]]   ;;  %s7821_s22 = smov 28  }
  0x2a   :  { %9110 = sst [smem:[#allocation76_spill]] %s7980_s30 }
  0x2b   :  { %s8000_s30 = sld [smem:[%s9049_s0 + %s7818_s28]]   ;;  %s7822_s28 = smov 29  }
  0x2c   :  { %9111 = sst [smem:[#allocation77_spill]] %s7985_s9 }
  0x2d   :  { %9112 = sst [smem:[#allocation78_spill]] %s7990_s19 }
  0x2e   :  { %s8005_s8 = sld [smem:[%s9049_s0 + %s7819_s7]]   ;;  %s7823_s7 = smov 30  }
  0x2f   :  { %9113 = sst [smem:[#allocation79_spill]] %s7995_s27 }
  0x30   :  { %s8010_s19 = sld [smem:[%s9049_s0 + %s7820_s15]]   ;;  %s7824_s15 = smov 31  }
  0x31   :  { %s8015_s27 = sld [smem:[%s9049_s0 + %s7821_s22]]   ;;  %s7825_s22 = smov 32  }
  0x32   :  { %s8020_s29 = sld [smem:[%s9049_s0 + %s7822_s28]]   ;;  %s7826_s28 = smov 33  }
  0x33   :  { %s8035_s21 = sld [smem:[%s9049_s0 + %s7825_s22]]   ;;  %s7829_s22 = smov 36  }
  0x34   :  { %9114 = sst [smem:[#allocation80_spill]] %s8005_s8 }
  0x35   :  { %s8025_s8 = sld [smem:[%s9049_s0 + %s7823_s7]]   ;;  %s7827_s7 = smov 34  }
  0x36   :  { %9115 = sst [smem:[#allocation81_spill]] %s8010_s19 }
  0x37   :  { %s8030_s19 = sld [smem:[%s9049_s0 + %s7824_s15]]   ;;  %s7828_s15 = smov 35  }
  0x38   :  { %9116 = sst [smem:[#allocation82_spill]] %s8020_s29 }
  0x39   :  { %9119 = sst [smem:[#allocation85_spill]] %s8035_s21 }
  0x3a   :  { %s8040_s29 = sld [smem:[%s9049_s0 + %s7826_s28]]   ;;  %s7830_s28 = smov 37  }
  0x3b   :  { %9117 = sst [smem:[#allocation83_spill]] %s8025_s8 }
  0x3c   :  { %s8045_s8 = sld [smem:[%s9049_s0 + %s7827_s7]]   ;;  %s7831_s7 = smov 38  }
  0x3d   :  { %9118 = sst [smem:[#allocation84_spill]] %s8030_s19 }
  0x3e   :  { %s8050_s19 = sld [smem:[%s9049_s0 + %s7828_s15]]  }
  0x3f   :  { %s8055_s21 = sld [smem:[%s9049_s0 + %s7829_s22]]  }
  0x40   :  { %9120 = sst [smem:[#allocation86_spill]] %s8040_s29 }
  0x41   :  { %s8060_s29 = sld [smem:[%s9049_s0 + %s7830_s28]]  }
  0x42   :  { %9121 = sst [smem:[#allocation87_spill]] %s8045_s8 }
  0x43   :  { %s8065_s8 = sld [smem:[%s9049_s0 + %s7831_s7]]  }
  0x44   :  { %82 = vsyncpa [#allocation6], 0 }
  0x45   :  { %83 = vsyncpa [#allocation4], 0 }
  0x46   :  { %84 = vsyncpa [#allocation9], 0 }
  0x47   :  { %85 = vsyncpa [#allocation12], 0 }
  0x48   :  { %86 = vsyncpa [#allocation15], 0 }
  0x49   :  { %87 = vsyncpa [#allocation18], 0 }
  0x4a   :  { %88 = vsyncpa [#allocation21], 0 }
  0x4b   :  { %89 = vsyncpa [#allocation24], 0 }
  0x4c   :  { %90 = vsyncpa [#allocation27], 0 }
  0x4d   :  { %91 = vsyncpa [#allocation30], 0 }
  0x4e   :  { %92 = vsyncpa [#allocation33], 0 }
  0x4f   :  { %93 = vsyncpa [#allocation36], 0 }
  0x50   :  { %94 = vsyncpa [#allocation39], 0 }
  0x51   :  { %95 = vsyncpa [#allocation42], 0 }
  0x52   :  { %96 = vsyncpa [#allocation5], 0 }
  0x53   :  { %98 = vsyncpa [#allocation5 + $0x1], 0  ;;  %s8067_s15 = smov 0   ;;  %s8069_s0 = smov 0  }
  0x54   :  { %s8071_s16 = smov 0   ;;  %s8073_s18 = smov 0  }
  0x55 LB: > { %s9122_s9 = sld [smem:[#allocation77_spill]]  ;;  %s9123_s6 = sld [smem:[#allocation70_spill]]  ;;  %s7788_s16 = sphi %s8071_s16, %s9198_s16   ;;  %s7784_s0 = sphi %s8069_s0, %s9200_s0   ;;  %s7780_s15 = sphi %s8067_s15, %s9199_s15   ;;  %s7792_s18 = sphi %s8073_s18, %s9196_s18  }
  0x56   : > { %s9124_s5 = sld [smem:[#allocation60_spill]]  ;;  %s9125_s4 = sld [smem:[#allocation73_spill]] }
  0x57   : > { %s9126_s3 = sld [smem:[#allocation66_spill]]  ;;  %s9127_s25 = sld [smem:[#allocation64_spill]] }
  0x58   : > { %s9128_s17 = sld [smem:[#allocation62_spill]]  ;;  %9129 = sst [smem:[#allocation88_spill]] %s7780_s15 }
  0x59   : > { %9130 = sst [smem:[#allocation89_spill]] %s7788_s16  ;;  %s8088_s22 = sadd.s32 4294967295, %s7792_s18  }
  0x5a   : > { %s5519_s23 = sadd.s32 4294967294, %s7792_s18   ;;  %s8092_s26 = sadd.s32 1, %s7792_s18  }
  0x5b   : > { %9131 = sst [smem:[#allocation90_spill]] %s8092_s26  ;;  %s914_s28 = sadd.s32 1, %s7788_s16 }
  0x5c   : > { %s911_s1 = ssub.s32 %s7792_s18, %s8092_s26  ;;  %p924_p0 = scmp.ne.s32.totalorder %s7788_s16, %s7784_s0 }
  0x5d   : > { %p912_p1 = scmp.eq.s32.totalorder %s911_s1, 0  ;;  %p925_p2 = scmp.eq.s32.totalorder %s8088_s22, 1 }
  0x5e   : > { %p930_p3 = scmp.ne.s32.totalorder %s7784_s0, %s7780_s15  ;;  %p931_p4 = scmp.eq.s32.totalorder %s5519_s23, 1 }
  0x5f   : > { %s8103_s2 = scalar_select %p912_p1, %s7788_s16, %s914_s28  }
  0x60   : > { %p8105_p5 = por %p925_p2, %p924_p0  ;;  %p8109_p6 = por %p931_p4, %p930_p3 }
  0x61   : > { %9132 = sst [smem:[#allocation91_spill]] %s8103_s2  ;;  %p5520_p7 = scmp.ge.s32.totalorder %s7792_s18, 1 }
  0x62   : > { %s9133_s7 = scalar_select %p8105_p5, 1, 0 }
  0x63   : > { %s9134_s10 = scalar_select %p8109_p6, 1, 0 }
  0x64   : > { %p938_p8 = scmp.lt.s32.totalorder %s7792_s18, 3  ;;  %p9071_p9 = scmp.eq.s32.totalorder %s8088_s22, 0 }
  0x65   : > { %9135 = sst [smem:[#allocation92_spill]] %s9134_s10  ;;  %s7832_s23 = smov [#allocation8]  }
  0x66   : > { %p8116_p10 = pnand %p5520_p7, %p938_p8  ;;  %s973_s28 = sshll.u32 %s7832_s23, 4  ;;  %s974_s28 = int_to_ptr.vmem [resolvable:$true] %s973_s28 }
  0x67   : > { %s7833_s1 = smov [#allocation11]   ;;  %s7834_s26 = smov [#allocation14]  }
  0x68   : > { %s9136_s11 = scalar_select %p8116_p10, 1, 0 }
  0x69   : > { %p6585_p11 = pneg %p8116_p10  ;;  %s997_s2 = sshll.u32 %s7833_s1, 4  ;;  %s8128_s2 = int_to_ptr.vmem [resolvable:$true] %s997_s2 }
  0x6a   : > { %s1021_s10 = sshll.u32 %s7834_s26, 4  ;;  %s6961_s15 = scalar_lea.hbm %s9128_s17, 16  ;;  %s8130_s10 = int_to_ptr.vmem [resolvable:$true] %s1021_s10 }
  0x6b   : > { %p8124_p12 = pnand %p9071_p9, %p6585_p11  ;;  %p6962_p13 = scmp.ne.s32.totalorder %s9128_s17, %s6961_s15 }
  0x6c   : > { %p6968_p3 = scmp.lt.u32.totalorder %s6961_s15, %s9128_s17 }
  0x6d   : > { %p8136_p0 = pneg %p8124_p12 }
  0x6f   : > { %p6964_p1 = pnand %p8136_p0, %p6962_p13 }
  0x71   : > { %p6965_p2 = pneg %p6964_p1 }
  0x73   : > { %p6970_p4 = pnand %p6968_p3, %p6965_p2 }
  0x75   : > { %6973 = shalt.err (!%p6970_p4)
}
  0x76   : > { %s6974_s1 = scalar_lea.vmem %s974_s28, 16  ;;  %s6981_s26 = scalar_lea.vmem %s974_s28, 32 }
  0x77   : > { %p6975_p7 = scmp.ne.s32.totalorder %s974_s28, %s6974_s1  ;;  %p6982_p9 = scmp.lt.s32.totalorder %s974_s28, %s974_s28 }
  0x78   : > { %p6983_p6 = scmp.lt.s32.totalorder %s6981_s26, %s6974_s1 }
  0x79   : > { %p6977_p8 = pnand %p6975_p7, %p8136_p0 }
  0x7a   : > { %p6984_p5 = por %p6983_p6, %p6982_p9 }
  0x7b   : > { %p6978_p11 = pneg %p6977_p8 }
  0x7d   : > { %p6985_p10 = pnand %p6984_p5, %p6978_p11 }
  0x7f   : > { %6988 = shalt.err (!%p6985_p10)
}
  0x80   : > { %6594 = dma.hbm_to_vmem [thread:$0]  (!%p8124_p12), %s9128_s17, 16, %s974_s28, [#allocation9]  }
  0x81   : > { %s6989_s15 = scalar_lea.hbm %s9127_s25, 16 }
  0x82   : > { %p6990_p13 = scmp.ne.s32.totalorder %s9127_s25, %s6989_s15  ;;  %p6996_p3 = scmp.lt.u32.totalorder %s6989_s15, %s9127_s25 }
  0x84   : > { %p6992_p1 = pnand %p6990_p13, %p8136_p0 }
  0x86   : > { %p6993_p2 = pneg %p6992_p1 }
  0x88   : > { %p6998_p4 = pnand %p6996_p3, %p6993_p2 }
  0x8a   : > { %7001 = shalt.err (!%p6998_p4)
}
  0x8b   : > { %s7002_s1 = scalar_lea.vmem %s8128_s2, 16  ;;  %s7009_s26 = scalar_lea.vmem %s8128_s2, 32 }
  0x8c   : > { %p7003_p5 = scmp.ne.s32.totalorder %s8128_s2, %s7002_s1  ;;  %p7010_p10 = scmp.lt.s32.totalorder %s8128_s2, %s8128_s2 }
  0x8d   : > { %p7011_p7 = scmp.lt.s32.totalorder %s7009_s26, %s7002_s1 }
  0x8e   : > { %p7005_p6 = pnand %p7003_p5, %p8136_p0 }
  0x8f   : > { %p7012_p8 = por %p7011_p7, %p7010_p10 }
  0x90   : > { %p7006_p9 = pneg %p7005_p6 }
  0x92   : > { %p7013_p11 = pnand %p7012_p8, %p7006_p9 }
  0x94   : > { %7016 = shalt.err (!%p7013_p11)
}
  0x95   : > { %6600 = dma.hbm_to_vmem [thread:$0]  (!%p8124_p12), %s9127_s25, 16, %s8128_s2, [#allocation12]  }
  0x96   : > { %s7017_s28 = scalar_lea.hbm %s9126_s3, 16 }
  0x97   : > { %p7018_p13 = scmp.ne.s32.totalorder %s9126_s3, %s7017_s28  ;;  %p7024_p3 = scmp.lt.u32.totalorder %s7017_s28, %s9126_s3 }
  0x99   : > { %p7020_p1 = pnand %p7018_p13, %p8136_p0 }
  0x9b   : > { %p7021_p2 = pneg %p7020_p1 }
  0x9d   : > { %p7026_p4 = pnand %p7024_p3, %p7021_p2 }
  0x9f   : > { %7029 = shalt.err (!%p7026_p4)
}
  0xa0   : > { %s7030_s15 = scalar_lea.vmem %s8130_s10, 16  ;;  %s7037_s1 = scalar_lea.vmem %s8130_s10, 32 }
  0xa1   : > { %p7031_p5 = scmp.ne.s32.totalorder %s8130_s10, %s7030_s15  ;;  %p7038_p10 = scmp.lt.s32.totalorder %s8130_s10, %s8130_s10 }
  0xa2   : > { %p7039_p7 = scmp.lt.s32.totalorder %s7037_s1, %s7030_s15 }
  0xa3   : > { %p7033_p6 = pnand %p7031_p5, %p8136_p0 }
  0xa4   : > { %p7040_p8 = por %p7039_p7, %p7038_p10 }
  0xa5   : > { %p7034_p9 = pneg %p7033_p6 }
  0xa7   : > { %p7041_p11 = pnand %p7040_p8, %p7034_p9 }
  0xa9   : > { %7044 = shalt.err (!%p7041_p11)
}
  0xaa   : > { %6606 = dma.hbm_to_vmem [thread:$0]  (!%p8124_p12), %s9126_s3, 16, %s8130_s10, [#allocation15]  }
  0xab   : > { %s7835_s2 = smov [#allocation17]   ;;  %s7836_s28 = smov [#allocation20]  }
  0xac   : > { %s1045_s26 = sshll.u32 %s7835_s2, 4  ;;  %s1069_s17 = sshll.u32 %s7836_s28, 4  ;;  %s1046_s26 = int_to_ptr.vmem [resolvable:$true] %s1045_s26  ;;  %s1070_s17 = int_to_ptr.vmem [resolvable:$true] %s1069_s17 }
  0xad   : > { %s7045_s25 = scalar_lea.hbm %s7920_s14, 16 }
  0xae   : > { %p7046_p13 = scmp.ne.s32.totalorder %s7920_s14, %s7045_s25  ;;  %p7052_p3 = scmp.lt.u32.totalorder %s7045_s25, %s7920_s14 }
  0xb0   : > { %p7048_p1 = pnand %p7046_p13, %p8136_p0 }
  0xb2   : > { %p7049_p2 = pneg %p7048_p1 }
  0xb4   : > { %p7054_p4 = pnand %p7052_p3, %p7049_p2 }
  0xb6   : > { %7057 = shalt.err (!%p7054_p4)
}
  0xb7   : > { %s7058_s15 = scalar_lea.vmem %s1046_s26, 16  ;;  %s7065_s10 = scalar_lea.vmem %s1046_s26, 32 }
  0xb8   : > { %p7059_p5 = scmp.ne.s32.totalorder %s1046_s26, %s7058_s15  ;;  %p7066_p10 = scmp.lt.s32.totalorder %s1046_s26, %s1046_s26 }
  0xb9   : > { %p7067_p7 = scmp.lt.s32.totalorder %s7065_s10, %s7058_s15 }
  0xba   : > { %p7061_p6 = pnand %p7059_p5, %p8136_p0 }
  0xbb   : > { %p7068_p8 = por %p7067_p7, %p7066_p10 }
  0xbc   : > { %p7062_p9 = pneg %p7061_p6 }
  0xbe   : > { %p7069_p11 = pnand %p7068_p8, %p7062_p9 }
  0xc0   : > { %7072 = shalt.err (!%p7069_p11)
}
  0xc1   : > { %6612 = dma.hbm_to_vmem [thread:$0]  (!%p8124_p12), %s7920_s14, 16, %s1046_s26, [#allocation18]  }
  0xc2   : > { %s7073_s25 = scalar_lea.hbm %s7930_s24, 16 }
  0xc3   : > { %p7074_p13 = scmp.ne.s32.totalorder %s7930_s24, %s7073_s25  ;;  %p7080_p3 = scmp.lt.u32.totalorder %s7073_s25, %s7930_s24 }
  0xc5   : > { %p7076_p1 = pnand %p7074_p13, %p8136_p0 }
  0xc7   : > { %p7077_p2 = pneg %p7076_p1 }
  0xc9   : > { %p7082_p4 = pnand %p7080_p3, %p7077_p2 }
  0xcb   : > { %7085 = shalt.err (!%p7082_p4)
}
  0xcc   : > { %s7086_s1 = scalar_lea.vmem %s1070_s17, 16  ;;  %s7093_s2 = scalar_lea.vmem %s1070_s17, 32 }
  0xcd   : > { %p7087_p5 = scmp.ne.s32.totalorder %s1070_s17, %s7086_s1  ;;  %p7094_p10 = scmp.lt.s32.totalorder %s1070_s17, %s1070_s17 }
  0xce   : > { %p7095_p7 = scmp.lt.s32.totalorder %s7093_s2, %s7086_s1 }
  0xcf   : > { %p7089_p6 = pnand %p7087_p5, %p8136_p0 }
  0xd0   : > { %p7096_p8 = por %p7095_p7, %p7094_p10 }
  0xd1   : > { %p7090_p9 = pneg %p7089_p6 }
  0xd3   : > { %p7097_p11 = pnand %p7096_p8, %p7090_p9 }
  0xd5   : > { %7100 = shalt.err (!%p7097_p11)
}
  0xd6   : > { %6618 = dma.hbm_to_vmem [thread:$0]  (!%p8124_p12), %s7930_s24, 16, %s1070_s17, [#allocation21]  }
  0xd7   : > { %s7837_s26 = smov [#allocation23]   ;;  %s7838_s15 = smov [#allocation26]  }
  0xd8   : > { %s1093_s28 = sshll.u32 %s7837_s26, 4  ;;  %s1117_s10 = sshll.u32 %s7838_s15, 4  ;;  %s1094_s28 = int_to_ptr.vmem [resolvable:$true] %s1093_s28  ;;  %s1118_s10 = int_to_ptr.vmem [resolvable:$true] %s1117_s10 }
  0xd9   : > { %s7101_s25 = scalar_lea.hbm %s9123_s6, 16 }
  0xda   : > { %p7102_p13 = scmp.ne.s32.totalorder %s9123_s6, %s7101_s25  ;;  %p7108_p3 = scmp.lt.u32.totalorder %s7101_s25, %s9123_s6 }
  0xdc   : > { %p7104_p1 = pnand %p7102_p13, %p8136_p0 }
  0xde   : > { %p7105_p2 = pneg %p7104_p1 }
  0xe0   : > { %p7110_p4 = pnand %p7108_p3, %p7105_p2 }
  0xe2   : > { %7113 = shalt.err (!%p7110_p4)
}
  0xe3   : > { %s7114_s1 = scalar_lea.vmem %s1094_s28, 16  ;;  %s7121_s17 = scalar_lea.vmem %s1094_s28, 32 }
  0xe4   : > { %p7115_p5 = scmp.ne.s32.totalorder %s1094_s28, %s7114_s1  ;;  %p7122_p10 = scmp.lt.s32.totalorder %s1094_s28, %s1094_s28 }
  0xe5   : > { %p7123_p7 = scmp.lt.s32.totalorder %s7121_s17, %s7114_s1 }
  0xe6   : > { %p7117_p6 = pnand %p7115_p5, %p8136_p0 }
  0xe7   : > { %p7124_p8 = por %p7123_p7, %p7122_p10 }
  0xe8   : > { %p7118_p9 = pneg %p7117_p6 }
  0xea   : > { %p7125_p11 = pnand %p7124_p8, %p7118_p9 }
  0xec   : > { %7128 = shalt.err (!%p7125_p11)
}
  0xed   : > { %6624 = dma.hbm_to_vmem [thread:$0]  (!%p8124_p12), %s9123_s6, 16, %s1094_s28, [#allocation24]  }
  0xee   : > { %s7129_s2 = scalar_lea.hbm %s7950_s20, 16 }
  0xef   : > { %p7130_p13 = scmp.ne.s32.totalorder %s7950_s20, %s7129_s2  ;;  %p7136_p3 = scmp.lt.u32.totalorder %s7129_s2, %s7950_s20 }
  0xf1   : > { %p7132_p1 = pnand %p7130_p13, %p8136_p0 }
  0xf3   : > { %p7133_p2 = pneg %p7132_p1 }
  0xf5   : > { %p7138_p4 = pnand %p7136_p3, %p7133_p2 }
  0xf7   : > { %7141 = shalt.err (!%p7138_p4)
}
  0xf8   : > { %s7142_s26 = scalar_lea.vmem %s1118_s10, 16  ;;  %s7149_s15 = scalar_lea.vmem %s1118_s10, 32 }
  0xf9   : > { %p7143_p5 = scmp.ne.s32.totalorder %s1118_s10, %s7142_s26  ;;  %p7150_p10 = scmp.lt.s32.totalorder %s1118_s10, %s1118_s10 }
  0xfa   : > { %p7151_p7 = scmp.lt.s32.totalorder %s7149_s15, %s7142_s26 }
  0xfb   : > { %p7145_p6 = pnand %p7143_p5, %p8136_p0 }
  0xfc   : > { %p7152_p8 = por %p7151_p7, %p7150_p10 }
  0xfd   : > { %p7146_p9 = pneg %p7145_p6 }
  0xff   : > { %p7153_p11 = pnand %p7152_p8, %p7146_p9 }
 0x101   : > { %7156 = shalt.err (!%p7153_p11)
}
 0x102   : > { %6630 = dma.hbm_to_vmem [thread:$0]  (!%p8124_p12), %s7950_s20, 16, %s1118_s10, [#allocation27]  }
 0x103   : > { %s7839_s28 = smov [#allocation29]   ;;  %s7840_s1 = smov [#allocation32]  }
 0x104   : > { %s1141_s25 = sshll.u32 %s7839_s28, 4  ;;  %s1165_s17 = sshll.u32 %s7840_s1, 4  ;;  %s1142_s25 = int_to_ptr.vmem [resolvable:$true] %s1141_s25  ;;  %s1166_s17 = int_to_ptr.vmem [resolvable:$true] %s1165_s17 }
 0x105   : > { %s7157_s2 = scalar_lea.hbm %s9125_s4, 16 }
 0x106   : > { %p7158_p13 = scmp.ne.s32.totalorder %s9125_s4, %s7157_s2  ;;  %p7164_p3 = scmp.lt.u32.totalorder %s7157_s2, %s9125_s4 }
 0x108   : > { %p7160_p1 = pnand %p7158_p13, %p8136_p0 }
 0x10a   : > { %p7161_p2 = pneg %p7160_p1 }
 0x10c   : > { %p7166_p4 = pnand %p7164_p3, %p7161_p2 }
 0x10e   : > { %7169 = shalt.err (!%p7166_p4)
}
 0x10f   : > { %s7170_s26 = scalar_lea.vmem %s1142_s25, 16  ;;  %s7177_s10 = scalar_lea.vmem %s1142_s25, 32 }
 0x110   : > { %p7171_p5 = scmp.ne.s32.totalorder %s1142_s25, %s7170_s26  ;;  %p7178_p10 = scmp.lt.s32.totalorder %s1142_s25, %s1142_s25 }
 0x111   : > { %p7179_p7 = scmp.lt.s32.totalorder %s7177_s10, %s7170_s26 }
 0x112   : > { %p7173_p6 = pnand %p7171_p5, %p8136_p0 }
 0x113   : > { %p7180_p8 = por %p7179_p7, %p7178_p10 }
 0x114   : > { %p7174_p9 = pneg %p7173_p6 }
 0x116   : > { %p7181_p11 = pnand %p7180_p8, %p7174_p9 }
 0x118   : > { %7184 = shalt.err (!%p7181_p11)
}
 0x119   : > { %6636 = dma.hbm_to_vmem [thread:$0]  (!%p8124_p12), %s9125_s4, 16, %s1142_s25, [#allocation30]  }
 0x11a   : > { %s7185_s15 = scalar_lea.hbm %s7970_s12, 16 }
 0x11b   : > { %p7186_p13 = scmp.ne.s32.totalorder %s7970_s12, %s7185_s15  ;;  %p7192_p3 = scmp.lt.u32.totalorder %s7185_s15, %s7970_s12 }
 0x11d   : > { %p7188_p1 = pnand %p7186_p13, %p8136_p0 }
 0x11f   : > { %p7189_p2 = pneg %p7188_p1 }
 0x121   : > { %p7194_p4 = pnand %p7192_p3, %p7189_p2 }
 0x123   : > { %7197 = shalt.err (!%p7194_p4)
}
 0x124   : > { %s7198_s28 = scalar_lea.vmem %s1166_s17, 16  ;;  %s7205_s1 = scalar_lea.vmem %s1166_s17, 32 }
 0x125   : > { %p7199_p5 = scmp.ne.s32.totalorder %s1166_s17, %s7198_s28  ;;  %p7206_p10 = scmp.lt.s32.totalorder %s1166_s17, %s1166_s17 }
 0x126   : > { %p7207_p7 = scmp.lt.s32.totalorder %s7205_s1, %s7198_s28 }
 0x127   : > { %p7201_p6 = pnand %p7199_p5, %p8136_p0 }
 0x128   : > { %p7208_p8 = por %p7207_p7, %p7206_p10 }
 0x129   : > { %p7202_p9 = pneg %p7201_p6 }
 0x12b   : > { %p7209_p11 = pnand %p7208_p8, %p7202_p9 }
 0x12d   : > { %7212 = shalt.err (!%p7209_p11)
}
 0x12e   : > { %6642 = dma.hbm_to_vmem [thread:$0]  (!%p8124_p12), %s7970_s12, 16, %s1166_s17, [#allocation33]  }
 0x12f   : > { %s7841_s25 = smov [#allocation35]   ;;  %s7842_s26 = smov [#allocation38]  }
 0x130   : > { %s1189_s2 = sshll.u32 %s7841_s25, 4  ;;  %s1217_s10 = sshll.u32 %s7842_s26, 4  ;;  %s1190_s2 = int_to_ptr.vmem [resolvable:$true] %s1189_s2  ;;  %s1218_s10 = int_to_ptr.vmem [resolvable:$true] %s1217_s10 }
 0x131   : > { %s7213_s15 = scalar_lea.hbm %s9122_s9, 256 }
 0x132   : > { %p7214_p13 = scmp.ne.s32.totalorder %s9122_s9, %s7213_s15  ;;  %p7220_p3 = scmp.lt.u32.totalorder %s7213_s15, %s9122_s9 }
 0x134   : > { %p7216_p1 = pnand %p7214_p13, %p8136_p0 }
 0x136   : > { %p7217_p2 = pneg %p7216_p1 }
 0x138   : > { %p7222_p4 = pnand %p7220_p3, %p7217_p2 }
 0x13a   : > { %7225 = shalt.err (!%p7222_p4)
}
 0x13b   : > { %s7226_s28 = scalar_lea.vmem %s1190_s2, 256  ;;  %p7234_p10 = scmp.lt.s32.totalorder %s1190_s2, %s1190_s2 }
 0x13c   : > { %p7227_p5 = scmp.ne.s32.totalorder %s1190_s2, %s7226_s28  ;;  %p7235_p7 = scmp.lt.s32.totalorder %s7226_s28, %s7226_s28 }
 0x13e   : > { %p7229_p6 = pnand %p7227_p5, %p8136_p0  ;;  %p7236_p8 = por %p7235_p7, %p7234_p10 }
 0x140   : > { %p7230_p9 = pneg %p7229_p6 }
 0x142   : > { %p7237_p11 = pnand %p7236_p8, %p7230_p9 }
 0x144   : > { %7240 = shalt.err (!%p7237_p11)
}
 0x145   : > { %s9076_s17 = smov 64   ;;  %s9078_s1 = smov 4  }
 0x146   : > { %6648 = dma.hbm_to_vmem [thread:$0]  (!%p8124_p12), %s9122_s9, 256, %s1190_s2, [#allocation36], %s9076_s17, %s9076_s17, %s9078_s1  }
 0x147   : > { %s7241_s25 = scalar_lea.hbm %s8000_s30, 16 }
 0x148   : > { %p7242_p13 = scmp.ne.s32.totalorder %s8000_s30, %s7241_s25  ;;  %p7248_p3 = scmp.lt.u32.totalorder %s7241_s25, %s8000_s30 }
 0x14a   : > { %p7244_p1 = pnand %p7242_p13, %p8136_p0 }
 0x14c   : > { %p7245_p2 = pneg %p7244_p1 }
 0x14e   : > { %p7250_p4 = pnand %p7248_p3, %p7245_p2 }
 0x150   : > { %7253 = shalt.err (!%p7250_p4)
}
 0x151   : > { %s7254_s26 = scalar_lea.vmem %s1218_s10, 16  ;;  %s7261_s15 = scalar_lea.vmem %s1218_s10, 32 }
 0x152   : > { %p7255_p5 = scmp.ne.s32.totalorder %s1218_s10, %s7254_s26  ;;  %p7262_p10 = scmp.lt.s32.totalorder %s1218_s10, %s1218_s10 }
 0x153   : > { %p7263_p7 = scmp.lt.s32.totalorder %s7261_s15, %s7254_s26 }
 0x154   : > { %p7257_p6 = pnand %p7255_p5, %p8136_p0 }
 0x155   : > { %p7264_p8 = por %p7263_p7, %p7262_p10 }
 0x156   : > { %p7258_p9 = pneg %p7257_p6 }
 0x158   : > { %p7265_p11 = pnand %p7264_p8, %p7258_p9 }
 0x15a   : > { %7268 = shalt.err (!%p7265_p11)
}
 0x15b   : > { %6654 = dma.hbm_to_vmem [thread:$0]  (!%p8124_p12), %s8000_s30, 16, %s1218_s10, [#allocation39]  }
 0x15c   : > { %s7845_s2 = smov [#allocation41]   ;;  %s7269_s25 = scalar_lea.hbm %s8015_s27, 1536 }
 0x15d   : > { %s1243_s28 = sshll.u32 %s7845_s2, 4  ;;  %p7270_p13 = scmp.ne.s32.totalorder %s8015_s27, %s7269_s25  ;;  %s1244_s28 = int_to_ptr.vmem [resolvable:$true] %s1243_s28 }
 0x15e   : > { %p7276_p3 = scmp.lt.u32.totalorder %s7269_s25, %s8015_s27 }
 0x15f   : > { %p7272_p1 = pnand %p7270_p13, %p8136_p0 }
 0x161   : > { %p7273_p2 = pneg %p7272_p1 }
 0x163   : > { %p7278_p4 = pnand %p7276_p3, %p7273_p2 }
 0x165   : > { %7281 = shalt.err (!%p7278_p4)
}
 0x166   : > { %s7282_s26 = scalar_lea.vmem %s1244_s28, 1536  ;;  %p7290_p10 = scmp.lt.s32.totalorder %s1244_s28, %s1244_s28 }
 0x167   : > { %p7283_p5 = scmp.ne.s32.totalorder %s1244_s28, %s7282_s26  ;;  %p7291_p7 = scmp.lt.s32.totalorder %s7282_s26, %s7282_s26 }
 0x169   : > { %p7285_p6 = pnand %p7283_p5, %p8136_p0  ;;  %p7292_p8 = por %p7291_p7, %p7290_p10 }
 0x16b   : > { %p7286_p9 = pneg %p7285_p6 }
 0x16d   : > { %p7293_p11 = pnand %p7292_p8, %p7286_p9 }
 0x16f   : > { %7296 = shalt.err (!%p7293_p11)
}
 0x170   : > { %6660 = dma.hbm_to_vmem [thread:$0]  (!%p8124_p12), %s8015_s27, 1536, %s1244_s28, [#allocation42], %s9076_s17, %s9076_s17, %s9078_s1  }
 0x171   : > { %s7297_s10 = scalar_lea.hbm %s9124_s5, 16 }
 0x172   : > { %p7298_p13 = scmp.ne.s32.totalorder %s9124_s5, %s7297_s10  ;;  %p7304_p3 = scmp.lt.u32.totalorder %s7297_s10, %s9124_s5 }
 0x174   : > { %p7300_p1 = pnand %p7298_p13, %p8136_p0 }
 0x176   : > { %p7301_p2 = pneg %p7300_p1 }
 0x178   : > { %p7306_p4 = pnand %p7304_p3, %p7301_p2 }
 0x17a   : > { %7309 = shalt.err (!%p7306_p4)
}
 0x17b   : > { %s7846_s15 = smov [#allocation3]   ;;  %s7847_s2 = smov [#allocation7]  }
 0x17c   : > { %6588 = dma.hbm_to_smem (!%p8124_p12), %s9124_s5, 16, %s7846_s15, [#allocation6]  }
 0x17d   : > { %s959_s25 = sshll.u32 %s7847_s2, 4  ;;  %s7310_s28 = scalar_lea.hbm %s7885_s13, 112  ;;  %s960_s25 = int_to_ptr.vmem [resolvable:$true] %s959_s25 }
 0x17e   : > { %p7311_p5 = scmp.ne.s32.totalorder %s7885_s13, %s7310_s28  ;;  %p7317_p10 = scmp.lt.u32.totalorder %s7310_s28, %s7885_s13 }
 0x180   : > { %p7313_p6 = pnand %p7311_p5, %p8136_p0 }
 0x182   : > { %p7314_p9 = pneg %p7313_p6 }
 0x184   : > { %p7319_p7 = pnand %p7317_p10, %p7314_p9 }
 0x186   : > { %7322 = shalt.err (!%p7319_p7)
}
 0x187   : > { %s7323_s26 = scalar_lea.vmem %s960_s25, 112  ;;  %s7330_s10 = scalar_lea.vmem %s960_s25, 128 }
 0x188   : > { %p7324_p8 = scmp.ne.s32.totalorder %s960_s25, %s7323_s26  ;;  %p7331_p1 = scmp.lt.s32.totalorder %s960_s25, %s960_s25 }
 0x189   : > { %p7332_p2 = scmp.lt.s32.totalorder %s7330_s10, %s7323_s26 }
 0x18a   : > { %p7326_p11 = pnand %p7324_p8, %p8136_p0 }
 0x18b   : > { %p7333_p3 = por %p7332_p2, %p7331_p1 }
 0x18c   : > { %p7327_p13 = pneg %p7326_p11 }
 0x18e   : > { %p7334_p4 = pnand %p7333_p3, %p7327_p13 }
 0x190   : > { %7337 = shalt.err (!%p7334_p4)
}
 0x191   : > { %s7848_s15 = smov 16   ;;  %s9139_s2 = sld [smem:[#allocation63_spill]] }
 0x192   : > { %s7849_s28 = smov 1   ;;  %s7850_s17 = smov [#allocation10]  }
 0x193   : > { %6591 = dma.hbm_to_vmem [thread:$0]  (!%p8124_p12), %s7885_s13, 112, %s960_s25, [#allocation4], %s7848_s15, %s7848_s15, %s7849_s28  }
 0x194   : > { %s983_s1 = sshll.u32 %s7850_s17, 4  ;;  %s7851_s3 = smov [#allocation13]   ;;  %s984_s1 = int_to_ptr.vmem [resolvable:$true] %s983_s1 }
 0x195   : > { %s1007_s4 = sshll.u32 %s7851_s3, 4  ;;  %s8294_s4 = int_to_ptr.vmem [resolvable:$true] %s1007_s4 }
 0x197   : > { %s7338_s26 = scalar_lea.hbm %s9139_s2, 384 }
 0x198   : > { %p7339_p5 = scmp.ne.s32.totalorder %s9139_s2, %s7338_s26  ;;  %p7345_p10 = scmp.lt.u32.totalorder %s7338_s26, %s9139_s2 }
 0x19a   : > { %p7341_p6 = pnand %p7339_p5, %p8136_p0 }
 0x19c   : > { %p7342_p9 = pneg %p7341_p6 }
 0x19e   : > { %p7347_p7 = pnand %p7345_p10, %p7342_p9 }
 0x1a0   : > { %7350 = shalt.err (!%p7347_p7)
}
 0x1a1   : > { %s7351_s10 = scalar_lea.vmem %s984_s1, 384  ;;  %p7359_p1 = scmp.lt.s32.totalorder %s984_s1, %s984_s1 }
 0x1a2   : > { %p7352_p8 = scmp.ne.s32.totalorder %s984_s1, %s7351_s10  ;;  %p7360_p2 = scmp.lt.s32.totalorder %s7351_s10, %s7351_s10 }
 0x1a4   : > { %p7354_p11 = pnand %p7352_p8, %p8136_p0  ;;  %p7361_p3 = por %p7360_p2, %p7359_p1 }
 0x1a6   : > { %p7355_p13 = pneg %p7354_p11 }
 0x1a8   : > { %p7362_p4 = pnand %p7361_p3, %p7355_p13 }
 0x1aa   : > { %7365 = shalt.err (!%p7362_p4)
}
 0x1ab   : > { %s9140_s3 = smov 4   ;;  %s9141_s17 = smov 64  }
 0x1ac   : > { %s9142_s25 = sld [smem:[#allocation65_spill]] }
 0x1ad   : > { %6597 = dma.hbm_to_vmem [thread:$0]  (!%p8124_p12), %s9139_s2, 384, %s984_s1, [#allocation9], %s9141_s17, %s9141_s17, %s9140_s3  }
 0x1b2   : > { %s7366_s15 = scalar_lea.hbm %s9142_s25, 768 }
 0x1b3   : > { %p7367_p5 = scmp.ne.s32.totalorder %s9142_s25, %s7366_s15  ;;  %p7373_p10 = scmp.lt.u32.totalorder %s7366_s15, %s9142_s25 }
 0x1b5   : > { %p7369_p6 = pnand %p7367_p5, %p8136_p0 }
 0x1b7   : > { %p7370_p9 = pneg %p7369_p6 }
 0x1b9   : > { %p7375_p7 = pnand %p7373_p10, %p7370_p9 }
 0x1bb   : > { %7378 = shalt.err (!%p7375_p7)
}
 0x1bc   : > { %s7379_s28 = scalar_lea.vmem %s8294_s4, 768  ;;  %p7387_p1 = scmp.lt.s32.totalorder %s8294_s4, %s8294_s4 }
 0x1bd   : > { %p7380_p8 = scmp.ne.s32.totalorder %s8294_s4, %s7379_s28  ;;  %p7388_p2 = scmp.lt.s32.totalorder %s7379_s28, %s7379_s28 }
 0x1bf   : > { %p7382_p11 = pnand %p7380_p8, %p8136_p0  ;;  %p7389_p3 = por %p7388_p2, %p7387_p1 }
 0x1c1   : > { %p7383_p13 = pneg %p7382_p11 }
 0x1c3   : > { %p7390_p4 = pnand %p7389_p3, %p7383_p13 }
 0x1c5   : > { %7393 = shalt.err (!%p7390_p4)
}
 0x1c6   : > { %s9143_s1 = sld [smem:[#allocation67_spill]]  ;;  %s7852_s26 = smov [#allocation16]  }
 0x1c7   : > { %6603 = dma.hbm_to_vmem [thread:$0]  (!%p8124_p12), %s9142_s25, 768, %s8294_s4, [#allocation12], %s9141_s17, %s9141_s17, %s9140_s3  }
 0x1c8   : > { %s1031_s10 = sshll.u32 %s7852_s26, 4  ;;  %s7853_s15 = smov [#allocation19]   ;;  %s1032_s10 = int_to_ptr.vmem [resolvable:$true] %s1031_s10 }
 0x1c9   : > { %s1055_s2 = sshll.u32 %s7853_s15, 4  ;;  %s8327_s2 = int_to_ptr.vmem [resolvable:$true] %s1055_s2 }
 0x1cc   : > { %s7394_s28 = scalar_lea.hbm %s9143_s1, 128 }
 0x1cd   : > { %p7395_p5 = scmp.ne.s32.totalorder %s9143_s1, %s7394_s28  ;;  %p7401_p10 = scmp.lt.u32.totalorder %s7394_s28, %s9143_s1 }
 0x1cf   : > { %p7397_p6 = pnand %p7395_p5, %p8136_p0 }
 0x1d1   : > { %p7398_p9 = pneg %p7397_p6 }
 0x1d3   : > { %p7403_p7 = pnand %p7401_p10, %p7398_p9 }
 0x1d5   : > { %7406 = shalt.err (!%p7403_p7)
}
 0x1d6   : > { %s7407_s5 = scalar_lea.vmem %s1032_s10, 128  ;;  %p7415_p1 = scmp.lt.s32.totalorder %s1032_s10, %s1032_s10 }
 0x1d7   : > { %p7408_p8 = scmp.ne.s32.totalorder %s1032_s10, %s7407_s5  ;;  %p7416_p2 = scmp.lt.s32.totalorder %s7407_s5, %s7407_s5 }
 0x1d9   : > { %p7410_p11 = pnand %p7408_p8, %p8136_p0  ;;  %p7417_p3 = por %p7416_p2, %p7415_p1 }
 0x1db   : > { %p7411_p13 = pneg %p7410_p11 }
 0x1dd   : > { %p7418_p4 = pnand %p7417_p3, %p7411_p13 }
 0x1df   : > { %7421 = shalt.err (!%p7418_p4)
}
 0x1e0   : > { %s9144_s4 = sld [smem:[#allocation68_spill]] }
 0x1e1   : > { %6609 = dma.hbm_to_vmem [thread:$0]  (!%p8124_p12), %s9143_s1, 128, %s1032_s10, [#allocation15], %s9141_s17, %s9141_s17, %s9140_s3  }
 0x1e6   : > { %s7422_s26 = scalar_lea.hbm %s9144_s4, 768 }
 0x1e7   : > { %p7423_p5 = scmp.ne.s32.totalorder %s9144_s4, %s7422_s26  ;;  %p7429_p10 = scmp.lt.u32.totalorder %s7422_s26, %s9144_s4 }
 0x1e9   : > { %p7425_p6 = pnand %p7423_p5, %p8136_p0 }
 0x1eb   : > { %p7426_p9 = pneg %p7425_p6 }
 0x1ed   : > { %p7431_p7 = pnand %p7429_p10, %p7426_p9 }
 0x1ef   : > { %7434 = shalt.err (!%p7431_p7)
}
 0x1f0   : > { %s7435_s5 = scalar_lea.vmem %s8327_s2, 768  ;;  %p7443_p1 = scmp.lt.s32.totalorder %s8327_s2, %s8327_s2 }
 0x1f1   : > { %p7436_p8 = scmp.ne.s32.totalorder %s8327_s2, %s7435_s5  ;;  %p7444_p2 = scmp.lt.s32.totalorder %s7435_s5, %s7435_s5 }
 0x1f3   : > { %p7438_p11 = pnand %p7436_p8, %p8136_p0  ;;  %p7445_p3 = por %p7444_p2, %p7443_p1 }
 0x1f5   : > { %p7439_p13 = pneg %p7438_p11 }
 0x1f7   : > { %p7446_p4 = pnand %p7445_p3, %p7439_p13 }
 0x1f9   : > { %7449 = shalt.err (!%p7446_p4)
}
 0x1fa   : > { %s9145_s10 = sld [smem:[#allocation69_spill]]  ;;  %s7854_s15 = smov [#allocation22]  }
 0x1fb   : > { %6615 = dma.hbm_to_vmem [thread:$0]  (!%p8124_p12), %s9144_s4, 768, %s8327_s2, [#allocation18], %s9141_s17, %s9141_s17, %s9140_s3  }
 0x1fc   : > { %s1079_s28 = sshll.u32 %s7854_s15, 4  ;;  %s7855_s26 = smov [#allocation25]   ;;  %s1080_s28 = int_to_ptr.vmem [resolvable:$true] %s1079_s28 }
 0x1fd   : > { %s1103_s1 = sshll.u32 %s7855_s26, 4  ;;  %s8360_s1 = int_to_ptr.vmem [resolvable:$true] %s1103_s1 }
 0x200   : > { %s7450_s5 = scalar_lea.hbm %s9145_s10, 768 }
 0x201   : > { %p7451_p5 = scmp.ne.s32.totalorder %s9145_s10, %s7450_s5  ;;  %p7457_p10 = scmp.lt.u32.totalorder %s7450_s5, %s9145_s10 }
 0x203   : > { %p7453_p6 = pnand %p7451_p5, %p8136_p0 }
 0x205   : > { %p7454_p9 = pneg %p7453_p6 }
 0x207   : > { %p7459_p7 = pnand %p7457_p10, %p7454_p9 }
 0x209   : > { %7462 = shalt.err (!%p7459_p7)
}
 0x20a   : > { %s7463_s6 = scalar_lea.vmem %s1080_s28, 768  ;;  %p7471_p1 = scmp.lt.s32.totalorder %s1080_s28, %s1080_s28 }
 0x20b   : > { %p7464_p8 = scmp.ne.s32.totalorder %s1080_s28, %s7463_s6  ;;  %p7472_p2 = scmp.lt.s32.totalorder %s7463_s6, %s7463_s6 }
 0x20d   : > { %p7466_p11 = pnand %p7464_p8, %p8136_p0  ;;  %p7473_p3 = por %p7472_p2, %p7471_p1 }
 0x20f   : > { %p7467_p13 = pneg %p7466_p11 }
 0x211   : > { %p7474_p4 = pnand %p7473_p3, %p7467_p13 }
 0x213   : > { %7477 = shalt.err (!%p7474_p4)
}
 0x214   : > { %s9146_s2 = sld [smem:[#allocation71_spill]] }
 0x215   : > { %6621 = dma.hbm_to_vmem [thread:$0]  (!%p8124_p12), %s9145_s10, 768, %s1080_s28, [#allocation21], %s9141_s17, %s9141_s17, %s9140_s3  }
 0x21a   : > { %s7478_s15 = scalar_lea.hbm %s9146_s2, 768 }
 0x21b   : > { %p7479_p5 = scmp.ne.s32.totalorder %s9146_s2, %s7478_s15  ;;  %p7485_p10 = scmp.lt.u32.totalorder %s7478_s15, %s9146_s2 }
 0x21d   : > { %p7481_p6 = pnand %p7479_p5, %p8136_p0 }
 0x21f   : > { %p7482_p9 = pneg %p7481_p6 }
 0x221   : > { %p7487_p7 = pnand %p7485_p10, %p7482_p9 }
 0x223   : > { %7490 = shalt.err (!%p7487_p7)
}
 0x224   : > { %s7491_s6 = scalar_lea.vmem %s8360_s1, 768  ;;  %p7499_p1 = scmp.lt.s32.totalorder %s8360_s1, %s8360_s1 }
 0x225   : > { %p7492_p8 = scmp.ne.s32.totalorder %s8360_s1, %s7491_s6  ;;  %p7500_p2 = scmp.lt.s32.totalorder %s7491_s6, %s7491_s6 }
 0x227   : > { %p7494_p11 = pnand %p7492_p8, %p8136_p0  ;;  %p7501_p3 = por %p7500_p2, %p7499_p1 }
 0x229   : > { %p7495_p13 = pneg %p7494_p11 }
 0x22b   : > { %p7502_p4 = pnand %p7501_p3, %p7495_p13 }
 0x22d   : > { %7505 = shalt.err (!%p7502_p4)
}
 0x22e   : > { %s9147_s28 = sld [smem:[#allocation72_spill]]  ;;  %s7856_s26 = smov [#allocation28]  }
 0x22f   : > { %6627 = dma.hbm_to_vmem [thread:$0]  (!%p8124_p12), %s9146_s2, 768, %s8360_s1, [#allocation24], %s9141_s17, %s9141_s17, %s9140_s3  }
 0x230   : > { %s1127_s5 = sshll.u32 %s7856_s26, 4  ;;  %s7857_s15 = smov [#allocation31]   ;;  %s1128_s5 = int_to_ptr.vmem [resolvable:$true] %s1127_s5 }
 0x231   : > { %s1151_s4 = sshll.u32 %s7857_s15, 4  ;;  %s8393_s4 = int_to_ptr.vmem [resolvable:$true] %s1151_s4 }
 0x234   : > { %s7506_s6 = scalar_lea.hbm %s9147_s28, 768 }
 0x235   : > { %p7507_p5 = scmp.ne.s32.totalorder %s9147_s28, %s7506_s6  ;;  %p7513_p10 = scmp.lt.u32.totalorder %s7506_s6, %s9147_s28 }
 0x237   : > { %p7509_p6 = pnand %p7507_p5, %p8136_p0 }
 0x239   : > { %p7510_p9 = pneg %p7509_p6 }
 0x23b   : > { %p7515_p7 = pnand %p7513_p10, %p7510_p9 }
 0x23d   : > { %7518 = shalt.err (!%p7515_p7)
}
 0x23e   : > { %s7519_s9 = scalar_lea.vmem %s1128_s5, 768  ;;  %p7527_p1 = scmp.lt.s32.totalorder %s1128_s5, %s1128_s5 }
 0x23f   : > { %p7520_p8 = scmp.ne.s32.totalorder %s1128_s5, %s7519_s9  ;;  %p7528_p2 = scmp.lt.s32.totalorder %s7519_s9, %s7519_s9 }
 0x241   : > { %p7522_p11 = pnand %p7520_p8, %p8136_p0  ;;  %p7529_p3 = por %p7528_p2, %p7527_p1 }
 0x243   : > { %p7523_p13 = pneg %p7522_p11 }
 0x245   : > { %p7530_p4 = pnand %p7529_p3, %p7523_p13 }
 0x247   : > { %7533 = shalt.err (!%p7530_p4)
}
 0x248   : > { %s9148_s1 = sld [smem:[#allocation74_spill]] }
 0x249   : > { %6633 = dma.hbm_to_vmem [thread:$0]  (!%p8124_p12), %s9147_s28, 768, %s1128_s5, [#allocation27], %s9141_s17, %s9141_s17, %s9140_s3  }
 0x24e   : > { %s7534_s26 = scalar_lea.hbm %s9148_s1, 768 }
 0x24f   : > { %p7535_p5 = scmp.ne.s32.totalorder %s9148_s1, %s7534_s26  ;;  %p7541_p10 = scmp.lt.u32.totalorder %s7534_s26, %s9148_s1 }
 0x251   : > { %p7537_p6 = pnand %p7535_p5, %p8136_p0 }
 0x253   : > { %p7538_p9 = pneg %p7537_p6 }
 0x255   : > { %p7543_p7 = pnand %p7541_p10, %p7538_p9 }
 0x257   : > { %7546 = shalt.err (!%p7543_p7)
}
 0x258   : > { %s7547_s9 = scalar_lea.vmem %s8393_s4, 768  ;;  %p7555_p1 = scmp.lt.s32.totalorder %s8393_s4, %s8393_s4 }
 0x259   : > { %p7548_p8 = scmp.ne.s32.totalorder %s8393_s4, %s7547_s9  ;;  %p7556_p2 = scmp.lt.s32.totalorder %s7547_s9, %s7547_s9 }
 0x25b   : > { %p7550_p11 = pnand %p7548_p8, %p8136_p0  ;;  %p7557_p3 = por %p7556_p2, %p7555_p1 }
 0x25d   : > { %p7551_p13 = pneg %p7550_p11 }
 0x25f   : > { %p7558_p4 = pnand %p7557_p3, %p7551_p13 }
 0x261   : > { %7561 = shalt.err (!%p7558_p4)
}
 0x262   : > { %s9149_s5 = sld [smem:[#allocation76_spill]]  ;;  %s7858_s15 = smov [#allocation34]  }
 0x263   : > { %6639 = dma.hbm_to_vmem [thread:$0]  (!%p8124_p12), %s9148_s1, 768, %s8393_s4, [#allocation30], %s9141_s17, %s9141_s17, %s9140_s3  }
 0x264   : > { %s1179_s6 = sshll.u32 %s7858_s15, 4  ;;  %s7859_s26 = smov [#allocation37]   ;;  %s1180_s6 = int_to_ptr.vmem [resolvable:$true] %s1179_s6 }
 0x265   : > { %s1203_s2 = sshll.u32 %s7859_s26, 4  ;;  %s8426_s2 = int_to_ptr.vmem [resolvable:$true] %s1203_s2 }
 0x268   : > { %s7562_s9 = scalar_lea.hbm %s9149_s5, 16 }
 0x269   : > { %p7563_p5 = scmp.ne.s32.totalorder %s9149_s5, %s7562_s9  ;;  %p7569_p10 = scmp.lt.u32.totalorder %s7562_s9, %s9149_s5 }
 0x26b   : > { %p7565_p6 = pnand %p7563_p5, %p8136_p0 }
 0x26d   : > { %p7566_p9 = pneg %p7565_p6 }
 0x26f   : > { %p7571_p7 = pnand %p7569_p10, %p7566_p9 }
 0x271   : > { %7574 = shalt.err (!%p7571_p7)
}
 0x272   : > { %s7575_s10 = scalar_lea.vmem %s1180_s6, 16  ;;  %s7582_s4 = scalar_lea.vmem %s1180_s6, 32 }
 0x273   : > { %p7576_p8 = scmp.ne.s32.totalorder %s1180_s6, %s7575_s10  ;;  %p7583_p1 = scmp.lt.s32.totalorder %s1180_s6, %s1180_s6 }
 0x274   : > { %p7584_p2 = scmp.lt.s32.totalorder %s7582_s4, %s7575_s10 }
 0x275   : > { %p7578_p11 = pnand %p7576_p8, %p8136_p0 }
 0x276   : > { %p7585_p3 = por %p7584_p2, %p7583_p1 }
 0x277   : > { %p7579_p13 = pneg %p7578_p11 }
 0x279   : > { %p7586_p4 = pnand %p7585_p3, %p7579_p13 }
 0x27b   : > { %7589 = shalt.err (!%p7586_p4)
}
 0x27c   : > { %s9150_s15 = sld [smem:[#allocation78_spill]] }
 0x27d   : > { %6645 = dma.hbm_to_vmem [thread:$0]  (!%p8124_p12), %s9149_s5, 16, %s1180_s6, [#allocation33]  }
 0x282   : > { %s9151_s26 = smov %s9150_s15  ;;  %s7590_s9 = scalar_lea.hbm %s9150_s15, 16 }
 0x283   : > { %p7591_p5 = scmp.ne.s32.totalorder %s9151_s26, %s7590_s9  ;;  %p7597_p10 = scmp.lt.u32.totalorder %s7590_s9, %s9151_s26 }
 0x285   : > { %p7593_p6 = pnand %p7591_p5, %p8136_p0 }
 0x287   : > { %p7594_p9 = pneg %p7593_p6 }
 0x289   : > { %p7599_p7 = pnand %p7597_p10, %p7594_p9 }
 0x28b   : > { %7602 = shalt.err (!%p7599_p7)
}
 0x28c   : > { %s7603_s10 = scalar_lea.vmem %s8426_s2, 16  ;;  %s7610_s4 = scalar_lea.vmem %s8426_s2, 32 }
 0x28d   : > { %p7604_p8 = scmp.ne.s32.totalorder %s8426_s2, %s7603_s10  ;;  %p7611_p1 = scmp.lt.s32.totalorder %s8426_s2, %s8426_s2 }
 0x28e   : > { %p7612_p2 = scmp.lt.s32.totalorder %s7610_s4, %s7603_s10 }
 0x28f   : > { %p7606_p11 = pnand %p7604_p8, %p8136_p0 }
 0x290   : > { %p7613_p3 = por %p7612_p2, %p7611_p1 }
 0x291   : > { %p7607_p13 = pneg %p7606_p11 }
 0x293   : > { %p7614_p4 = pnand %p7613_p3, %p7607_p13 }
 0x295   : > { %7617 = shalt.err (!%p7614_p4)
}
 0x296   : > { %s9152_s6 = sld [smem:[#allocation80_spill]]  ;;  %s7860_s15 = smov [#allocation40]  }
 0x297   : > { %6651 = dma.hbm_to_vmem [thread:$0]  (!%p8124_p12), %s9151_s26, 16, %s8426_s2, [#allocation36]  }
 0x298   : > { %s1227_s9 = sshll.u32 %s7860_s15, 4  ;;  %s7861_s1 = smov [#allocation43]   ;;  %s1228_s9 = int_to_ptr.vmem [resolvable:$true] %s1227_s9 }
 0x299   : > { %s1259_s5 = sshll.u32 %s7861_s1, 4  ;;  %s8454_s5 = int_to_ptr.vmem [resolvable:$true] %s1259_s5 }
 0x29c   : > { %s7618_s10 = scalar_lea.hbm %s9152_s6, 1536 }
 0x29d   : > { %p7619_p5 = scmp.ne.s32.totalorder %s9152_s6, %s7618_s10  ;;  %p7625_p10 = scmp.lt.u32.totalorder %s7618_s10, %s9152_s6 }
 0x29f   : > { %p7621_p6 = pnand %p7619_p5, %p8136_p0 }
 0x2a1   : > { %p7622_p9 = pneg %p7621_p6 }
 0x2a3   : > { %p7627_p7 = pnand %p7625_p10, %p7622_p9 }
 0x2a5   : > { %7630 = shalt.err (!%p7627_p7)
}
 0x2a6   : > { %s7631_s4 = scalar_lea.vmem %s1228_s9, 1536  ;;  %p7639_p1 = scmp.lt.s32.totalorder %s1228_s9, %s1228_s9 }
 0x2a7   : > { %p7632_p8 = scmp.ne.s32.totalorder %s1228_s9, %s7631_s4  ;;  %p7640_p2 = scmp.lt.s32.totalorder %s7631_s4, %s7631_s4 }
 0x2a9   : > { %p7634_p11 = pnand %p7632_p8, %p8136_p0  ;;  %p7641_p3 = por %p7640_p2, %p7639_p1 }
 0x2ab   : > { %p7635_p13 = pneg %p7634_p11 }
 0x2ad   : > { %p7642_p4 = pnand %p7641_p3, %p7635_p13 }
 0x2af   : > { %7645 = shalt.err (!%p7642_p4)
}
 0x2b0   : > { %s9153_s2 = sld [smem:[#allocation83_spill]] }
 0x2b1   : > { %6657 = dma.hbm_to_vmem [thread:$0]  (!%p8124_p12), %s9152_s6, 1536, %s1228_s9, [#allocation39], %s9141_s17, %s9141_s17, %s9140_s3  }
 0x2b6   : > { %s7646_s1 = scalar_lea.hbm %s9153_s2, 1536 }
 0x2b7   : > { %p7647_p5 = scmp.ne.s32.totalorder %s9153_s2, %s7646_s1  ;;  %p7653_p10 = scmp.lt.u32.totalorder %s7646_s1, %s9153_s2 }
 0x2b9   : > { %p7649_p6 = pnand %p7647_p5, %p8136_p0 }
 0x2bb   : > { %p7650_p9 = pneg %p7649_p6 }
 0x2bd   : > { %p7655_p7 = pnand %p7653_p10, %p7650_p9 }
 0x2bf   : > { %7658 = shalt.err (!%p7655_p7)
}
 0x2c0   : > { %s7659_s15 = scalar_lea.vmem %s8454_s5, 1536  ;;  %p7667_p1 = scmp.lt.s32.totalorder %s8454_s5, %s8454_s5 }
 0x2c1   : > { %p7660_p8 = scmp.ne.s32.totalorder %s8454_s5, %s7659_s15  ;;  %p7668_p2 = scmp.lt.s32.totalorder %s7659_s15, %s7659_s15 }
 0x2c3   : > { %p7662_p11 = pnand %p7660_p8, %p8136_p0  ;;  %p7669_p3 = por %p7668_p2, %p7667_p1 }
 0x2c5   : > { %p7663_p13 = pneg %p7662_p11 }
 0x2c7   : > { %p7670_p4 = pnand %p7669_p3, %p7663_p13 }
 0x2c9   : > { %7673 = shalt.err (!%p7670_p4)
}
 0x2ca   : > { %6663 = dma.hbm_to_vmem [thread:$0]  (!%p8124_p12), %s9153_s2, 1536, %s8454_s5, [#allocation42], %s9141_s17, %s9141_s17, %s9140_s3  }
 0x2cb   : > { %p9154_p5 = scmp.ne.s32.totalorder %s9136_s11, 0 }
 0x2cc   : > { %p9155_p0 = scmp.eq.s32.totalorder (!%p9154_p5), %s8088_s22, 0 }
 0x2cd   : > { %1304 = sbr.rel (%p9154_p5) target bundleno = 4941 (0x134d), region = 172 }
 0x2d4   : > { %7719 = dma.done.wait (%p9155_p0), [#allocation6], 16   ;;  %p9156_p6 = pmov %p9155_p0 }
 0x2d5   : > { %p9157_p9 = pmov %p9155_p0 }
 0x2d6   : > { %7721 = vsyncadd (%p9156_p6), [#allocation6], 4294967280 }
 0x2d7   : > { %7723 = dma.done.wait (%p9157_p9), [#allocation4], 112   ;;  %p9158_p10 = pmov %p9155_p0 }
 0x2d8   : > { %p9159_p7 = pmov %p9155_p0 }
 0x2d9   : > { %7725 = vsyncadd (%p9158_p10), [#allocation4], 4294967184 }
 0x2da   : > { %7727 = dma.done.wait (%p9159_p7), [#allocation9], 400   ;;  %p9160_p12 = pmov %p9155_p0 }
 0x2db   : > { %p9161_p8 = pmov %p9155_p0 }
 0x2dc   : > { %7729 = vsyncadd (%p9160_p12), [#allocation9], 4294966896 }
 0x2dd   : > { %7731 = dma.done.wait (%p9161_p8), [#allocation12], 784   ;;  %p9162_p11 = pmov %p9155_p0 }
 0x2de   : > { %p9163_p13 = pmov %p9155_p0 }
 0x2df   : > { %7733 = vsyncadd (%p9162_p11), [#allocation12], 4294966512 }
 0x2e0   : > { %7735 = dma.done.wait (%p9163_p13), [#allocation15], 144   ;;  %p9164_p1 = pmov %p9155_p0 }
 0x2e1   : > { %p9165_p2 = pmov %p9155_p0 }
 0x2e2   : > { %7737 = vsyncadd (%p9164_p1), [#allocation15], 4294967152 }
 0x2e3   : > { %7739 = dma.done.wait (%p9165_p2), [#allocation18], 784   ;;  %p9166_p3 = pmov %p9155_p0 }
 0x2e4   : > { %p9167_p4 = pmov %p9155_p0 }
 0x2e5   : > { %7741 = vsyncadd (%p9166_p3), [#allocation18], 4294966512 }
 0x2e6   : > { %7743 = dma.done.wait (%p9167_p4), [#allocation21], 784   ;;  %p9168_p5 = pmov %p9155_p0 }
 0x2e8   : > { %7745 = vsyncadd (%p9168_p5), [#allocation21], 4294966512 }
 0x2e9   : > { %7747 = dma.done.wait (%p9155_p0), [#allocation24], 784   ;;  %p9169_p6 = pmov %p9155_p0 }
 0x2ea   : > { %p9170_p9 = pmov %p9155_p0 }
 0x2eb   : > { %7749 = vsyncadd (%p9169_p6), [#allocation24], 4294966512 }
 0x2ec   : > { %7751 = dma.done.wait (%p9170_p9), [#allocation27], 784   ;;  %p9171_p10 = pmov %p9155_p0 }
 0x2ed   : > { %p9172_p7 = pmov %p9155_p0 }
 0x2ee   : > { %7753 = vsyncadd (%p9171_p10), [#allocation27], 4294966512 }
 0x2ef   : > { %7755 = dma.done.wait (%p9172_p7), [#allocation30], 784   ;;  %p9173_p12 = pmov %p9155_p0 }
 0x2f0   : > { %p9174_p8 = pmov %p9155_p0 }
 0x2f1   : > { %7757 = vsyncadd (%p9173_p12), [#allocation30], 4294966512 }
 0x2f2   : > { %7759 = dma.done.wait (%p9174_p8), [#allocation33], 32   ;;  %p9175_p11 = pmov %p9155_p0 }
 0x2f3   : > { %p9176_p13 = pmov %p9155_p0 }
 0x2f4   : > { %7761 = vsyncadd (%p9175_p11), [#allocation33], 4294967264 }
 0x2f5   : > { %7763 = dma.done.wait (%p9176_p13), [#allocation36], 272   ;;  %p9177_p1 = pmov %p9155_p0 }
 0x2f6   : > { %p9178_p2 = pmov %p9155_p0 }
 0x2f7   : > { %7765 = vsyncadd (%p9177_p1), [#allocation36], 4294967024 }
 0x2f8   : > { %7767 = dma.done.wait (%p9178_p2), [#allocation39], 1552   ;;  %p9179_p3 = pmov %p9155_p0 }
 0x2f9   : > { %p9180_p4 = pmov %p9155_p0 }
 0x2fa   : > { %7769 = vsyncadd (%p9179_p3), [#allocation39], 4294965744 }
 0x2fb   : > { %7771 = dma.done.wait (%p9180_p4), [#allocation42], 3072   ;;  %p9181_p5 = pmov %p9155_p0 }
 0x2fd   : > { %7773 = vsyncadd (%p9181_p5), [#allocation42], 4294964224 }
 0x2fe   : > { %1410 = sfence }
 0x2ff   : > { %p1498_p0 = scmp.lt.s32.totalorder %s8088_s22, 1  ;;  %vm1512_vm0 = vcmask 7168   ;;  %vm1521_vm1 = vcmask 5120   ;;  %v7862_v0 = vmov 0   ;;  %s9182_s16 = sld [smem:[#allocation61_spill]]  ;;  %v7863_v1 = vmov 0.0  }
 0x300   : > { %6826 = vset.pattern.permute.xlu1 %v7862_v0  ;;  %6825 = vset.pattern.permute.xlu0 %v7862_v0  ;;  %1513 = vst.msk [vmem:[#allocation2] sm:$0xff] %vm1512_vm0, %v7863_v1  ;;  %1514 = vst.msk [vmem:[#allocation2 + $0x8] sm:$0xff] %vm1512_vm0, %v7863_v1  ;;  %vm1862_vm2 = vcmask 130048   ;;  %v7864_v20 = vmov -1e+30   ;;  %vm1867_vm3 = vcmask 123904  }
 0x301   : > { %1515 = vst.msk [vmem:[#allocation2 + $0x10] sm:$0xff] %vm1512_vm0, %v7863_v1  ;;  %1516 = vst.msk [vmem:[#allocation2 + $0x18] sm:$0xff] %vm1512_vm0, %v7863_v1  ;;  %s1499_s11 = scalar_select %p1498_p0, %s8088_s22, 1  ;;  %6015 = vmatprep.subr.bf16.mxu0 %v7863_v1  ;;  %6021 = vmatprep.subr.bf16.mxu1 %v7863_v1  ;;  %v6827_v39 = vld [vmem:[#allocation10 + $0x8] sm:$0xff]   ;;  %v6828_v40 = vld [vmem:[#allocation10] sm:$0xff]   ;;  %vm7865_vm4 = vmmov 0  }
 0x302   : > { %1517 = vst.msk [vmem:[#allocation2 + $0x20] sm:$0xff] %vm1512_vm0, %v7863_v1  ;;  %1518 = vst.msk [vmem:[#allocation2 + $0x28] sm:$0xff] %vm1512_vm0, %v7863_v1  ;;  %6016 = vmatpush3.bf16.msra.mxu0 %v6827_v39  ;;  %6022 = vmatpush3.bf16.msra.mxu1 %v6828_v40  ;;  %v5578_v59 = vld [vmem:[#allocation7 + $0x1] ss:$0 sm:$0xff]  ;;  %v5579_v60 = vld [vmem:[#allocation7 + $0x2] ss:$0 sm:$0xff] }
 0x303   : > { %1519 = vst.msk [vmem:[#allocation2 + $0x30] sm:$0xff] %vm1512_vm0, %v7863_v1  ;;  %1520 = vst.msk [vmem:[#allocation2 + $0x38] sm:$0xff] %vm1512_vm0, %v7863_v1  ;;  %s5840_s23 = sshll.u32 %s1499_s11, 6  ;;  %6017 = vmatprep.mubr.msk.bf16.mxu0 %vm7865_vm4, %v7863_v1  ;;  %6023 = vmatprep.mubr.msk.bf16.mxu1 %vm7865_vm4, %v7863_v1  ;;  %v5577_v62 = vld [vmem:[#allocation7] ss:$0 sm:$0xff]  ;;  %s8588_s17 = sld [smem:[#allocation3]] }
 0x304   : > { %1522 = vst.msk [vmem:[#allocation2 + $0x40] sm:$0x3f] %vm1521_vm1, %v7863_v1  ;;  %6027 = vmatprep.subr.bf16.mxu0 %v7863_v1  ;;  %6033 = vmatprep.subr.bf16.mxu1 %v7863_v1  ;;  %vm2118_vm9 = vcmask 261120   ;;  %vm2120_vm10 = vcmask 254976   ;;  %s8623_s5 = sld [smem:[#allocation3 + $0x1]]  ;;  %s8671_s9 = sld [smem:[#allocation3 + $0x2]] }
 0x305   : > { %s1502_s3 = scalar_lea.vmem %s9182_s16, %s5840_s23  ;;  %s8718_s10 = sld [smem:[#allocation3 + $0x3]]  ;;  %vm3392_vm1 = vcmask 521216  }
 0x306   : > { %v1507_v2 = vld [vmem:[%s1502_s3 + $0x18] sm:$0xff]  ;;  %v1508_v3 = vld [vmem:[%s1502_s3 + $0x20] sm:$0xff]  ;;  %v1509_v4 = vld [vmem:[%s1502_s3 + $0x28] sm:$0xff]  ;;  %s9183_s4 = sld [smem:[#allocation75_spill]]  ;;  %s8769_s1 = sld [smem:[#allocation3 + $0x4]] }
 0x307   : > { %1526 = vst.msk [vmem:[#allocation2 + $0x1b] sm:$0xff] %vm1512_vm0, %v1507_v2  ;;  %1527 = vst.msk [vmem:[#allocation2 + $0x23] sm:$0xff] %vm1512_vm0, %v1508_v3  ;;  %v1504_v5 = vld [vmem:[%s1502_s3] sm:$0xff]  ;;  %v1505_v6 = vld [vmem:[%s1502_s3 + $0x8] sm:$0xff]  ;;  %s9184_s15 = sld [smem:[#allocation79_spill]]  ;;  %s8851_s16 = sld [smem:[#allocation3 + $0x5]] }
 0x308   : > { %1528 = vst.msk [vmem:[#allocation2 + $0x2b] sm:$0xff] %vm1512_vm0, %v1509_v4  ;;  %v1510_v7 = vld [vmem:[%s1502_s3 + $0x30] sm:$0xff]  ;;  %1523 = vst.msk [vmem:[#allocation2 + $0x3] sm:$0xff] %vm1512_vm0, %v1504_v5  ;;  %v1511_v8 = vld [vmem:[%s1502_s3 + $0x38] sm:$0xff]  ;;  %s9186_s23 = sld [smem:[#allocation81_spill]]  ;;  %p9192_p9 = scmp.ne.s32.totalorder %s9133_s7, 0 }
 0x309   : > { %1524 = vst.msk [vmem:[#allocation2 + $0xb] sm:$0xff] %vm1512_vm0, %v1505_v6  ;;  %1529 = vst.msk [vmem:[#allocation2 + $0x33] sm:$0xff] %vm1512_vm0, %v1510_v7  ;;  %v1506_v9 = vld [vmem:[%s1502_s3 + $0x10] sm:$0xff]  ;;  %v5580_v3 = vld [vmem:[#allocation7 + $0x3] ss:$0 sm:$0xff]  ;;  %s9187_s3 = sld [smem:[#allocation82_spill]] }
 0x30a   : > { %1530 = vst.msk [vmem:[#allocation2 + $0x3b] sm:$0xff] %vm1512_vm0, %v1511_v8  ;;  %1525 = vst.msk [vmem:[#allocation2 + $0x13] sm:$0xff] %vm1512_vm0, %v1506_v9  ;;  %v5581_v8 = vld [vmem:[#allocation7 + $0x4] ss:$0 sm:$0xff] }
 0x30d   : > { %s9185_s11 = smov %s9184_s15 }
 0x30f   : > { %v1535_v10 = vld [vmem:[#allocation2 + $0x20] ss:$2 sm:$0xff]  ;;  %v1578_v22 = vld [vmem:[#allocation2 + $0x21] ss:$2 sm:$0xff] }
 0x310   : > { %1551 = vperm.xlu1 %6826, %v1535_v10   ;;  %v1531_v11 = vld [vmem:[#allocation2] ss:$2 sm:$0xff]  ;;  %v1574_v12 = vld [vmem:[#allocation2 + $0x1] ss:$2 sm:$0xff] }
 0x311   : > { %v1618_v13 = vld [vmem:[#allocation2 + $0x2] ss:$2 sm:$0xff]  ;;  %v1662_v14 = vld [vmem:[#allocation2 + $0x3] ss:$2 sm:$0xff]  ;;  %1541 = vperm.xlu0 %6825, %v1531_v11   ;;  %v1620_v23 = vld [vmem:[#allocation2 + $0x12] ss:$2 sm:$0xff] }
 0x312   : > { %v1706_v15 = vld [vmem:[#allocation2 + $0x4] ss:$2 sm:$0xff]  ;;  %v1750_v18 = vld [vmem:[#allocation2 + $0x5] ss:$2 sm:$0xff]  ;;  %v1708_v25 = vld [vmem:[#allocation2 + $0x14] ss:$2 sm:$0xff] }
 0x313   : > { %v1537_v16 = vld [vmem:[#allocation2 + $0x30] ss:$2 sm:$0xff]  ;;  %v1576_v21 = vld [vmem:[#allocation2 + $0x11] ss:$2 sm:$0xff] }
 0x314   : > { %v1533_v17 = vld [vmem:[#allocation2 + $0x10] ss:$2 sm:$0xff]  ;;  %1556 = vperm.xlu1 %6826, %v1537_v16   ;;  %v1664_v24 = vld [vmem:[#allocation2 + $0x13] ss:$2 sm:$0xff]  ;;  %v1666_v32 = vld [vmem:[#allocation2 + $0x23] ss:$2 sm:$0xff] }
 0x315   : > { %v1794_v19 = vld [vmem:[#allocation2 + $0x6] ss:$2 sm:$0xff]  ;;  %1546 = vperm.xlu0 %6825, %v1533_v17   ;;  %v1752_v26 = vld [vmem:[#allocation2 + $0x15] ss:$2 sm:$0xff]  ;;  %v1796_v27 = vld [vmem:[#allocation2 + $0x16] ss:$2 sm:$0xff] }
 0x316   : > { %1863 = vst.msk [vmem:[#allocation2] sm:$0xff] %vm1862_vm2, %v7864_v20  ;;  %1864 = vst.msk [vmem:[#allocation2 + $0x8] sm:$0xff] %vm1862_vm2, %v7864_v20  ;;  %v1580_v28 = vld [vmem:[#allocation2 + $0x31] ss:$2 sm:$0xff]  ;;  %v1624_v29 = vld [vmem:[#allocation2 + $0x32] ss:$2 sm:$0xff] }
 0x317   : > { %1868 = vst.msk [vmem:[#allocation2 + $0x20] sm:$0x3] %vm1867_vm3, %v7864_v20  ;;  %v1622_v30 = vld [vmem:[#allocation2 + $0x22] ss:$2 sm:$0xff]  ;;  %v1668_v31 = vld [vmem:[#allocation2 + $0x33] ss:$2 sm:$0xff] }
 0x318   : > { %1590 = vperm.xlu1 %6826, %v1576_v21   ;;  %1866 = vst.msk [vmem:[#allocation2 + $0x18] sm:$0xff] %vm1862_vm2, %v7864_v20  ;;  %1865 = vst.msk [vmem:[#allocation2 + $0x10] sm:$0xff] %vm1862_vm2, %v7864_v20  ;;  %v1712_v33 = vld [vmem:[#allocation2 + $0x34] ss:$2 sm:$0xff]  ;;  %v1710_v34 = vld [vmem:[#allocation2 + $0x24] ss:$2 sm:$0xff] }
 0x319   : > { %1585 = vperm.xlu0 %6825, %v1574_v12   ;;  %v1756_v35 = vld [vmem:[#allocation2 + $0x35] ss:$2 sm:$0xff]  ;;  %v1754_v36 = vld [vmem:[#allocation2 + $0x25] ss:$2 sm:$0xff]  ;;  %v1800_v37 = vld [vmem:[#allocation2 + $0x36] ss:$2 sm:$0xff] }
 0x31a   : > { %v1798_v38 = vld [vmem:[#allocation2 + $0x26] ss:$2 sm:$0xff]  ;;  %v5582_v17 = vld [vmem:[#allocation7 + $0x5] ss:$0 sm:$0xff] }
 0x31c   : > { %1600 = vperm.xlu1 %6826, %v1580_v28  }
 0x31d   : > { %1595 = vperm.xlu0 %6825, %v1578_v22  }
 0x320   : > { %1634 = vperm.xlu1 %6826, %v1620_v23  }
 0x321   : > { %1629 = vperm.xlu0 %6825, %v1618_v13  }
 0x324   : > { %1644 = vperm.xlu1 %6826, %v1624_v29  }
 0x325   : > { %1639 = vperm.xlu0 %6825, %v1622_v30  }
 0x328   : > { %1678 = vperm.xlu1 %6826, %v1664_v24  }
 0x329   : > { %1673 = vperm.xlu0 %6825, %v1662_v14  }
 0x32c   : > { %1688 = vperm.xlu1 %6826, %v1668_v31  }
 0x32d   : > { %1683 = vperm.xlu0 %6825, %v1666_v32  }
 0x330   : > { %1722 = vperm.xlu1 %6826, %v1708_v25  }
 0x331   : > { %1717 = vperm.xlu0 %6825, %v1706_v15  }
 0x334   : > { %1732 = vperm.xlu1 %6826, %v1712_v33  }
 0x335   : > { %1727 = vperm.xlu0 %6825, %v1710_v34  }
 0x338   : > { %1766 = vperm.xlu1 %6826, %v1752_v26  }
 0x339   : > { %1761 = vperm.xlu0 %6825, %v1750_v18  }
 0x33c   : > { %1776 = vperm.xlu1 %6826, %v1756_v35  }
 0x33d   : > { %1771 = vperm.xlu0 %6825, %v1754_v36   ;;  %v5583_v36 = vld [vmem:[#allocation7 + $0x6] ss:$0 sm:$0xff] }
 0x340   : > { %1810 = vperm.xlu1 %6826, %v1796_v27  }
 0x341   : > { %1805 = vperm.xlu0 %6825, %v1794_v19  }
 0x344   : > { %1820 = vperm.xlu1 %6826, %v1800_v37  }
 0x345   : > { %1815 = vperm.xlu0 %6825, %v1798_v38  }
 0x38f   : > { %v1552_v41 = vpop.permute.xlu1 %1551 }
 0x390   : > { %v1542_v42 = vpop.permute.xlu0 %1541  ;;  %v1567_v22 = vmul.f32 %v5577_v62, %v1552_v41 }
 0x391   : > { %v1565_v6 = vmul.f32 %v5577_v62, %v1542_v42 }
 0x393   : > { %v1557_v43 = vpop.permute.xlu1 %1556 }
 0x394   : > { %v1547_v44 = vpop.permute.xlu0 %1546  ;;  %v1568_v18 = vmul.f32 %v5577_v62, %v1557_v43 }
 0x395   : > { %v1566_v4 = vmul.f32 %v5577_v62, %v1547_v44 }
 0x397   : > { %v1591_v45 = vpop.permute.xlu1 %1590 }
 0x398   : > { %v1586_v46 = vpop.permute.xlu0 %1585  ;;  %v1610_v63 = vmul.f32 %v5578_v59, %v1591_v45 }
 0x399   : > { %v1609_v2 = vmul.f32 %v5578_v59, %v1586_v46 }
 0x39a   : > { %v1614_v10 = vadd.f32 %v1610_v63, %v1566_v4 }
 0x39b   : > { %v1601_v47 = vpop.permute.xlu1 %1600  ;;  %v1613_v14 = vadd.f32 %v1609_v2, %v1565_v6 }
 0x39c   : > { %v1596_v48 = vpop.permute.xlu0 %1595  ;;  %v1612_v11 = vmul.f32 %v5578_v59, %v1601_v47 }
 0x39d   : > { %v1611_v15 = vmul.f32 %v5578_v59, %v1596_v48 }
 0x39e   : > { %v1616_v27 = vadd.f32 %v1612_v11, %v1568_v18 }
 0x39f   : > { %v1635_v49 = vpop.permute.xlu1 %1634  ;;  %v1615_v32 = vadd.f32 %v1611_v15, %v1567_v22 }
 0x3a0   : > { %v1630_v50 = vpop.permute.xlu0 %1629  ;;  %v1654_v5 = vmul.f32 %v5579_v60, %v1635_v49 }
 0x3a1   : > { %v1653_v7 = vmul.f32 %v5579_v60, %v1630_v50 }
 0x3a2   : > { %v1658_v19 = vadd.f32 %v1654_v5, %v1614_v10 }
 0x3a3   : > { %v1645_v51 = vpop.permute.xlu1 %1644  ;;  %v1657_v23 = vadd.f32 %v1653_v7, %v1613_v14 }
 0x3a4   : > { %v1640_v52 = vpop.permute.xlu0 %1639  ;;  %v1656_v20 = vmul.f32 %v5579_v60, %v1645_v51 }
 0x3a5   : > { %v1655_v24 = vmul.f32 %v5579_v60, %v1640_v52  ;;  %v5584_v52 = vld [vmem:[#allocation8] ss:$0 sm:$0xff] }
 0x3a6   : > { %v1660_v37 = vadd.f32 %v1656_v20, %v1616_v27 }
 0x3a7   : > { %v1679_v53 = vpop.permute.xlu1 %1678  ;;  %v1659_v40 = vadd.f32 %v1655_v24, %v1615_v32 }
 0x3a8   : > { %v1674_v54 = vpop.permute.xlu0 %1673  ;;  %v1698_v12 = vmul.f32 %v5580_v3, %v1679_v53 }
 0x3a9   : > { %v1697_v16 = vmul.f32 %v5580_v3, %v1674_v54 }
 0x3aa   : > { %v1702_v28 = vadd.f32 %v1698_v12, %v1658_v19 }
 0x3ab   : > { %v1689_v55 = vpop.permute.xlu1 %1688  ;;  %v1701_v33 = vadd.f32 %v1697_v16, %v1657_v23 }
 0x3ac   : > { %v1684_v56 = vpop.permute.xlu0 %1683  ;;  %v1700_v29 = vmul.f32 %v5580_v3, %v1689_v55 }
 0x3ad   : > { %v1699_v34 = vmul.f32 %v5580_v3, %v1684_v56 }
 0x3ae   : > { %v1704_v44 = vadd.f32 %v1700_v29, %v1660_v37  ;;  %v6830_v29 = vld [vmem:[#allocation16] sm:$0xff]  }
 0x3af   : > { %v1723_v57 = vpop.permute.xlu1 %1722  ;;  %v1703_v49 = vadd.f32 %v1699_v34, %v1659_v40  ;;  %v6831_v34 = vld [vmem:[#allocation13 + $0x10] sm:$0xff]  }
 0x3b0   : > { %v1718_v58 = vpop.permute.xlu0 %1717  ;;  %v1742_v21 = vmul.f32 %v5581_v8, %v1723_v57  ;;  %v1853_v57 = vstv %s8588_s17  ;;  %s8911_s17 = sld [smem:[#allocation3 + $0x6]] }
 0x3b1   : > { %v1741_v25 = vmul.f32 %v5581_v8, %v1718_v58 }
 0x3b2   : > { %v1746_v38 = vadd.f32 %v1742_v21, %v1702_v28 }
 0x3b3   : > { %v1733_v61 = vpop.permute.xlu1 %1732  ;;  %v1745_v41 = vadd.f32 %v1741_v25, %v1701_v33 }
 0x3b4   : > { %v1728_v0 = vpop.permute.xlu0 %1727  ;;  %v1744_v39 = vmul.f32 %v5581_v8, %v1733_v61 }
 0x3b5   : > { %v1743_v42 = vmul.f32 %v5581_v8, %v1728_v0 }
 0x3b6   : > { %v1748_v54 = vadd.f32 %v1744_v39, %v1704_v44 }
 0x3b7   : > { %v1767_v9 = vpop.permute.xlu1 %1766  ;;  %v1747_v56 = vadd.f32 %v1743_v42, %v1703_v49  ;;  %v2060_v49 = vstv %s8623_s5  ;;  %s9188_s5 = sld [smem:[#allocation85_spill]] }
 0x3b8   : > { %v1762_v13 = vpop.permute.xlu0 %1761  ;;  %v1786_v30 = vmul.f32 %v5582_v17, %v1767_v9 }
 0x3b9   : > { %v1785_v35 = vmul.f32 %v5582_v17, %v1762_v13 }
 0x3ba   : > { %v1790_v45 = vadd.f32 %v1786_v30, %v1746_v38 }
 0x3bb   : > { %v1777_v26 = vpop.permute.xlu1 %1776  ;;  %v1789_v50 = vadd.f32 %v1785_v35, %v1745_v41  ;;  %v6832_v35 = vld [vmem:[#allocation13 + $0x18] sm:$0xff]  }
 0x3bc   : > { %v1772_v31 = vpop.permute.xlu0 %1771  ;;  %v1788_v46 = vmul.f32 %v5582_v17, %v1777_v26  ;;  %v6829_v26 = vld [vmem:[#allocation10 + $0x10] sm:$0xff]  }
 0x3bd   : > { %v1787_v51 = vmul.f32 %v5582_v17, %v1772_v31 }
 0x3be   : > { %v1792_v60 = vadd.f32 %v1788_v46, %v1748_v54  ;;  %v5592_v46 = vld [vmem:[#allocation11] ss:$0 sm:$0xff] }
 0x3bf   : > { %v1811_v43 = vpop.permute.xlu1 %1810  ;;  %v1791_v0 = vadd.f32 %v1787_v51, %v1747_v56 }
 0x3c0   : > { %v1830_v47 = vmul.f32 %v5583_v36, %v1811_v43  ;;  %v1806_v48 = vpop.permute.xlu0 %1805 }
 0x3c1   : > { %v1829_v53 = vmul.f32 %v5583_v36, %v1806_v48 }
 0x3c2   : > { %v1834_v55 = vadd.f32 %v1830_v47, %v1790_v45 }
 0x3c3   : > { %v1833_v58 = vadd.f32 %v1829_v53, %v1789_v50  ;;  %v1821_v59 = vpop.permute.xlu1 %1820 }
 0x3c4   : > { %v1845_v61 = vadd.f32 %v5584_v52, %v1834_v55  ;;  %v1832_v62 = vmul.f32 %v5583_v36, %v1821_v59  ;;  %v1816_v63 = vpop.permute.xlu0 %1815  ;;  %v6833_v55 = vld [vmem:[#allocation13] sm:$0xff]  }
 0x3c5   : > { %v1844_v2 = vadd.f32 %v5584_v52, %v1833_v58  ;;  %v1831_v3 = vmul.f32 %v5583_v36, %v1816_v63  ;;  %v6836_v63 = vld [vmem:[#allocation13 + $0x28] sm:$0xff]  }
 0x3c6   : > { %vm1850_vm5 = vcmp.ge.f32.partialorder %v1845_v61, 0.0  ;;  %v1855_v4 = vmul.f32 %v1853_v57, %v1845_v61  ;;  %v1836_v5 = vadd.f32 %v1832_v62, %v1792_v60  ;;  %v6834_v60 = vld [vmem:[#allocation13 + $0x8] sm:$0xff]  }
 0x3c7   : > { %vm1849_vm6 = vcmp.ge.f32.partialorder %v1844_v2, 0.0  ;;  %v1854_v6 = vmul.f32 %v1853_v57, %v1844_v2  ;;  %v1835_v7 = vadd.f32 %v1831_v3, %v1791_v0  ;;  %v6838_v3 = vld [vmem:[#allocation19 + $0x18] sm:$0xff]  }
 0x3c8   : > { %v1859_v8 = vsel %vm1850_vm5, %v1845_v61, %v1855_v4  ;;  %v1847_v9 = vadd.f32 %v5584_v52, %v1836_v5  ;;  %v6835_v61 = vld [vmem:[#allocation13 + $0x20] sm:$0xff]   ;;  %v5593_v4 = vld [vmem:[#allocation17] ss:$0 sm:$0xff]  ;;  %vm3441_vm5 = vcmask 523264  }
 0x3c9   : > { %1870 = vst.msk [vmem:[#allocation2 + $0x9] sm:$0xff] %vm1862_vm2, %v1859_v8  ;;  %v1858_v10 = vsel %vm1849_vm6, %v1844_v2, %v1854_v6  ;;  %v1846_v11 = vadd.f32 %v5584_v52, %v1835_v7  ;;  %v6837_v2 = vld [vmem:[#allocation19 + $0x10] sm:$0xff]  }
 0x3ca   : > { %1869 = vst.msk [vmem:[#allocation2 + $0x1] sm:$0xff] %vm1862_vm2, %v1858_v10  ;;  %vm1852_vm7 = vcmp.ge.f32.partialorder %v1847_v9, 0.0  ;;  %v1857_v12 = vmul.f32 %v1853_v57, %v1847_v9  ;;  %v5605_v6 = vld [vmem:[#allocation14] ss:$0 sm:$0xff] }
 0x3cb   : > { %vm1851_vm8 = vcmp.ge.f32.partialorder %v1846_v11, 0.0  ;;  %v1856_v13 = vmul.f32 %v1853_v57, %v1846_v11 }
 0x3cc   : > { %v1861_v14 = vsel %vm1852_vm7, %v1847_v9, %v1857_v12 }
 0x3cd   : > { %1872 = vst.msk [vmem:[#allocation2 + $0x19] sm:$0xff] %vm1862_vm2, %v1861_v14  ;;  %v1860_v15 = vsel %vm1851_vm8, %v1846_v11, %v1856_v13  ;;  %v6839_v14 = vld [vmem:[#allocation19] sm:$0xff]  }
 0x3ce   : > { %1871 = vst.msk [vmem:[#allocation2 + $0x11] sm:$0xff] %vm1862_vm2, %v1860_v15 }
 0x3d1   : > { %v1873_v16 = vld [vmem:[#allocation2] ss:$2 sm:$0xff]  ;;  %v1875_v17 = vld [vmem:[#allocation2 + $0x1] ss:$2 sm:$0xff] }
 0x3d2   : > { %v1879_v18 = vld [vmem:[#allocation2 + $0x2] ss:$2 sm:$0xff]  ;;  %v1877_v19 = vmax.f32 %v1873_v16, %v1875_v17 }
 0x3d3   : > { %1884 = vst.msk [vmem:[#allocation2] sm:$0xff] %vm1862_vm2, %v7863_v1  ;;  %1885 = vst.msk [vmem:[#allocation2 + $0x8] sm:$0xff] %vm1862_vm2, %v7863_v1 }
 0x3d4   : > { %v1881_v20 = vmax.f32 %v1877_v19, %v1879_v18  ;;  %v6840_v19 = vld [vmem:[#allocation19 + $0x8] sm:$0xff]  }
 0x3d5   : > { %v1874_v21 = vld [vmem:[#allocation2 + $0x10] ss:$2 sm:$0xff]  ;;  %v1876_v22 = vld [vmem:[#allocation2 + $0x11] ss:$2 sm:$0xff] }
 0x3d6   : > { %1887 = vst.msk [vmem:[#allocation2 + $0x1] sm:$0xff] %vm1862_vm2, %v1881_v20  ;;  %v1878_v23 = vmax.f32 %v1874_v21, %v1876_v22  ;;  %v1880_v24 = vld [vmem:[#allocation2 + $0x12] ss:$2 sm:$0xff]  ;;  %v6841_v20 = vld [vmem:[#allocation19 + $0x20] sm:$0xff]  }
 0x3d7   : > { %1886 = vst.msk [vmem:[#allocation2 + $0x10] sm:$0x3] %vm1867_vm3, %v7863_v1  ;;  %v6842_v22 = vld [vmem:[#allocation19 + $0x28] sm:$0xff]   ;;  %vm3394_vm3 = vcmask 519168  }
 0x3d8   : > { %v1882_v25 = vmax.f32 %v1878_v23, %v1880_v24  ;;  %v6843_v24 = vld [vmem:[#allocation22 + $0x10] sm:$0xff]  }
 0x3da   : > { %1888 = vst.msk [vmem:[#allocation2 + $0x9] sm:$0xff] %vm1862_vm2, %v1882_v25  ;;  %v6844_v25 = vld [vmem:[#allocation22] sm:$0xff]  }
 0x3e1   : > { %v1889_v27 = vld [vmem:[#allocation2] ss:$2 sm:$0xff]  ;;  %v1893_v28 = vld [vmem:[#allocation2 + $0x1] ss:$2 sm:$0xff] }
 0x3e2   : > { %v1894_v30 = vpack.c.bf16 %v1893_v28, %v1893_v28  ;;  %v1890_v31 = vpack.c.bf16 %v1889_v27, %v1889_v27  ;;  %v1996_v32 = vld [vmem:[#allocation2 + $0x2] ss:$2 sm:$0xff] }
 0x3e3   : > { %v1997_v33 = vpack.c.bf16 %v1996_v32, %v1996_v32  ;;  %2119 = vst.msk [vmem:[#allocation2] sm:$0xff] %vm2118_vm9, %v7863_v1  ;;  %v6846_v27 = vld [vmem:[#allocation22 + $0x8] sm:$0xff]  }
 0x3e4   : > { %6018 = vmatmul.mubr.msk.bf16.vlgmr.msra.gmra.mrb[0].mxu0 %vm1862_vm2, %v1894_v30  ;;  %6024 = vmatmul.mubr.msk.bf16.vlgmr.msra.gmra.mrb[0].mxu1 %vm1862_vm2, %v1890_v31  ;;  %2121 = vst.msk [vmem:[#allocation2 + $0x8] sm:$0x3] %vm2120_vm10, %v7863_v1 }
 0x3e5   : > { %6028 = vmatpush3.bf16.msra.mxu0 %v6829_v26  ;;  %6034 = vmatpush3.bf16.msra.mxu1 %v6830_v29  ;;  %v6845_v26 = vld [vmem:[#allocation22 + $0x18] sm:$0xff]  }
 0x3e6   : > { %6029 = vmatprep.mubr.msk.bf16.mxu0 %vm7865_vm4, %v7863_v1  ;;  %6035 = vmatprep.mubr.msk.bf16.mxu1 %vm7865_vm4, %v7863_v1 }
 0x3e7   : > { %6039 = vmatprep.subr.bf16.mxu1 %v7863_v1  ;;  %6063 = vmatprep.subr.bf16.mxu0 %v7863_v1 }
 0x3ec   : > { %6030 = vmatmul.mubr.msk.bf16.vlgmr.msra.gmra.mrb[4].mxu0 %vm1862_vm2, %v1997_v33  ;;  %6036 = vmatmul.mubr.msk.bf16.vlgmr.msra.gmra.mrb[4].mxu1 %vm1862_vm2, %v1894_v30 }
 0x3ed   : > { %6043 = vmatprep.mubr.msk.bf16.mxu1 %vm7865_vm4, %v7863_v1  ;;  %6067 = vmatprep.mubr.msk.bf16.mxu0 %vm7865_vm4, %v7863_v1 }
 0x3ee   : > { %6040 = vmatpush3.bf16.msra.mxu1 %v6831_v34  ;;  %6064 = vmatpush3.bf16.msra.mxu0 %v6837_v2 }
 0x3ef   : > { %6041 = vmatprep.subr.bf16.mxu1 %v7863_v1  ;;  %6065 = vmatprep.subr.bf16.mxu0 %v7863_v1 }
 0x3f2   : > { %6042 = vmatpush3.bf16.msra.mxu1 %v6832_v35  ;;  %6066 = vmatpush3.bf16.msra.mxu0 %v6838_v3 }
 0x3f3   : > { %6047 = vmatprep.subr.bf16.mxu1 %v7863_v1  ;;  %6071 = vmatprep.subr.bf16.mxu0 %v7863_v1 }
 0x4b7   : > { %v1941_v36 = vpop.f32.mrb[0].mxu0  ;;  %v1990_v37 = vpop.f32.mrb[0].mxu1 }
 0x4b8   : > { %v1991_v38 = vadd.f32 %v1990_v37, %v1941_v36  ;;  %v6019_v39 = vpop.f32.mrb[1].mxu0  ;;  %v6025_v40 = vpop.f32.mrb[1].mxu1 }
 0x4b9   : > { %v1944_v41 = vpop.f32.mrb[2].mxu0  ;;  %v1993_v42 = vpop.f32.mrb[2].mxu1 }
 0x4ba   : > { %v6020_v43 = vpop.f32.mrb[3].mxu0  ;;  %v6026_v44 = vpop.f32.mrb[3].mxu1  ;;  %v2520_v41 = vstv %s8671_s9  ;;  %s9189_s9 = sld [smem:[#allocation84_spill]] }
 0x4bf   : > { %v2044_v45 = vpop.f32.mrb[4].mxu0 }
 0x4c0   : > { %v2050_v47 = vadd.f32 %v2044_v45, %v1991_v38  ;;  %v6031_v48 = vpop.f32.mrb[5].mxu0  ;;  %v5616_v38 = vld [vmem:[#allocation20] ss:$0 sm:$0xff] }
 0x4c1   : > { %v2047_v50 = vpop.f32.mrb[6].mxu0 }
 0x4c2   : > { %v2058_v51 = vadd.f32 %v5592_v46, %v2050_v47  ;;  %v6032_v52 = vpop.f32.mrb[7].mxu0  ;;  %v6847_v47 = vld [vmem:[#allocation22 + $0x20] sm:$0xff]  }
 0x4c4   : > { %vm2059_vm11 = vcmp.ge.f32.partialorder %v2058_v51, 0.0  ;;  %v2061_v53 = vmul.f32 %v2060_v49, %v2058_v51 }
 0x4c6   : > { %v2062_v54 = vsel %vm2059_vm11, %v2058_v51, %v2061_v53  ;;  %v6848_v53 = vld [vmem:[#allocation22 + $0x28] sm:$0xff]  }
 0x4c7   : > { %2122 = vst.msk [vmem:[#allocation2 + $0x1] sm:$0xff] %vm2118_vm9, %v2062_v54 }
 0x4ce   : > { %v2129_v56 = vld [vmem:[#allocation2 + $0x1] sm:$0xff] }
 0x4cf   : > { %v2246_v57 = vld [vmem:[#allocation2 + $0x2] sm:$0xff]  ;;  %v2130_v59 = vpack.c.bf16 %v2129_v56, %v2129_v56  ;;  %v6850_v56 = vld [vmem:[#allocation25] sm:$0xff]  }
 0x4d0   : > { %v2123_v58 = vld [vmem:[#allocation2] sm:$0xff]  ;;  %2323 = vst.msk [vmem:[#allocation2 + $0x8] sm:$0x3] %vm2120_vm10, %v7863_v1  ;;  %v2247_v0 = vpack.c.bf16 %v2246_v57, %v2246_v57 }
 0x4d1   : > { %2322 = vst.msk [vmem:[#allocation2] sm:$0xff] %vm2118_vm9, %v7863_v1  ;;  %6044 = vmatmul.mubr.msk.bf16.vlgmr.msra.gmra.mrb[4].mxu1 %vm2118_vm9, %v2130_v59  ;;  %v2124_v62 = vpack.c.bf16 %v2123_v58, %v2123_v58  ;;  %v6851_v57 = vld [vmem:[#allocation25 + $0x18] sm:$0xff]   ;;  %v6852_v58 = vld [vmem:[#allocation25 + $0x8] sm:$0xff]  }
 0x4d2   : > { %6048 = vmatpush3.bf16.msra.mxu1 %v6833_v55  ;;  %6051 = vmatprep.mubr.msk.bf16.mxu1 %vm7865_vm4, %v7863_v1  ;;  %v6849_v55 = vld [vmem:[#allocation25 + $0x10] sm:$0xff]  }
 0x4d3   : > { %6049 = vmatprep.subr.bf16.mxu1 %v7863_v1 }
 0x4d6   : > { %6050 = vmatpush3.bf16.msra.mxu1 %v6834_v60 }
 0x4d7   : > { %6055 = vmatprep.subr.bf16.mxu1 %v7863_v1 }
 0x4dd   : > { %6052 = vmatmul.mubr.msk.bf16.vlgmr.msra.gmra.mrb[4].mxu1 %vm2118_vm9, %v2124_v62 }
 0x4de   : > { %6056 = vmatpush3.bf16.msra.mxu1 %v6835_v61  ;;  %6059 = vmatprep.mubr.msk.bf16.mxu1 %vm7865_vm4, %v7863_v1 }
 0x4df   : > { %6057 = vmatprep.subr.bf16.mxu1 %v7863_v1 }
 0x4e2   : > { %6058 = vmatpush3.bf16.msra.mxu1 %v6836_v63 }
 0x4e3   : > { %6095 = vmatprep.subr.bf16.mxu1 %v7863_v1 }
 0x4e9   : > { %6060 = vmatmul.mubr.msk.bf16.vlgmr.msra.gmra.mrb[4].mxu1 %vm2118_vm9, %v2247_v0 }
 0x4ea   : > { %6099 = vmatprep.mubr.msk.bf16.mxu1 %vm7865_vm4, %v7863_v1  ;;  %6096 = vmatpush3.bf16.msra.mxu1 %v6844_v25  ;;  %v6857_v25 = vld [vmem:[#allocation28 + $0x18] sm:$0xff]  }
 0x4eb   : > { %6097 = vmatprep.subr.bf16.mxu1 %v7863_v1 }
 0x4ee   : > { %6098 = vmatpush3.bf16.msra.mxu1 %v6846_v27 }
 0x4ef   : > { %6111 = vmatprep.subr.bf16.mxu1 %v7863_v1 }
 0x5bc   : > { %v2302_v5 = vpop.f32.mrb[4].mxu1 }
 0x5bd   : > { %v6451_v7 = vadd.f32 %v5593_v4, %v2302_v5  ;;  %v6061_v8 = vpop.f32.mrb[5].mxu1 }
 0x5be   : > { %v2305_v9 = vpop.f32.mrb[6].mxu1 }
 0x5bf   : > { %v6452_v10 = vadd.f32 %v6451_v7, %v5605_v6  ;;  %v6062_v11 = vpop.f32.mrb[7].mxu1  ;;  %v5626_v6 = vld [vmem:[#allocation23] ss:$0 sm:$0xff] }
 0x5c1   : > { %vm2318_vm12 = vcmp.ge.f32.partialorder %v6452_v10, 0.0  ;;  %v2319_v12 = vmul.f32 %v6452_v10, %v2060_v49 }
 0x5c3   : > { %v8646_v13 = vsel %vm2318_vm12, %v6452_v10, %v2319_v12 }
 0x5c4   : > { %2324 = vst.msk [vmem:[#allocation2 + $0x1] sm:$0xff] %vm2118_vm9, %v8646_v13 }
 0x5cb   : > { %v2331_v15 = vld [vmem:[#allocation2 + $0x1] sm:$0xff] }
 0x5cc   : > { %v2448_v16 = vld [vmem:[#allocation2 + $0x2] sm:$0xff]  ;;  %v2332_v18 = vpack.c.bf16 %v2331_v15, %v2331_v15 }
 0x5cd   : > { %v2325_v17 = vld [vmem:[#allocation2] sm:$0xff]  ;;  %2524 = vst.msk [vmem:[#allocation2 + $0x8] sm:$0x3] %vm2120_vm10, %v7863_v1  ;;  %v2449_v23 = vpack.c.bf16 %v2448_v16, %v2448_v16  ;;  %v6853_v16 = vld [vmem:[#allocation25 + $0x20] sm:$0xff]  }
 0x5ce   : > { %2523 = vst.msk [vmem:[#allocation2] sm:$0xff] %vm2118_vm9, %v7863_v1  ;;  %6068 = vmatmul.mubr.msk.bf16.vlgmr.msra.gmra.mrb[8].mxu0 %vm2118_vm9, %v2332_v18  ;;  %v2326_v21 = vpack.c.bf16 %v2325_v17, %v2325_v17 }
 0x5cf   : > { %6072 = vmatpush3.bf16.msra.mxu0 %v6839_v14  ;;  %6075 = vmatprep.mubr.msk.bf16.mxu0 %vm7865_vm4, %v7863_v1 }
 0x5d0   : > { %6073 = vmatprep.subr.bf16.mxu0 %v7863_v1 }
 0x5d3   : > { %6074 = vmatpush3.bf16.msra.mxu0 %v6840_v19 }
 0x5d4   : > { %6079 = vmatprep.subr.bf16.mxu0 %v7863_v1 }
 0x5d6   : > { %6076 = vmatmul.mubr.msk.bf16.vlgmr.msra.gmra.mrb[12].mxu0 %vm2118_vm9, %v2326_v21 }
 0x5d7   : > { %6080 = vmatpush3.bf16.msra.mxu0 %v6841_v20  ;;  %6083 = vmatprep.mubr.msk.bf16.mxu0 %vm7865_vm4, %v7863_v1 }
 0x5d8   : > { %6081 = vmatprep.subr.bf16.mxu0 %v7863_v1 }
 0x5db   : > { %6082 = vmatpush3.bf16.msra.mxu0 %v6842_v22 }
 0x5dc   : > { %6087 = vmatprep.subr.bf16.mxu0 %v7863_v1 }
 0x5de   : > { %6084 = vmatmul.mubr.msk.bf16.vlgmr.msra.gmra.mrb[16].mxu0 %vm2118_vm9, %v2449_v23  ;;  %v6855_v23 = vld [vmem:[#allocation28 + $0x10] sm:$0xff]  }
 0x5df   : > { %6091 = vmatprep.mubr.msk.bf16.mxu0 %vm7865_vm4, %v7863_v1  ;;  %6088 = vmatpush3.bf16.msra.mxu0 %v6843_v24  ;;  %v6856_v24 = vld [vmem:[#allocation28] sm:$0xff]  }
 0x5e0   : > { %6089 = vmatprep.subr.bf16.mxu0 %v7863_v1 }
 0x5e3   : > { %6090 = vmatpush3.bf16.msra.mxu0 %v6845_v26  ;;  %v6858_v26 = vld [vmem:[#allocation28 + $0x8] sm:$0xff]  }
 0x5e4   : > { %6103 = vmatprep.subr.bf16.mxu0 %v7863_v1 }
 0x6a1   : > { %v2387_v28 = vpop.f32.mrb[8].mxu0 }
 0x6a2   : > { %v6069_v29 = vpop.f32.mrb[9].mxu0 }
 0x6a3   : > { %v2390_v30 = vpop.f32.mrb[10].mxu0 }
 0x6a4   : > { %v6070_v31 = vpop.f32.mrb[11].mxu0 }
 0x6a9   : > { %v2442_v32 = vpop.f32.mrb[12].mxu0 }
 0x6aa   : > { %v2443_v33 = vadd.f32 %v2442_v32, %v2387_v28  ;;  %v6077_v34 = vpop.f32.mrb[13].mxu0 }
 0x6ab   : > { %v2445_v35 = vpop.f32.mrb[14].mxu0 }
 0x6ac   : > { %v6078_v36 = vpop.f32.mrb[15].mxu0 }
 0x6b1   : > { %v2504_v37 = vpop.f32.mrb[16].mxu0 }
 0x6b2   : > { %v2510_v39 = vadd.f32 %v2504_v37, %v2443_v33  ;;  %v6085_v40 = vpop.f32.mrb[17].mxu0  ;;  %v5637_v37 = vld [vmem:[#allocation26] ss:$0 sm:$0xff] }
 0x6b3   : > { %v2507_v42 = vpop.f32.mrb[18].mxu0  ;;  %v2923_v40 = vstv %s8718_s10  ;;  %s9190_s10 = sld [smem:[#allocation87_spill]] }
 0x6b4   : > { %v2518_v43 = vadd.f32 %v5616_v38, %v2510_v39  ;;  %v6086_v44 = vpop.f32.mrb[19].mxu0 }
 0x6b6   : > { %vm2519_vm13 = vcmp.ge.f32.partialorder %v2518_v43, 0.0  ;;  %v2521_v45 = vmul.f32 %v2520_v41, %v2518_v43 }
 0x6b8   : > { %v2522_v46 = vsel %vm2519_vm13, %v2518_v43, %v2521_v45  ;;  %vm5148_vm13 = vcmask 32768  }
 0x6b9   : > { %2525 = vst.msk [vmem:[#allocation2 + $0x1] sm:$0xff] %vm2118_vm9, %v2522_v46  ;;  %v6859_v46 = vld [vmem:[#allocation28 + $0x20] sm:$0xff]  }
 0x6c0   : > { %v2532_v48 = vld [vmem:[#allocation2 + $0x1] sm:$0xff] }
 0x6c1   : > { %v2649_v49 = vld [vmem:[#allocation2 + $0x2] sm:$0xff]  ;;  %v2533_v51 = vpack.c.bf16 %v2532_v48, %v2532_v48 }
 0x6c2   : > { %v2526_v50 = vld [vmem:[#allocation2] sm:$0xff]  ;;  %2726 = vst.msk [vmem:[#allocation2 + $0x8] sm:$0x3] %vm2120_vm10, %v7863_v1  ;;  %v2650_v54 = vpack.c.bf16 %v2649_v49, %v2649_v49 }
 0x6c3   : > { %v2527_v52 = vpack.c.bf16 %v2526_v50, %v2526_v50  ;;  %2725 = vst.msk [vmem:[#allocation2] sm:$0xff] %vm2118_vm9, %v7863_v1  ;;  %6092 = vmatmul.mubr.msk.bf16.vlgmr.msra.gmra.mrb[20].mxu0 %vm2118_vm9, %v2533_v51 }
 0x6c4   : > { %6104 = vmatpush3.bf16.msra.mxu0 %v6847_v47  ;;  %6107 = vmatprep.mubr.msk.bf16.mxu0 %vm7865_vm4, %v7863_v1 }
 0x6c5   : > { %6100 = vmatmul.mubr.msk.bf16.vlgmr.msra.gmra.mrb[8].mxu1 %vm2118_vm9, %v2527_v52  ;;  %6105 = vmatprep.subr.bf16.mxu0 %v7863_v1  ;;  %v6860_v52 = vld [vmem:[#allocation28 + $0x28] sm:$0xff]  }
 0x6c6   : > { %6115 = vmatprep.mubr.msk.bf16.mxu1 %vm7865_vm4, %v7863_v1  ;;  %6112 = vmatpush3.bf16.msra.mxu1 %v6849_v55  ;;  %v6862_v55 = vld [vmem:[#allocation31] sm:$0xff]  }
 0x6c7   : > { %6113 = vmatprep.subr.bf16.mxu1 %v7863_v1 }
 0x6c8   : > { %6106 = vmatpush3.bf16.msra.mxu0 %v6848_v53 }
 0x6c9   : > { %6119 = vmatprep.subr.bf16.mxu0 %v7863_v1 }
 0x6ca   : > { %6114 = vmatpush3.bf16.msra.mxu1 %v6851_v57  ;;  %v6864_v57 = vld [vmem:[#allocation31 + $0x8] sm:$0xff]  }
 0x6cb   : > { %6108 = vmatmul.mubr.msk.bf16.vlgmr.msra.gmra.mrb[24].mxu0 %vm2118_vm9, %v2650_v54  ;;  %6127 = vmatprep.subr.bf16.mxu1 %v7863_v1  ;;  %v6861_v54 = vld [vmem:[#allocation31 + $0x10] sm:$0xff]  }
 0x6cc   : > { %6123 = vmatprep.mubr.msk.bf16.mxu0 %vm7865_vm4, %v7863_v1  ;;  %6120 = vmatpush3.bf16.msra.mxu0 %v6850_v56  ;;  %v6863_v56 = vld [vmem:[#allocation31 + $0x18] sm:$0xff]  }
 0x6cd   : > { %6121 = vmatprep.subr.bf16.mxu0 %v7863_v1 }
 0x6d0   : > { %6122 = vmatpush3.bf16.msra.mxu0 %v6852_v58 }
 0x6d1   : > { %6135 = vmatprep.subr.bf16.mxu0 %v7863_v1 }
 0x796   : > { %v2588_v59 = vpop.f32.mrb[20].mxu0 }
 0x797   : > { %v6093_v62 = vpop.f32.mrb[21].mxu0 }
 0x798   : > { %v2643_v60 = vpop.f32.mrb[8].mxu1  ;;  %v2591_v0 = vpop.f32.mrb[22].mxu0 }
 0x799   : > { %v2644_v61 = vadd.f32 %v2643_v60, %v2588_v59  ;;  %v6101_v63 = vpop.f32.mrb[9].mxu1  ;;  %v6094_v3 = vpop.f32.mrb[23].mxu0 }
 0x79a   : > { %v2646_v2 = vpop.f32.mrb[10].mxu1 }
 0x79b   : > { %v6102_v4 = vpop.f32.mrb[11].mxu1 }
 0x79e   : > { %v2705_v5 = vpop.f32.mrb[24].mxu0 }
 0x79f   : > { %v2711_v7 = vadd.f32 %v2705_v5, %v2644_v61  ;;  %v6109_v8 = vpop.f32.mrb[25].mxu0  ;;  %v5647_v5 = vld [vmem:[#allocation29] ss:$0 sm:$0xff] }
 0x7a0   : > { %v2708_v9 = vpop.f32.mrb[26].mxu0 }
 0x7a1   : > { %v2719_v10 = vadd.f32 %v5626_v6, %v2711_v7  ;;  %v6110_v11 = vpop.f32.mrb[27].mxu0 }
 0x7a3   : > { %v2720_v12 = vadd.f32 %v2719_v10, %v8646_v13  ;;  %v6854_v13 = vld [vmem:[#allocation25 + $0x28] sm:$0xff]  }
 0x7a5   : > { %vm2721_vm14 = vcmp.ge.f32.partialorder %v2720_v12, 0.0  ;;  %v2722_v14 = vmul.f32 %v2720_v12, %v2520_v41 }
 0x7a7   : > { %v8695_v15 = vsel %vm2721_vm14, %v2720_v12, %v2722_v14 }
 0x7a8   : > { %2727 = vst.msk [vmem:[#allocation2 + $0x1] sm:$0xff] %vm2118_vm9, %v8695_v15 }
 0x7af   : > { %v2734_v17 = vld [vmem:[#allocation2 + $0x1] sm:$0xff] }
 0x7b0   : > { %v2851_v18 = vld [vmem:[#allocation2 + $0x2] sm:$0xff]  ;;  %v2735_v20 = vpack.c.bf16 %v2734_v17, %v2734_v17 }
 0x7b1   : > { %v2728_v19 = vld [vmem:[#allocation2] sm:$0xff]  ;;  %2927 = vst.msk [vmem:[#allocation2 + $0x8] sm:$0x3] %vm2120_vm10, %v7863_v1  ;;  %v2852_v22 = vpack.c.bf16 %v2851_v18, %v2851_v18 }
 0x7b2   : > { %v2729_v21 = vpack.c.bf16 %v2728_v19, %v2728_v19  ;;  %2926 = vst.msk [vmem:[#allocation2] sm:$0xff] %vm2118_vm9, %v7863_v1  ;;  %6116 = vmatmul.mubr.msk.bf16.vlgmr.msra.gmra.mrb[12].mxu1 %vm2118_vm9, %v2735_v20  ;;  %v6866_v17 = vld [vmem:[#allocation35] sm:$0xff]  }
 0x7b3   : > { %6128 = vmatpush3.bf16.msra.mxu1 %v6853_v16  ;;  %6131 = vmatprep.mubr.msk.bf16.mxu1 %vm7865_vm4, %v7863_v1  ;;  %v6865_v16 = vld [vmem:[#allocation31 + $0x20] sm:$0xff]  }
 0x7b4   : > { %6124 = vmatmul.mubr.msk.bf16.vlgmr.msra.gmra.mrb[28].mxu0 %vm2118_vm9, %v2729_v21  ;;  %6129 = vmatprep.subr.bf16.mxu1 %v7863_v1 }
 0x7b5   : > { %6139 = vmatprep.mubr.msk.bf16.mxu0 %vm7865_vm4, %v7863_v1  ;;  %6136 = vmatpush3.bf16.msra.mxu0 %v6855_v23 }
 0x7b6   : > { %6137 = vmatprep.subr.bf16.mxu0 %v7863_v1 }
 0x7b7   : > { %6130 = vmatpush3.bf16.msra.mxu1 %v6854_v13  ;;  %v6867_v13 = vld [vmem:[#allocation31 + $0x28] sm:$0xff]  }
 0x7b8   : > { %6143 = vmatprep.subr.bf16.mxu1 %v7863_v1 }
 0x7b9   : > { %6138 = vmatpush3.bf16.msra.mxu0 %v6857_v25  ;;  %v6870_v25 = vld [vmem:[%s9183_s4 + $0x28] sm:$0xff]  }
 0x7ba   : > { %6132 = vmatmul.mubr.msk.bf16.vlgmr.msra.gmra.mrb[16].mxu1 %vm2118_vm9, %v2852_v22  ;;  %6151 = vmatprep.subr.bf16.mxu0 %v7863_v1 }
 0x7bb   : > { %6147 = vmatprep.mubr.msk.bf16.mxu1 %vm7865_vm4, %v7863_v1  ;;  %6144 = vmatpush3.bf16.msra.mxu1 %v6856_v24  ;;  %v6869_v24 = vld [vmem:[%s9183_s4 + $0x20] sm:$0xff]  }
 0x7bc   : > { %6145 = vmatprep.subr.bf16.mxu1 %v7863_v1 }
 0x7bf   : > { %6146 = vmatpush3.bf16.msra.mxu1 %v6858_v26  ;;  %v6871_v26 = vld [vmem:[%s9183_s4 + $0x30] sm:$0xff]  }
 0x7c0   : > { %6159 = vmatprep.subr.bf16.mxu1 %v7863_v1 }
 0x885   : > { %v2790_v27 = vpop.f32.mrb[12].mxu1 }
 0x886   : > { %v6117_v30 = vpop.f32.mrb[13].mxu1 }
 0x887   : > { %v2845_v28 = vpop.f32.mrb[28].mxu0  ;;  %v2793_v32 = vpop.f32.mrb[14].mxu1 }
 0x888   : > { %v2846_v29 = vadd.f32 %v2845_v28, %v2790_v27  ;;  %v6125_v31 = vpop.f32.mrb[29].mxu0  ;;  %v6118_v34 = vpop.f32.mrb[15].mxu1  ;;  %v6872_v27 = vld [vmem:[%s9183_s4 + $0x38] sm:$0xff]  }
 0x889   : > { %v2848_v33 = vpop.f32.mrb[30].mxu0 }
 0x88a   : > { %v6126_v35 = vpop.f32.mrb[31].mxu0 }
 0x88d   : > { %v2907_v36 = vpop.f32.mrb[16].mxu1 }
 0x88e   : > { %v2913_v38 = vadd.f32 %v2907_v36, %v2846_v29  ;;  %v6133_v39 = vpop.f32.mrb[17].mxu1 }
 0x88f   : > { %v2910_v41 = vpop.f32.mrb[18].mxu1 }
 0x890   : > { %v2921_v42 = vadd.f32 %v5637_v37, %v2913_v38  ;;  %v6134_v43 = vpop.f32.mrb[19].mxu1  ;;  %v5658_v38 = vld [vmem:[#allocation32] ss:$0 sm:$0xff]  ;;  %v3326_v41 = vstv %s8769_s1  ;;  %s9191_s1 = sld [smem:[#allocation86_spill]] }
 0x892   : > { %vm2922_vm15 = vcmp.ge.f32.partialorder %v2921_v42, 0.0  ;;  %v2924_v44 = vmul.f32 %v2923_v40, %v2921_v42 }
 0x894   : > { %v2925_v45 = vsel %vm2922_vm15, %v2921_v42, %v2924_v44 }
 0x895   : > { %2928 = vst.msk [vmem:[#allocation2 + $0x1] sm:$0xff] %vm2118_vm9, %v2925_v45 }
 0x89c   : > { %v2935_v47 = vld [vmem:[#allocation2 + $0x1] sm:$0xff] }
 0x89d   : > { %v3052_v48 = vld [vmem:[#allocation2 + $0x2] sm:$0xff]  ;;  %v2936_v50 = vpack.c.bf16 %v2935_v47, %v2935_v47 }
 0x89e   : > { %v2929_v49 = vld [vmem:[#allocation2] sm:$0xff]  ;;  %3129 = vst.msk [vmem:[#allocation2 + $0x8] sm:$0x3] %vm2120_vm10, %v7863_v1  ;;  %v3053_v53 = vpack.c.bf16 %v3052_v48, %v3052_v48 }
 0x89f   : > { %v2930_v51 = vpack.c.bf16 %v2929_v49, %v2929_v49  ;;  %3128 = vst.msk [vmem:[#allocation2] sm:$0xff] %vm2118_vm9, %v7863_v1  ;;  %6140 = vmatmul.mubr.msk.bf16.vlgmr.msra.gmra.mrb[32].mxu0 %vm2118_vm9, %v2936_v50  ;;  %v6873_v47 = vld [vmem:[%s9183_s4] sm:$0xff]  }
 0x8a0   : > { %6152 = vmatpush3.bf16.msra.mxu0 %v6859_v46  ;;  %6155 = vmatprep.mubr.msk.bf16.mxu0 %vm7865_vm4, %v7863_v1 }
 0x8a1   : > { %6148 = vmatmul.mubr.msk.bf16.vlgmr.msra.gmra.mrb[20].mxu1 %vm2118_vm9, %v2930_v51  ;;  %6153 = vmatprep.subr.bf16.mxu0 %v7863_v1 }
 0x8a2   : > { %6163 = vmatprep.mubr.msk.bf16.mxu1 %vm7865_vm4, %v7863_v1  ;;  %6160 = vmatpush3.bf16.msra.mxu1 %v6861_v54  ;;  %v6876_v54 = vld [vmem:[%s9183_s4 + $0x18] sm:$0xff]  }
 0x8a3   : > { %6161 = vmatprep.subr.bf16.mxu1 %v7863_v1 }
 0x8a4   : > { %6154 = vmatpush3.bf16.msra.mxu0 %v6860_v52  ;;  %v6874_v52 = vld [vmem:[%s9183_s4 + $0x8] sm:$0xff]  }
 0x8a5   : > { %6167 = vmatprep.subr.bf16.mxu0 %v7863_v1 }
 0x8a6   : > { %6162 = vmatpush3.bf16.msra.mxu1 %v6863_v56 }
 0x8a7   : > { %6156 = vmatmul.mubr.msk.bf16.vlgmr.msra.gmra.mrb[36].mxu0 %vm2118_vm9, %v3053_v53  ;;  %6175 = vmatprep.subr.bf16.mxu1 %v7863_v1  ;;  %v6875_v53 = vld [vmem:[%s9183_s4 + $0x10] sm:$0xff]  }
 0x8a8   : > { %6171 = vmatprep.mubr.msk.bf16.mxu0 %vm7865_vm4, %v7863_v1  ;;  %6168 = vmatpush3.bf16.msra.mxu0 %v6862_v55  ;;  %v6877_v55 = vld [vmem:[%s9183_s4 + $0x40] sm:$0xff]  }
 0x8a9   : > { %6169 = vmatprep.subr.bf16.mxu0 %v7863_v1 }
 0x8ac   : > { %6170 = vmatpush3.bf16.msra.mxu0 %v6864_v57  ;;  %v6878_v57 = vld [vmem:[%s9183_s4 + $0x48] sm:$0xff]  }
 0x8ad   : > { %6183 = vmatprep.subr.bf16.mxu0 %v7863_v1 }
 0x972   : > { %v2991_v58 = vpop.f32.mrb[32].mxu0 }
 0x973   : > { %v6141_v61 = vpop.f32.mrb[33].mxu0 }
 0x974   : > { %v3046_v59 = vpop.f32.mrb[20].mxu1  ;;  %v2994_v63 = vpop.f32.mrb[34].mxu0  ;;  %v6881_v61 = vld [vmem:[%s9184_s15 + $0x20] sm:$0xff]   ;;  %s5821_s15 = sld [smem:[#allocation3 + $0x7]] }
 0x975   : > { %v3047_v60 = vadd.f32 %v3046_v59, %v2991_v58  ;;  %v6149_v62 = vpop.f32.mrb[21].mxu1  ;;  %v6142_v2 = vpop.f32.mrb[35].mxu0  ;;  %v6879_v58 = vld [vmem:[%s9183_s4 + $0x50] sm:$0xff]   ;;  %v6880_v59 = vld [vmem:[%s9183_s4 + $0x58] sm:$0xff]  }
 0x976   : > { %v3049_v0 = vpop.f32.mrb[22].mxu1  ;;  %v6882_v62 = vld [vmem:[%s9185_s11 + $0x28] sm:$0xff]   ;;  %v6883_v63 = vld [vmem:[%s9185_s11 + $0x30] sm:$0xff]  }
 0x977   : > { %v6150_v3 = vpop.f32.mrb[23].mxu1  ;;  %v6884_v0 = vld [vmem:[%s9185_s11 + $0x38] sm:$0xff]   ;;  %v5659_v2 = vld [vmem:[#allocation37] ss:$0 sm:$0xff] }
 0x97a   : > { %v3108_v4 = vpop.f32.mrb[36].mxu0 }
 0x97b   : > { %v3114_v6 = vadd.f32 %v3108_v4, %v3047_v60  ;;  %v6157_v7 = vpop.f32.mrb[37].mxu0  ;;  %v5694_v4 = vld [vmem:[#allocation34] ss:$0 sm:$0xff] }
 0x97c   : > { %v3111_v8 = vpop.f32.mrb[38].mxu0 }
 0x97d   : > { %v3122_v9 = vadd.f32 %v5647_v5, %v3114_v6  ;;  %v6158_v10 = vpop.f32.mrb[39].mxu0 }
 0x97f   : > { %v3123_v11 = vadd.f32 %v3122_v9, %v8695_v15  ;;  %v6868_v15 = vld [vmem:[#allocation35 + $0x8] sm:$0xff]  }
 0x981   : > { %vm3124_vm0 = vcmp.ge.f32.partialorder %v3123_v11, 0.0  ;;  %v3125_v12 = vmul.f32 %v3123_v11, %v2923_v40 }
 0x983   : > { %v3126_v14 = vsel %vm3124_vm0, %v3123_v11, %v3125_v12  ;;  %v6885_v12 = vld [vmem:[%s9185_s11] sm:$0xff]  }
 0x984   : > { %3130 = vst.msk [vmem:[#allocation2 + $0x1] sm:$0xff] %vm2118_vm9, %v3126_v14 }
 0x98b   : > { %v3137_v18 = vld [vmem:[#allocation2 + $0x1] ss:$2 sm:$0xf]  ;;  %v3131_v19 = vld [vmem:[#allocation2] ss:$2 sm:$0xf] }
 0x98c   : > { %v3138_v20 = vpack.c.bf16 %v3137_v18, %v3137_v18  ;;  %v3132_v21 = vpack.c.bf16 %v3131_v19, %v3131_v19  ;;  %v3254_v22 = vld [vmem:[#allocation2 + $0x2] ss:$2 sm:$0xf] }
 0x98d   : > { %v3255_v23 = vpack.c.bf16 %v3254_v22, %v3254_v22  ;;  %3393 = vst.msk [vmem:[#allocation2] sm:$0x3f] %vm3392_vm1, %v7863_v1  ;;  %v6886_v19 = vld [vmem:[%s9185_s11 + $0x8] sm:$0xff]  }
 0x98e   : > { %6164 = vmatmul.mubr.msk.bf16.vlgmr.msra.gmra.mrb[24].mxu1 %vm2118_vm9, %v3138_v20  ;;  %6172 = vmatmul.mubr.msk.bf16.vlgmr.msra.gmra.mrb[40].mxu0 %vm2118_vm9, %v3132_v21  ;;  %v6888_v21 = vld [vmem:[%s9185_s11 + $0x18] sm:$0xff]   ;;  %v6890_v22 = vld [vmem:[%s9185_s11 + $0x48] sm:$0xff]  }
 0x98f   : > { %6176 = vmatpush3.bf16.msra.mxu1 %v6865_v16  ;;  %6184 = vmatpush3.bf16.msra.mxu0 %v6866_v17 }
 0x990   : > { %6177 = vmatprep.subr.bf16.mxu1 %v7863_v1  ;;  %6185 = vmatprep.subr.bf16.mxu0 %v7863_v1 }
 0x991   : > { %6179 = vmatprep.mubr.msk.bf16.mxu1 %vm7865_vm4, %v7863_v1  ;;  %6187 = vmatprep.mubr.msk.bf16.mxu0 %vm7865_vm4, %v7863_v1 }
 0x993   : > { %6178 = vmatpush3.bf16.msra.mxu1 %v6867_v13  ;;  %6186 = vmatpush3.bf16.msra.mxu0 %v6868_v15  ;;  %v6889_v13 = vld [vmem:[%s9185_s11 + $0x40] sm:$0xff]  }
 0x994   : > { %6191 = vmatprep.subr.bf16.mxu0 %v7863_v1  ;;  %6227 = vmatprep.subr.bf16.mxu1 %v7863_v1 }
 0x996   : > { %6180 = vmatmul.mubr.msk.bf16.vlgmr.msra.gmra.mrb[28].mxu1 %vm2118_vm9, %v3255_v23  ;;  %6188 = vmatmul.mubr.msk.bf16.vlgmr.msra.gmra.mrb[44].mxu0 %vm2118_vm9, %v3138_v20  ;;  %v6887_v20 = vld [vmem:[%s9185_s11 + $0x10] sm:$0xff]  }
 0x997   : > { %6199 = vmatprep.mubr.msk.bf16.mxu0 %vm7865_vm4, %v7863_v1  ;;  %6235 = vmatprep.mubr.msk.bf16.mxu1 %vm7865_vm4, %v7863_v1  ;;  %v6891_v23 = vld [vmem:[%s9185_s11 + $0x50] sm:$0xff]  }
 0x998   : > { %6192 = vmatpush3.bf16.msra.mxu0 %v6869_v24  ;;  %6228 = vmatpush3.bf16.msra.mxu1 %v6881_v61  ;;  %v6892_v24 = vld [vmem:[%s9185_s11 + $0x58] sm:$0xff]   ;;  %v6904_v61 = vld [vmem:[#allocation40 + $0x58] sm:$0xff]  }
 0x999   : > { %6193 = vmatprep.subr.bf16.mxu0 %v7863_v1  ;;  %6229 = vmatprep.subr.bf16.mxu1 %v7863_v1 }
 0x99c   : > { %6194 = vmatpush3.bf16.msra.mxu0 %v6870_v25  ;;  %6230 = vmatpush3.bf16.msra.mxu1 %v6882_v62 }
 0x99d   : > { %6195 = vmatprep.subr.bf16.mxu0 %v7863_v1  ;;  %6231 = vmatprep.subr.bf16.mxu1 %v7863_v1 }
 0x9a0   : > { %6196 = vmatpush3.bf16.msra.mxu0 %v6871_v26  ;;  %6232 = vmatpush3.bf16.msra.mxu1 %v6883_v63  ;;  %v6893_v26 = vld [vmem:[#allocation40 + $0x20] sm:$0xff]  }
 0x9a1   : > { %6197 = vmatprep.subr.bf16.mxu0 %v7863_v1  ;;  %6233 = vmatprep.subr.bf16.mxu1 %v7863_v1  ;;  %v6905_v63 = vld [vmem:[#allocation41 + $0x20] sm:$0xff]  }
 0x9a4   : > { %6198 = vmatpush3.bf16.msra.mxu0 %v6872_v27  ;;  %6234 = vmatpush3.bf16.msra.mxu1 %v6884_v0  ;;  %v6894_v27 = vld [vmem:[#allocation40] sm:$0xff]  }
 0x9a5   : > { %6203 = vmatprep.subr.bf16.mxu0 %v7863_v1  ;;  %6239 = vmatprep.subr.bf16.mxu1 %v7863_v1  ;;  %v6906_v0 = vld [vmem:[#allocation41] sm:$0xff]  }
 0xa61   : > { %v3193_v28 = vpop.f32.mrb[24].mxu1  ;;  %v3248_v29 = vpop.f32.mrb[40].mxu0 }
 0xa62   : > { %v3249_v30 = vadd.f32 %v3248_v29, %v3193_v28  ;;  %v6165_v31 = vpop.f32.mrb[25].mxu1  ;;  %v6173_v32 = vpop.f32.mrb[41].mxu0  ;;  %v6895_v28 = vld [vmem:[#allocation40 + $0x28] sm:$0xff]  }
 0xa63   : > { %v3196_v33 = vpop.f32.mrb[26].mxu1  ;;  %v3251_v34 = vpop.f32.mrb[42].mxu0  ;;  %v6896_v29 = vld [vmem:[#allocation40 + $0x8] sm:$0xff]   ;;  %v6898_v31 = vld [vmem:[#allocation40 + $0x10] sm:$0xff]   ;;  %v6899_v32 = vld [vmem:[#allocation40 + $0x38] sm:$0xff]  }
 0xa64   : > { %v6166_v35 = vpop.f32.mrb[27].mxu1  ;;  %v6174_v36 = vpop.f32.mrb[43].mxu0  ;;  %v6900_v33 = vld [vmem:[#allocation40 + $0x18] sm:$0xff]  }
 0xa69   : > { %v3310_v37 = vpop.f32.mrb[28].mxu1 }
 0xa6a   : > { %v3316_v39 = vadd.f32 %v3310_v37, %v3249_v30  ;;  %v6181_v40 = vpop.f32.mrb[29].mxu1  ;;  %v6897_v30 = vld [vmem:[#allocation40 + $0x30] sm:$0xff]  }
 0xa6b   : > { %v3313_v42 = vpop.f32.mrb[30].mxu1 }
 0xa6c   : > { %v3324_v43 = vadd.f32 %v5658_v38, %v3316_v39  ;;  %v6182_v44 = vpop.f32.mrb[31].mxu1 }
 0xa6d   : > { %v5727_v44 = vld [vmem:[#allocation38] ss:$0 sm:$0xff] }
 0xa6e   : > { %vm3325_vm2 = vcmp.ge.f32.partialorder %v3324_v43, 0.0  ;;  %v3327_v45 = vmul.f32 %v3326_v41, %v3324_v43 }
 0xa70   : > { %v3328_v46 = vsel %vm3325_vm2, %v3324_v43, %v3327_v45 }
 0xa71   : > { %3395 = vst.msk [vmem:[#allocation2 + $0x1] sm:$0xf] %vm3394_vm3, %v3328_v46 }
 0xa78   : > { %v3406_v48 = vld [vmem:[#allocation2 + $0x1] sm:$0xf] }
 0xa79   : > { %v3396_v49 = vld [vmem:[#allocation2] sm:$0xf]  ;;  %v3407_v51 = vpack.c.bf16 %v3406_v48, %v3406_v48 }
 0xa7a   : > { %v3552_v50 = vld [vmem:[#allocation2 + $0x2] sm:$0xf]  ;;  %v3397_v56 = vpack.c.bf16 %v3396_v49, %v3396_v49 }
 0xa7b   : > { %3644 = vst.msk [vmem:[#allocation2] sm:$0x3f] %vm3392_vm1, %v7863_v1  ;;  %6200 = vmatmul.mubr.msk.bf16.vlgmr.msra.gmra.mrb[44].mxu0 %vm3441_vm5, %v3407_v51  ;;  %v3553_v60 = vpack.c.bf16 %v3552_v50, %v3552_v50 }
 0xa7c   : > { %6204 = vmatpush3.bf16.msra.mxu0 %v6873_v47  ;;  %6211 = vmatprep.mubr.msk.bf16.mxu0 %vm7865_vm4, %v7863_v1  ;;  %v3889_v47 = vstv %s8851_s16  ;;  %s5830_s16 = sld [smem:[#allocation3 + $0x8]] }
 0xa7d   : > { %6205 = vmatprep.subr.bf16.mxu0 %v7863_v1 }
 0xa80   : > { %6206 = vmatpush3.bf16.msra.mxu0 %v6874_v52 }
 0xa81   : > { %6207 = vmatprep.subr.bf16.mxu0 %v7863_v1 }
 0xa84   : > { %6208 = vmatpush3.bf16.msra.mxu0 %v6875_v53  ;;  %v6901_v53 = vld [vmem:[#allocation40 + $0x40] sm:$0xff]  }
 0xa85   : > { %6209 = vmatprep.subr.bf16.mxu0 %v7863_v1 }
 0xa88   : > { %6210 = vmatpush3.bf16.msra.mxu0 %v6876_v54 }
 0xa89   : > { %6215 = vmatprep.subr.bf16.mxu0 %v7863_v1 }
 0xa8b   : > { %6212 = vmatmul.mubr.msk.bf16.vlgmr.msra.gmra.mrb[44].mxu0 %vm3441_vm5, %v3397_v56 }
 0xa8c   : > { %6216 = vmatpush3.bf16.msra.mxu0 %v6877_v55  ;;  %6223 = vmatprep.mubr.msk.bf16.mxu0 %vm7865_vm4, %v7863_v1 }
 0xa8d   : > { %6217 = vmatprep.subr.bf16.mxu0 %v7863_v1 }
 0xa90   : > { %6218 = vmatpush3.bf16.msra.mxu0 %v6878_v57 }
 0xa91   : > { %6219 = vmatprep.subr.bf16.mxu0 %v7863_v1 }
 0xa94   : > { %6220 = vmatpush3.bf16.msra.mxu0 %v6879_v58 }
 0xa95   : > { %6221 = vmatprep.subr.bf16.mxu0 %v7863_v1 }
 0xa98   : > { %6222 = vmatpush3.bf16.msra.mxu0 %v6880_v59  ;;  %v6902_v59 = vld [vmem:[#allocation40 + $0x48] sm:$0xff]  }
 0xa99   : > { %6275 = vmatprep.subr.bf16.mxu0 %v7863_v1 }
 0xa9b   : > { %6224 = vmatmul.mubr.msk.bf16.vlgmr.msra.gmra.mrb[44].mxu0 %vm3441_vm5, %v3553_v60  ;;  %v6903_v60 = vld [vmem:[#allocation40 + $0x50] sm:$0xff]  }
 0xa9c   : > { %6283 = vmatprep.mubr.msk.bf16.mxu0 %vm7865_vm4, %v7863_v1  ;;  %6276 = vmatpush3.bf16.msra.mxu0 %v6894_v27 }
 0xa9d   : > { %6277 = vmatprep.subr.bf16.mxu0 %v7863_v1 }
 0xaa0   : > { %6278 = vmatpush3.bf16.msra.mxu0 %v6896_v29 }
 0xaa1   : > { %6279 = vmatprep.subr.bf16.mxu0 %v7863_v1 }
 0xaa4   : > { %6280 = vmatpush3.bf16.msra.mxu0 %v6898_v31 }
 0xaa5   : > { %6281 = vmatprep.subr.bf16.mxu0 %v7863_v1 }
 0xaa8   : > { %6282 = vmatpush3.bf16.msra.mxu0 %v6900_v33 }
 0xaa9   : > { %6299 = vmatprep.subr.bf16.mxu0 %v7863_v1 }
 0xb6e   : > { %v3624_v3 = vpop.f32.mrb[44].mxu0 }
 0xb6f   : > { %v6453_v5 = vadd.f32 %v5659_v2, %v3624_v3  ;;  %v6225_v6 = vpop.f32.mrb[45].mxu0  ;;  %v6907_v2 = vld [vmem:[#allocation41 + $0x28] sm:$0xff]  }
 0xb70   : > { %v3627_v7 = vpop.f32.mrb[46].mxu0  ;;  %v6908_v3 = vld [vmem:[#allocation41 + $0x8] sm:$0xff]   ;;  %v6911_v6 = vld [vmem:[#allocation41 + $0x38] sm:$0xff]  }
 0xb71   : > { %v6454_v8 = vadd.f32 %v6453_v5, %v5694_v4  ;;  %v6226_v9 = vpop.f32.mrb[47].mxu0  ;;  %v6909_v4 = vld [vmem:[#allocation41 + $0x30] sm:$0xff]   ;;  %v6912_v7 = vld [vmem:[#allocation41 + $0x18] sm:$0xff]  }
 0xb72   : > { %v6910_v5 = vld [vmem:[#allocation41 + $0x10] sm:$0xff]  }
 0xb73   : > { %vm3640_vm6 = vcmp.ge.f32.partialorder %v6454_v8, 0.0  ;;  %v3641_v10 = vmul.f32 %v6454_v8, %v3326_v41 }
 0xb75   : > { %v8812_v11 = vsel %vm3640_vm6, %v6454_v8, %v3641_v10 }
 0xb76   : > { %3645 = vst.msk [vmem:[#allocation2 + $0x1] sm:$0xf] %vm3394_vm3, %v8812_v11 }
 0xb7d   : > { %v3656_v14 = vld [vmem:[#allocation2 + $0x1] sm:$0xf] }
 0xb7e   : > { %v3646_v16 = vld [vmem:[#allocation2] sm:$0xf]  ;;  %v3657_v18 = vpack.c.bf16 %v3656_v14, %v3656_v14 }
 0xb7f   : > { %v3801_v17 = vld [vmem:[#allocation2 + $0x2] sm:$0xf]  ;;  %v3647_v15 = vpack.c.bf16 %v3646_v16, %v3646_v16 }
 0xb80   : > { %3892 = vst.msk [vmem:[#allocation2] sm:$0x3f] %vm3392_vm1, %v7863_v1  ;;  %6236 = vmatmul.mubr.msk.bf16.vlgmr.msra.gmra.mrb[32].mxu1 %vm3441_vm5, %v3657_v18  ;;  %v3802_v25 = vpack.c.bf16 %v3801_v17, %v3801_v17 }
 0xb81   : > { %6240 = vmatpush3.bf16.msra.mxu1 %v6885_v12  ;;  %6247 = vmatprep.mubr.msk.bf16.mxu1 %vm7865_vm4, %v7863_v1 }
 0xb82   : > { %6241 = vmatprep.subr.bf16.mxu1 %v7863_v1 }
 0xb85   : > { %6242 = vmatpush3.bf16.msra.mxu1 %v6886_v19 }
 0xb86   : > { %6243 = vmatprep.subr.bf16.mxu1 %v7863_v1 }
 0xb89   : > { %6244 = vmatpush3.bf16.msra.mxu1 %v6887_v20 }
 0xb8a   : > { %6245 = vmatprep.subr.bf16.mxu1 %v7863_v1 }
 0xb8d   : > { %6246 = vmatpush3.bf16.msra.mxu1 %v6888_v21  ;;  %v5743_v21 = vld [vmem:[%s9186_s23] ss:$0 sm:$0xff]  ;;  %s5836_s23 = sld [smem:[#allocation3 + $0x9]] }
 0xb8e   : > { %6251 = vmatprep.subr.bf16.mxu1 %v7863_v1 }
 0xb90   : > { %6248 = vmatmul.mubr.msk.bf16.vlgmr.msra.gmra.mrb[36].mxu1 %vm3441_vm5, %v3647_v15 }
 0xb91   : > { %6252 = vmatpush3.bf16.msra.mxu1 %v6889_v13  ;;  %6259 = vmatprep.mubr.msk.bf16.mxu1 %vm7865_vm4, %v7863_v1 }
 0xb92   : > { %6253 = vmatprep.subr.bf16.mxu1 %v7863_v1 }
 0xb95   : > { %6254 = vmatpush3.bf16.msra.mxu1 %v6890_v22 }
 0xb96   : > { %6255 = vmatprep.subr.bf16.mxu1 %v7863_v1 }
 0xb99   : > { %6256 = vmatpush3.bf16.msra.mxu1 %v6891_v23 }
 0xb9a   : > { %6257 = vmatprep.subr.bf16.mxu1 %v7863_v1 }
 0xb9d   : > { %6258 = vmatpush3.bf16.msra.mxu1 %v6892_v24 }
 0xb9e   : > { %6263 = vmatprep.subr.bf16.mxu1 %v7863_v1 }
 0xba0   : > { %6260 = vmatmul.mubr.msk.bf16.vlgmr.msra.gmra.mrb[40].mxu1 %vm3441_vm5, %v3802_v25 }
 0xba1   : > { %6271 = vmatprep.mubr.msk.bf16.mxu1 %vm7865_vm4, %v7863_v1  ;;  %6264 = vmatpush3.bf16.msra.mxu1 %v6893_v26 }
 0xba2   : > { %6265 = vmatprep.subr.bf16.mxu1 %v7863_v1 }
 0xba5   : > { %6266 = vmatpush3.bf16.msra.mxu1 %v6895_v28  ;;  %v6913_v28 = vld [vmem:[#allocation41 + $0x40] sm:$0xff]  }
 0xba6   : > { %6267 = vmatprep.subr.bf16.mxu1 %v7863_v1 }
 0xba9   : > { %6268 = vmatpush3.bf16.msra.mxu1 %v6897_v30 }
 0xbaa   : > { %6269 = vmatprep.subr.bf16.mxu1 %v7863_v1 }
 0xbad   : > { %6270 = vmatpush3.bf16.msra.mxu1 %v6899_v32 }
 0xbae   : > { %6287 = vmatprep.subr.bf16.mxu1 %v7863_v1 }
 0xc53   : > { %v3728_v34 = vpop.f32.mrb[32].mxu1 }
 0xc54   : > { %v6237_v35 = vpop.f32.mrb[33].mxu1 }
 0xc55   : > { %v3731_v36 = vpop.f32.mrb[34].mxu1  ;;  %v6916_v35 = vld [vmem:[#allocation41 + $0x58] sm:$0xff]  }
 0xc56   : > { %v6238_v37 = vpop.f32.mrb[35].mxu1 }
 0xc57   : > { %v6917_v37 = vld [vmem:[#allocation43 + $0x20] sm:$0xff]  }
 0xc63   : > { %v3795_v38 = vpop.f32.mrb[36].mxu1 }
 0xc64   : > { %v3796_v39 = vadd.f32 %v3795_v38, %v3728_v34  ;;  %v6249_v40 = vpop.f32.mrb[37].mxu1  ;;  %v6915_v34 = vld [vmem:[#allocation41 + $0x50] sm:$0xff]   ;;  %v6918_v38 = vld [vmem:[#allocation43] sm:$0xff]  }
 0xc65   : > { %v3798_v41 = vpop.f32.mrb[38].mxu1  ;;  %v6920_v40 = vld [vmem:[#allocation43 + $0x8] sm:$0xff]  }
 0xc66   : > { %v6250_v42 = vpop.f32.mrb[39].mxu1  ;;  %v6921_v41 = vld [vmem:[#allocation43 + $0x30] sm:$0xff]  }
 0xc67   : > { %v6922_v42 = vld [vmem:[#allocation43 + $0x10] sm:$0xff]  }
 0xc73   : > { %v3873_v43 = vpop.f32.mrb[40].mxu1 }
 0xc74   : > { %v3879_v45 = vadd.f32 %v3873_v43, %v3796_v39  ;;  %v6261_v46 = vpop.f32.mrb[41].mxu1  ;;  %v6919_v39 = vld [vmem:[#allocation43 + $0x28] sm:$0xff]   ;;  %v6923_v43 = vld [vmem:[#allocation43 + $0x38] sm:$0xff]  }
 0xc75   : > { %v3876_v48 = vpop.f32.mrb[42].mxu1 }
 0xc76   : > { %v3887_v49 = vadd.f32 %v5727_v44, %v3879_v45  ;;  %v6262_v50 = vpop.f32.mrb[43].mxu1  ;;  %v6924_v44 = vld [vmem:[#allocation43 + $0x18] sm:$0xff]  }
 0xc78   : > { %vm3888_vm7 = vcmp.ge.f32.partialorder %v3887_v49, 0.0  ;;  %v3890_v51 = vmul.f32 %v3889_v47, %v3887_v49 }
 0xc7a   : > { %v3891_v52 = vsel %vm3888_vm7, %v3887_v49, %v3890_v51 }
 0xc7b   : > { %3893 = vst.msk [vmem:[#allocation2 + $0x1] sm:$0xf] %vm3394_vm3, %v3891_v52 }
 0xc82   : > { %v3904_v54 = vld [vmem:[#allocation2 + $0x1] sm:$0xf] }
 0xc83   : > { %v3894_v55 = vld [vmem:[#allocation2] sm:$0xf]  ;;  %v3905_v57 = vpack.c.bf16 %v3904_v54, %v3904_v54 }
 0xc84   : > { %v4049_v56 = vld [vmem:[#allocation2 + $0x2] sm:$0xf]  ;;  %v3895_v58 = vpack.c.bf16 %v3894_v55, %v3894_v55  ;;  %v5760_v55 = vld [vmem:[%s9187_s3] ss:$0 sm:$0xff]  ;;  %s1496_s3 = sand.u32 1, %s7784_s0  }
 0xc85   : > { %4141 = vst.msk [vmem:[#allocation2] sm:$0x3f] %vm3392_vm1, %v7863_v1  ;;  %6272 = vmatmul.mubr.msk.bf16.vlgmr.msra.gmra.mrb[44].mxu1 %vm3441_vm5, %v3905_v57  ;;  %v4050_v62 = vpack.c.bf16 %v4049_v56, %v4049_v56 }
 0xc86   : > { %6284 = vmatmul.mubr.msk.bf16.vlgmr.msra.gmra.mrb[48].mxu0 %vm3441_vm5, %v3895_v58  ;;  %6288 = vmatpush3.bf16.msra.mxu1 %v6901_v53  ;;  %v4386_v58 = vstv %s8911_s17  ;;  %s5837_s17 = sshll.u32 %s8088_s22, 4  ;;  %s7866_s22 = smov [#allocation44]  }
 0xc87   : > { %6295 = vmatprep.mubr.msk.bf16.mxu1 %vm7865_vm4, %v7863_v1  ;;  %6289 = vmatprep.subr.bf16.mxu1 %v7863_v1  ;;  %s7678_s2 = sshll.u32 %s7866_s22, 4  ;;  %s7679_s2 = int_to_ptr.vmem [resolvable:$false] %s7678_s2 }
 0xc88   : > { %6307 = vmatprep.mubr.msk.bf16.mxu0 %vm7865_vm4, %v7863_v1  ;;  %6300 = vmatpush3.bf16.msra.mxu0 %v6905_v63  ;;  %s7680_s4 = scalar_lea.vmem %s7679_s2, 32 }
 0xc89   : > { %6301 = vmatprep.subr.bf16.mxu0 %v7863_v1 }
 0xc8a   : > { %6290 = vmatpush3.bf16.msra.mxu1 %v6902_v59 }
 0xc8b   : > { %6291 = vmatprep.subr.bf16.mxu1 %v7863_v1 }
 0xc8c   : > { %6302 = vmatpush3.bf16.msra.mxu0 %v6907_v2 }
 0xc8d   : > { %6303 = vmatprep.subr.bf16.mxu0 %v7863_v1 }
 0xc8e   : > { %6292 = vmatpush3.bf16.msra.mxu1 %v6903_v60 }
 0xc8f   : > { %6293 = vmatprep.subr.bf16.mxu1 %v7863_v1 }
 0xc90   : > { %6304 = vmatpush3.bf16.msra.mxu0 %v6909_v4 }
 0xc91   : > { %6305 = vmatprep.subr.bf16.mxu0 %v7863_v1 }
 0xc92   : > { %6294 = vmatpush3.bf16.msra.mxu1 %v6904_v61 }
 0xc93   : > { %6311 = vmatprep.subr.bf16.mxu1 %v7863_v1 }
 0xc94   : > { %6306 = vmatpush3.bf16.msra.mxu0 %v6911_v6  ;;  %v6926_v6 = vld [vmem:[#allocation43 + $0x48] sm:$0xff]  }
 0xc95   : > { %6296 = vmatmul.mubr.msk.bf16.vlgmr.msra.gmra.mrb[48].mxu1 %vm3441_vm5, %v4050_v62  ;;  %6323 = vmatprep.subr.bf16.mxu0 %v7863_v1 }
 0xc96   : > { %6319 = vmatprep.mubr.msk.bf16.mxu1 %vm7865_vm4, %v7863_v1  ;;  %6312 = vmatpush3.bf16.msra.mxu1 %v6906_v0 }
 0xc97   : > { %6313 = vmatprep.subr.bf16.mxu1 %v7863_v1 }
 0xc9a   : > { %6314 = vmatpush3.bf16.msra.mxu1 %v6908_v3  ;;  %v6925_v3 = vld [vmem:[#allocation43 + $0x40] sm:$0xff]  }
 0xc9b   : > { %6315 = vmatprep.subr.bf16.mxu1 %v7863_v1 }
 0xc9e   : > { %6316 = vmatpush3.bf16.msra.mxu1 %v6910_v5 }
 0xc9f   : > { %6317 = vmatprep.subr.bf16.mxu1 %v7863_v1 }
 0xca2   : > { %6318 = vmatpush3.bf16.msra.mxu1 %v6912_v7  ;;  %v6927_v7 = vld [vmem:[#allocation43 + $0x50] sm:$0xff]  }
 0xca3   : > { %6335 = vmatprep.subr.bf16.mxu1 %v7863_v1 }
 0xd58   : > { %v3976_v8 = vpop.f32.mrb[44].mxu1 }
 0xd59   : > { %v4043_v9 = vpop.f32.mrb[48].mxu0  ;;  %v6273_v12 = vpop.f32.mrb[45].mxu1 }
 0xd5a   : > { %v4044_v10 = vadd.f32 %v4043_v9, %v3976_v8  ;;  %v6285_v14 = vpop.f32.mrb[49].mxu0  ;;  %v3979_v16 = vpop.f32.mrb[46].mxu1  ;;  %v6928_v8 = vld [vmem:[#allocation43 + $0x58] sm:$0xff]   ;;  %v6929_v12 = vld [vmem:[%s9188_s5] sm:$0xff]  }
 0xd5b   : > { %v4046_v17 = vpop.f32.mrb[50].mxu0  ;;  %v6274_v18 = vpop.f32.mrb[47].mxu1  ;;  %v6930_v14 = vld [vmem:[%s9188_s5 + $0x20] sm:$0xff]   ;;  %v6931_v16 = vld [vmem:[%s9188_s5 + $0x8] sm:$0xff]  }
 0xd5c   : > { %v6286_v19 = vpop.f32.mrb[51].mxu0  ;;  %v6932_v17 = vld [vmem:[%s9188_s5 + $0x28] sm:$0xff]   ;;  %v6933_v18 = vld [vmem:[%s9188_s5 + $0x10] sm:$0xff]  }
 0xd5d   : > { %v6934_v19 = vld [vmem:[%s9188_s5 + $0x30] sm:$0xff]  }
 0xd68   : > { %v4121_v20 = vpop.f32.mrb[48].mxu1 }
 0xd69   : > { %v4127_v13 = vadd.f32 %v4121_v20, %v4044_v10  ;;  %v6297_v15 = vpop.f32.mrb[49].mxu1  ;;  %v6935_v20 = vld [vmem:[%s9188_s5 + $0x18] sm:$0xff]  }
 0xd6a   : > { %v4124_v22 = vpop.f32.mrb[50].mxu1 }
 0xd6b   : > { %v4135_v23 = vadd.f32 %v5743_v21, %v4127_v13  ;;  %v6298_v24 = vpop.f32.mrb[51].mxu1  ;;  %v6936_v21 = vld [vmem:[%s9188_s5 + $0x38] sm:$0xff]  }
 0xd6d   : > { %v4136_v25 = vadd.f32 %v4135_v23, %v8812_v11  ;;  %v6914_v11 = vld [vmem:[#allocation41 + $0x48] sm:$0xff]  }
 0xd6f   : > { %vm4137_vm8 = vcmp.ge.f32.partialorder %v4136_v25, 0.0  ;;  %v4138_v26 = vmul.f32 %v4136_v25, %v3889_v47 }
 0xd71   : > { %v8884_v27 = vsel %vm4137_vm8, %v4136_v25, %v4138_v26 }
 0xd72   : > { %4142 = vst.msk [vmem:[#allocation2 + $0x1] sm:$0xf] %vm3394_vm3, %v8884_v27 }
 0xd79   : > { %v4153_v29 = vld [vmem:[#allocation2 + $0x1] sm:$0xf] }
 0xd7a   : > { %v4143_v30 = vld [vmem:[#allocation2] sm:$0xf]  ;;  %v4154_v32 = vpack.c.bf16 %v4153_v29, %v4153_v29 }
 0xd7b   : > { %v4298_v31 = vld [vmem:[#allocation2 + $0x2] sm:$0xf]  ;;  %v4144_v33 = vpack.c.bf16 %v4143_v30, %v4143_v30 }
 0xd7c   : > { %4389 = vst.msk [vmem:[#allocation2] sm:$0x3f] %vm3392_vm1, %v7863_v1  ;;  %6308 = vmatmul.mubr.msk.bf16.vlgmr.msra.gmra.mrb[52].mxu0 %vm3441_vm5, %v4154_v32  ;;  %v4299_v36 = vpack.c.bf16 %v4298_v31, %v4298_v31  ;;  %v5776_v31 = vld [vmem:[%s9189_s9] ss:$0 sm:$0xff]  ;;  %s1497_s9 = scalar_lea.vmem [#allocation44], %s1496_s3 }
 0xd7d   : > { %6320 = vmatmul.mubr.msk.bf16.vlgmr.msra.gmra.mrb[52].mxu1 %vm3441_vm5, %v4144_v33  ;;  %6324 = vmatpush3.bf16.msra.mxu0 %v6913_v28 }
 0xd7e   : > { %6331 = vmatprep.mubr.msk.bf16.mxu0 %vm7865_vm4, %v7863_v1  ;;  %6325 = vmatprep.subr.bf16.mxu0 %v7863_v1 }
 0xd7f   : > { %6343 = vmatprep.mubr.msk.bf16.mxu1 %vm7865_vm4, %v7863_v1  ;;  %6336 = vmatpush3.bf16.msra.mxu1 %v6917_v37 }
 0xd80   : > { %6337 = vmatprep.subr.bf16.mxu1 %v7863_v1 }
 0xd81   : > { %6326 = vmatpush3.bf16.msra.mxu0 %v6914_v11 }
 0xd82   : > { %6327 = vmatprep.subr.bf16.mxu0 %v7863_v1 }
 0xd83   : > { %6338 = vmatpush3.bf16.msra.mxu1 %v6919_v39  ;;  %v6937_v39 = vld [vmem:[%s9188_s5 + $0x60] sm:$0xff]  }
 0xd84   : > { %6339 = vmatprep.subr.bf16.mxu1 %v7863_v1 }
 0xd85   : > { %6328 = vmatpush3.bf16.msra.mxu0 %v6915_v34 }
 0xd86   : > { %6329 = vmatprep.subr.bf16.mxu0 %v7863_v1 }
 0xd87   : > { %6340 = vmatpush3.bf16.msra.mxu1 %v6921_v41  ;;  %v6938_v41 = vld [vmem:[%s9188_s5 + $0x40] sm:$0xff]  }
 0xd88   : > { %6341 = vmatprep.subr.bf16.mxu1 %v7863_v1 }
 0xd89   : > { %6330 = vmatpush3.bf16.msra.mxu0 %v6916_v35 }
 0xd8a   : > { %6347 = vmatprep.subr.bf16.mxu0 %v7863_v1 }
 0xd8b   : > { %6342 = vmatpush3.bf16.msra.mxu1 %v6923_v43  ;;  %v6939_v43 = vld [vmem:[%s9188_s5 + $0x68] sm:$0xff]  }
 0xd8c   : > { %6332 = vmatmul.mubr.msk.bf16.vlgmr.msra.gmra.mrb[56].mxu0 %vm3441_vm5, %v4299_v36  ;;  %6359 = vmatprep.subr.bf16.mxu1 %v7863_v1 }
 0xd8d   : > { %6355 = vmatprep.mubr.msk.bf16.mxu0 %vm7865_vm4, %v7863_v1  ;;  %6348 = vmatpush3.bf16.msra.mxu0 %v6918_v38 }
 0xd8e   : > { %6349 = vmatprep.subr.bf16.mxu0 %v7863_v1 }
 0xd91   : > { %6350 = vmatpush3.bf16.msra.mxu0 %v6920_v40 }
 0xd92   : > { %6351 = vmatprep.subr.bf16.mxu0 %v7863_v1 }
 0xd95   : > { %6352 = vmatpush3.bf16.msra.mxu0 %v6922_v42 }
 0xd96   : > { %6353 = vmatprep.subr.bf16.mxu0 %v7863_v1 }
 0xd99   : > { %6354 = vmatpush3.bf16.msra.mxu0 %v6924_v44  ;;  %v6941_v44 = vld [vmem:[%s9188_s5 + $0x70] sm:$0xff]  }
 0xd9a   : > { %6371 = vmatprep.subr.bf16.mxu0 %v7863_v1 }
 0xe4f   : > { %v4225_v45 = vpop.f32.mrb[52].mxu0 }
 0xe50   : > { %v4292_v46 = vpop.f32.mrb[52].mxu1  ;;  %v6309_v48 = vpop.f32.mrb[53].mxu0 }
 0xe51   : > { %v4293_v47 = vadd.f32 %v4292_v46, %v4225_v45  ;;  %v6321_v49 = vpop.f32.mrb[53].mxu1  ;;  %v4228_v50 = vpop.f32.mrb[54].mxu0  ;;  %v6942_v45 = vld [vmem:[%s9188_s5 + $0x50] sm:$0xff]   ;;  %v6943_v46 = vld [vmem:[%s9188_s5 + $0x78] sm:$0xff]  }
 0xe52   : > { %v4295_v51 = vpop.f32.mrb[54].mxu1  ;;  %v6310_v52 = vpop.f32.mrb[55].mxu0  ;;  %v6945_v49 = vld [vmem:[%s9190_s10] sm:$0xff]  }
 0xe53   : > { %v6322_v53 = vpop.f32.mrb[55].mxu1  ;;  %v6946_v51 = vld [vmem:[%s9190_s10 + $0x8] sm:$0xff]   ;;  %v6947_v52 = vld [vmem:[%s9190_s10 + $0x10] sm:$0xff]  }
 0xe54   : > { %v6948_v53 = vld [vmem:[%s9190_s10 + $0x18] sm:$0xff]  }
 0xe5f   : > { %v4370_v54 = vpop.f32.mrb[56].mxu0 }
 0xe60   : > { %v4376_v56 = vadd.f32 %v4370_v54, %v4293_v47  ;;  %v6333_v57 = vpop.f32.mrb[57].mxu0  ;;  %v6944_v47 = vld [vmem:[%s9188_s5 + $0x58] sm:$0xff]   ;;  %v6949_v54 = vld [vmem:[%s9190_s10 + $0x20] sm:$0xff]  }
 0xe61   : > { %v4373_v59 = vpop.f32.mrb[58].mxu0  ;;  %v6952_v57 = vld [vmem:[%s9190_s10 + $0x38] sm:$0xff]  }
 0xe62   : > { %v4384_v60 = vadd.f32 %v5760_v55, %v4376_v56  ;;  %v6334_v61 = vpop.f32.mrb[59].mxu0  ;;  %v6950_v55 = vld [vmem:[%s9190_s10 + $0x28] sm:$0xff]   ;;  %v6951_v56 = vld [vmem:[%s9190_s10 + $0x30] sm:$0xff]  }
 0xe63   : > { %v6954_v59 = vld [vmem:[%s8055_s21 + $0x8] sm:$0xff]  }
 0xe64   : > { %vm4385_vm9 = vcmp.ge.f32.partialorder %v4384_v60, 0.0  ;;  %v4387_v62 = vmul.f32 %v4386_v58, %v4384_v60 }
 0xe66   : > { %v4388_v63 = vsel %vm4385_vm9, %v4384_v60, %v4387_v62 }
 0xe67   : > { %4390 = vst.msk [vmem:[#allocation2 + $0x1] sm:$0xf] %vm3394_vm3, %v4388_v63 }
 0xe6e   : > { %v4401_v0 = vld [vmem:[#allocation2 + $0x1] sm:$0xf] }
 0xe6f   : > { %v4391_v2 = vld [vmem:[#allocation2] sm:$0xf]  ;;  %v4402_v4 = vpack.c.bf16 %v4401_v0, %v4401_v0 }
 0xe70   : > { %v4392_v5 = vpack.c.bf16 %v4391_v2, %v4391_v2  ;;  %v4546_v9 = vld [vmem:[#allocation2 + $0x2] sm:$0xf] }
 0xe71   : > { %6344 = vmatmul.mubr.msk.bf16.vlgmr.msra.gmra.mrb[56].mxu1 %vm3441_vm5, %v4402_v4  ;;  %v4547_v10 = vpack.c.bf16 %v4546_v9, %v4546_v9 }
 0xe72   : > { %6356 = vmatmul.mubr.msk.bf16.vlgmr.msra.gmra.mrb[60].mxu0 %vm3441_vm5, %v4392_v5  ;;  %6360 = vmatpush3.bf16.msra.mxu1 %v6925_v3 }
 0xe73   : > { %6367 = vmatprep.mubr.msk.bf16.mxu1 %vm7865_vm4, %v7863_v1  ;;  %6361 = vmatprep.subr.bf16.mxu1 %v7863_v1 }
 0xe74   : > { %6379 = vmatprep.mubr.msk.bf16.mxu0 %vm7865_vm4, %v7863_v1  ;;  %6372 = vmatpush3.bf16.msra.mxu0 %v6930_v14 }
 0xe75   : > { %6373 = vmatprep.subr.bf16.mxu0 %v7863_v1 }
 0xe76   : > { %6362 = vmatpush3.bf16.msra.mxu1 %v6926_v6 }
 0xe77   : > { %6363 = vmatprep.subr.bf16.mxu1 %v7863_v1 }
 0xe78   : > { %6374 = vmatpush3.bf16.msra.mxu0 %v6932_v17 }
 0xe79   : > { %6375 = vmatprep.subr.bf16.mxu0 %v7863_v1 }
 0xe7a   : > { %6364 = vmatpush3.bf16.msra.mxu1 %v6927_v7 }
 0xe7b   : > { %6365 = vmatprep.subr.bf16.mxu1 %v7863_v1 }
 0xe7c   : > { %6376 = vmatpush3.bf16.msra.mxu0 %v6934_v19 }
 0xe7d   : > { %6377 = vmatprep.subr.bf16.mxu0 %v7863_v1 }
 0xe7e   : > { %6366 = vmatpush3.bf16.msra.mxu1 %v6928_v8 }
 0xe7f   : > { %6383 = vmatprep.subr.bf16.mxu1 %v7863_v1 }
 0xe80   : > { %6378 = vmatpush3.bf16.msra.mxu0 %v6936_v21 }
 0xe81   : > { %6368 = vmatmul.mubr.msk.bf16.vlgmr.msra.gmra.mrb[60].mxu1 %vm3441_vm5, %v4547_v10  ;;  %6395 = vmatprep.subr.bf16.mxu0 %v7863_v1 }
 0xe82   : > { %6391 = vmatprep.mubr.msk.bf16.mxu1 %vm7865_vm4, %v7863_v1  ;;  %6384 = vmatpush3.bf16.msra.mxu1 %v6929_v12 }
 0xe83   : > { %6385 = vmatprep.subr.bf16.mxu1 %v7863_v1 }
 0xe86   : > { %6386 = vmatpush3.bf16.msra.mxu1 %v6931_v16  ;;  %v4948_v16 = vld [vmem:[%s9191_s1] sm:$0x1]  ;;  %s5174_s1 = sshll.u32 %s1497_s9, 4  ;;  %s9012_s1 = int_to_ptr.vmem [resolvable:$true] %s5174_s1 }
 0xe87   : > { %6387 = vmatprep.subr.bf16.mxu1 %v7863_v1  ;;  %p7681_p12 = scmp.lt.s32.totalorder %s9012_s1, %s7679_s2 }
 0xe8a   : > { %6388 = vmatpush3.bf16.msra.mxu1 %v6933_v18 }
 0xe8b   : > { %6389 = vmatprep.subr.bf16.mxu1 %v7863_v1 }
 0xe8e   : > { %6390 = vmatpush3.bf16.msra.mxu1 %v6935_v20  ;;  %v4952_v20 = vstv %s5821_s15  ;;  %s9010_s15 = scalar_lea.hbm %s8065_s8, %s5837_s17 }
 0xe8f   : > { %6407 = vmatprep.subr.bf16.mxu1 %v7863_v1 }
 0xf44   : > { %v4473_v13 = vpop.f32.mrb[56].mxu1 }
 0xf45   : > { %v4540_v15 = vpop.f32.mrb[60].mxu0  ;;  %v6345_v23 = vpop.f32.mrb[57].mxu1 }
 0xf46   : > { %v4541_v22 = vadd.f32 %v4540_v15, %v4473_v13  ;;  %v6357_v24 = vpop.f32.mrb[61].mxu0  ;;  %v4476_v25 = vpop.f32.mrb[58].mxu1  ;;  %v6955_v23 = vld [vmem:[%s8055_s21 + $0x10] sm:$0xff]  }
 0xf47   : > { %v4543_v26 = vpop.f32.mrb[62].mxu0  ;;  %v6346_v28 = vpop.f32.mrb[59].mxu1  ;;  %v6956_v24 = vld [vmem:[%s8055_s21 + $0x18] sm:$0xff]   ;;  %v4972_v25 = vld [vmem:[%s8050_s19] sm:$0x1] }
 0xf48   : > { %v6358_v29 = vpop.f32.mrb[63].mxu0  ;;  %v5063_v28 = vstv %s5830_s16  ;;  %s5162_s16 = scalar_lea.sflag [#allocation5], %s1496_s3 }
 0xf54   : > { %v4618_v30 = vpop.f32.mrb[60].mxu1 }
 0xf55   : > { %v4624_v32 = vadd.f32 %v4618_v30, %v4541_v22  ;;  %v6369_v33 = vpop.f32.mrb[61].mxu1 }
 0xf56   : > { %v4621_v11 = vpop.f32.mrb[62].mxu1 }
 0xf57   : > { %v4632_v34 = vadd.f32 %v5776_v31, %v4624_v32  ;;  %v6370_v35 = vpop.f32.mrb[63].mxu1 }
 0xf58   : > { %v5075_v35 = vld [vmem:[%s8060_s29] sm:$0x1] }
 0xf59   : > { %v4633_v36 = vadd.f32 %v4632_v34, %v8884_v27  ;;  %v6940_v27 = vld [vmem:[%s9188_s5 + $0x48] sm:$0xff]  }
 0xf5b   : > { %vm4634_vm10 = vcmp.ge.f32.partialorder %v4633_v36, 0.0  ;;  %v4635_v37 = vmul.f32 %v4633_v36, %v4386_v58  ;;  %v6953_v58 = vld [vmem:[%s8055_s21] sm:$0xff]  }
 0xf5d   : > { %v4636_v38 = vsel %vm4634_vm10, %v4633_v36, %v4635_v37  ;;  %v5145_v36 = vstv %s5836_s23  ;;  %s7674_s23 = scalar_lea.vmem %s9012_s1, 16 }
 0xf5e   : > { %v4637_v40 = vpack.c.bf16 %v4636_v38, %v4636_v38  ;;  %p7675_p6 = scmp.ne.s32.totalorder %s9012_s1, %s7674_s23  ;;  %p7682_p8 = scmp.lt.s32.totalorder %s7680_s4, %s7674_s23 }
 0xf60   : > { %6392 = vmatmul.mubr.msk.bf16.vlgmr.msra.gmra.mrb[64].mxu1 %vm3441_vm5, %v4637_v40  ;;  %v4656_v42 = vshrl.u32 %v4637_v40, 16  ;;  %v4801_v50 = vrot.slane %v4637_v40, 1  ;;  %p7676_p10 = pnand %p7675_p6, %p9192_p9  ;;  %p7683_p11 = por %p7682_p8, %p7681_p12 }
 0xf61   : > { %6408 = vmatpush3.bf16.msra.mxu1 %v6937_v39  ;;  %6415 = vmatprep.mubr.msk.bf16.mxu1 %vm7865_vm4, %v7863_v1 }
 0xf62   : > { %6380 = vmatmul.mubr.msk.bf16.vlgmr.msra.gmra.mrb[64].mxu0 %vm3441_vm5, %v4656_v42  ;;  %6409 = vmatprep.subr.bf16.mxu1 %v7863_v1  ;;  %v4879_v48 = vrot.slane %v4656_v42, 1  ;;  %p7677_p7 = pneg %p7676_p10 }
 0xf63   : > { %6396 = vmatpush3.bf16.msra.mxu0 %v6938_v41  ;;  %6403 = vmatprep.mubr.msk.bf16.mxu0 %vm7865_vm4, %v7863_v1 }
 0xf64   : > { %6397 = vmatprep.subr.bf16.mxu0 %v7863_v1  ;;  %p7684_p13 = pnand %p7683_p11, %p7677_p7 }
 0xf65   : > { %6410 = vmatpush3.bf16.msra.mxu1 %v6939_v43 }
 0xf66   : > { %6411 = vmatprep.subr.bf16.mxu1 %v7863_v1 }
 0xf67   : > { %6398 = vmatpush3.bf16.msra.mxu0 %v6940_v27 }
 0xf68   : > { %6399 = vmatprep.subr.bf16.mxu0 %v7863_v1 }
 0xf69   : > { %6412 = vmatpush3.bf16.msra.mxu1 %v6941_v44 }
 0xf6a   : > { %6413 = vmatprep.subr.bf16.mxu1 %v7863_v1 }
 0xf6b   : > { %6400 = vmatpush3.bf16.msra.mxu0 %v6942_v45 }
 0xf6c   : > { %6401 = vmatprep.subr.bf16.mxu0 %v7863_v1 }
 0xf6d   : > { %6414 = vmatpush3.bf16.msra.mxu1 %v6943_v46 }
 0xf6e   : > { %6439 = vmatprep.subr.bf16.mxu1 %v7863_v1 }
 0xf6f   : > { %6402 = vmatpush3.bf16.msra.mxu0 %v6944_v47 }
 0xf70   : > { %6416 = vmatmul.mubr.msk.bf16.vlgmr.msra.gmra.mrb[68].mxu1 %vm3441_vm5, %v4879_v48  ;;  %6419 = vmatprep.subr.bf16.mxu0 %v7863_v1 }
 0xf71   : > { %6447 = vmatprep.mubr.msk.bf16.mxu1 %vm7865_vm4, %v7863_v1  ;;  %6440 = vmatpush3.bf16.msra.mxu1 %v6953_v58 }
 0xf72   : > { %6404 = vmatmul.mubr.msk.bf16.vlgmr.msra.gmra.mrb[68].mxu0 %vm3441_vm5, %v4801_v50  ;;  %6441 = vmatprep.subr.bf16.mxu1 %v7863_v1 }
 0xf73   : > { %6420 = vmatpush3.bf16.msra.mxu0 %v6945_v49  ;;  %6435 = vmatprep.mubr.msk.bf16.mxu0 %vm7865_vm4, %v7863_v1 }
 0xf74   : > { %6421 = vmatprep.subr.bf16.mxu0 %v7863_v1 }
 0xf75   : > { %6442 = vmatpush3.bf16.msra.mxu1 %v6954_v59 }
 0xf76   : > { %6443 = vmatprep.subr.bf16.mxu1 %v7863_v1 }
 0xf77   : > { %6422 = vmatpush3.bf16.msra.mxu0 %v6946_v51 }
 0xf78   : > { %6423 = vmatprep.subr.bf16.mxu0 %v7863_v1 }
 0xf79   : > { %6444 = vmatpush3.bf16.msra.mxu1 %v6955_v23 }
 0xf7a   : > { %6445 = vmatprep.subr.bf16.mxu1 %v7863_v1 }
 0xf7b   : > { %6424 = vmatpush3.bf16.msra.mxu0 %v6947_v52 }
 0xf7c   : > { %6425 = vmatprep.subr.bf16.mxu0 %v7863_v1 }
 0xf7d   : > { %6446 = vmatpush3.bf16.msra.mxu1 %v6956_v24 }
 0xf7f   : > { %6426 = vmatpush3.bf16.msra.mxu0 %v6948_v53 }
 0xf80   : > { %6427 = vmatprep.subr.bf16.mxu0 %v7863_v1 }
 0xf83   : > { %6428 = vmatpush3.bf16.msra.mxu0 %v6949_v54 }
 0xf84   : > { %6429 = vmatprep.subr.bf16.mxu0 %v7863_v1 }
 0xf87   : > { %6430 = vmatpush3.bf16.msra.mxu0 %v6950_v55 }
 0xf88   : > { %6431 = vmatprep.subr.bf16.mxu0 %v7863_v1 }
 0xf8b   : > { %6432 = vmatpush3.bf16.msra.mxu0 %v6951_v56 }
 0xf8c   : > { %6433 = vmatprep.subr.bf16.mxu0 %v7863_v1 }
 0xf8f   : > { %6434 = vmatpush3.bf16.msra.mxu0 %v6952_v57 }
0x1033   : > { %v4785_v60 = vpop.f32.mrb[64].mxu1 }
0x1034   : > { %v6393_v61 = vpop.f32.mrb[65].mxu1 }
0x1035   : > { %v4719_v62 = vpop.f32.mrb[64].mxu0  ;;  %v4788_v63 = vpop.f32.mrb[66].mxu1 }
0x1036   : > { %v4786_v0 = vadd.f32 %v4785_v60, %v4719_v62  ;;  %v6381_v2 = vpop.f32.mrb[65].mxu0  ;;  %v6394_v3 = vpop.f32.mrb[67].mxu1 }
0x1037   : > { %v4722_v4 = vpop.f32.mrb[66].mxu0 }
0x1038   : > { %v6382_v5 = vpop.f32.mrb[67].mxu0 }
0x1043   : > { %v4941_v6 = vpop.f32.mrb[68].mxu1 }
0x1044   : > { %v6417_v7 = vpop.f32.mrb[69].mxu1 }
0x1045   : > { %v4863_v8 = vpop.f32.mrb[68].mxu0  ;;  %v4944_v9 = vpop.f32.mrb[70].mxu1 }
0x1046   : > { %v4869_v10 = vadd.f32 %v4863_v8, %v4786_v0  ;;  %v6405_v12 = vpop.f32.mrb[69].mxu0  ;;  %v6418_v14 = vpop.f32.mrb[71].mxu1 }
0x1047   : > { %v4866_v17 = vpop.f32.mrb[70].mxu0 }
0x1048   : > { %v4947_v18 = vadd.f32 %v4941_v6, %v4869_v10  ;;  %v6406_v19 = vpop.f32.mrb[71].mxu0 }
0x104a   : > { %v4949_v21 = vadd.f32 %v4948_v16, %v4947_v18 }
0x104c   : > { %vm4951_vm4 = vcmp.ge.f32.partialorder %v4949_v21, 0.0  ;;  %v4953_v13 = vmul.f32 %v4952_v20, %v4949_v21 }
0x104e   : > { %v4954_v15 = vsel %vm4951_vm4, %v4949_v21, %v4953_v13 }
0x104f   : > { %v4955_v22 = vpack.c.bf16 %v4954_v15, %v4954_v15 }
0x1051   : > { %6436 = vmatmul.mubr.bf16.vlgmr.msra.gmra.mrb[72].mxu0 %v4955_v22 }
0x1124   : > { %v5055_v26 = vpop.f32.mrb[72].mxu0 }
0x1125   : > { %v5056_v29 = vadd.f32 %v5055_v26, %v4972_v25  ;;  %v6437_v30 = vpop.f32.mrb[73].mxu0 }
0x1126   : > { %v5058_v31 = vpop.f32.mrb[74].mxu0 }
0x1127   : > { %vm5062_vm11 = vcmp.ge.f32.partialorder %v5056_v29, 0.0  ;;  %v5064_v32 = vmul.f32 %v5063_v28, %v5056_v29  ;;  %v6438_v33 = vpop.f32.mrb[75].mxu0 }
0x1129   : > { %v5065_v11 = vsel %vm5062_vm11, %v5056_v29, %v5064_v32 }
0x112a   : > { %v5066_v34 = vpack.c.bf16 %v5065_v11, %v5065_v11 }
0x112c   : > { %6448 = vmatmul.mubr.msk.bf16.vlgmr.msra.gmra.mrb[72].mxu1 %vm3441_vm5, %v5066_v34 }
0x11ff   : > { %v5137_v1 = vpop.f32.mrb[72].mxu1 }
0x1200   : > { %v5138_v37 = vadd.f32 %v5137_v1, %v5075_v35  ;;  %v6449_v38 = vpop.f32.mrb[73].mxu1 }
0x1201   : > { %v5140_v39 = vpop.f32.mrb[74].mxu1 }
0x1202   : > { %v5146_v40 = vmul.f32 %v5145_v36, %v5138_v37  ;;  %v6450_v41 = vpop.f32.mrb[75].mxu1  ;;  %vm5144_vm12 = vcmp.ge.f32.partialorder %v5138_v37, 0.0 }
0x1204   : > { %v5147_v42 = vsel %vm5144_vm12, %v5138_v37, %v5146_v40 }
0x1205   : > { %v5149_v43 = vsel %vm5148_vm13, %v5147_v42, -inf }
0x1206   : > { %5150 = vmax.xlane.f32.xlu0 %v5149_v43 }
0x1293   : > { %v5151_v27 = vpop.xlane.xlu0 %5150 }
0x1294   : > { %v5152_v44 = vsub.f32 %v5147_v42, %v5151_v27 }
0x1296   : > { %v5153_v45 = vmul.f32 1.442695, %v5152_v44 }
0x1298   : > { %6957 = vpow2.f32 %v5153_v45 }
0x12a2   : > { %v6958_v46 = vpop.eup %6957 }
0x12a3   : > { %v5155_v47 = vsel %vm5148_vm13, %v6958_v46, 0.0 }
0x12a4   : > { %5156 = vadd.xlane.f32.xlu1 %v5155_v47 }
0x1331   : > { %v5157_v48 = vpop.xlane.xlu1 %5156 }
0x1332   : > { %6959 = vrcp.f32 %v5157_v48 }
0x133c   : > { %v6960_v49 = vpop.eup %6959 }
0x133d   : > { %v5159_v50 = vmul.f32 %v6960_v49, %v6958_v46 }
0x133f   : > { %5160 = vst.msk [vmem:[%s1497_s9] sm:$0x1] %vm5148_vm13, %v5159_v50 }
0x1340   : > { %7687 = shalt.err (!%p7684_p13)
}
0x1341   : > { %s7688_s3 = scalar_lea.hbm %s9010_s15, 16  ;;  %s7692_s17 = scalar_lea.hbm %s8065_s8, 32 }
0x1342   : > { %p7689_p1 = scmp.ne.s32.totalorder %s9010_s15, %s7688_s3  ;;  %p7693_p4 = scmp.lt.u32.totalorder %s9010_s15, %s8065_s8 }
0x1343   : > { %p7694_p5 = scmp.lt.u32.totalorder %s7692_s17, %s7688_s3  ;;  %p7696_p6 = scmp.lt.u32.totalorder %s7688_s3, %s9010_s15 }
0x1344   : > { %p7690_p2 = pnand %p7689_p1, %p9192_p9 }
0x1345   : > { %p7695_p0 = por %p7694_p5, %p7693_p4 }
0x1346   : > { %p7691_p3 = pneg %p7690_p2 }
0x1347   : > { %p7697_p10 = por %p7696_p6, %p7695_p0 }
0x1349   : > { %p7698_p7 = pnand %p7697_p10, %p7691_p3 }
0x134b   : > { %7701 = shalt.err (!%p7698_p7)
}
0x134c   : > { %6583 = dma.vmem_to_hbm [thread:$0]  (%p9192_p9), %s9012_s1, 16, %s9010_s15, %s5162_s16  }
0x134d PF: > { %s9193_s2 = sld [smem:[#allocation88_spill]]  ;;  %s9194_s4 = sld [smem:[#allocation92_spill]] }
0x134e   : > { %p6720_p12 = scmp.ge.s32.totalorder %s7792_s18, 2 }
0x1353   : > { %s5186_s9 = sand.u32 1, %s9193_s2   ;;  %p9195_p8 = scmp.ne.s32.totalorder %s9194_s4, 0 }
0x1354   : > { %s5187_s23 = scalar_lea.sflag [#allocation5], %s5186_s9 }
0x1355   : > { %p6665_p11 = pnand %p6720_p12, %p9195_p8 }
0x1357   : > { %7775 = dma.done.wait (!%p6665_p11), %s5187_s23, 16  }
0x1358   : > { %7777 = vsyncadd (!%p6665_p11), %s5187_s23, 4294967280  ;;  %s9196_s18 = sld [smem:[#allocation90_spill]]  ;;  %s9197_s22 = sld [smem:[#allocation89_spill]] }
0x1359   : > { %s9198_s16 = sld [smem:[#allocation91_spill]]  ;;  %s9199_s15 = smov %s7784_s0 }
0x135e   : > { %p101_p13 = scmp.ge.s32.totalorder %s9196_s18, 4   ;;  %s9200_s0 = smov %s9197_s22 }
0x1360   :  { %103 = sbr.rel (!%p101_p13) target bundleno = 85 (0x55), region = 411 }
0x1367   :  { %5191 = vsyncpa [#allocation4], 1 }
0x1368   :  { %5193 = vsyncpa [#allocation4 + $0x1], 1 }
0x1369   :  { %5194 = vsyncpa [#allocation9], 1 }
0x136a   :  { %5195 = vsyncpa [#allocation12], 1 }
0x136b   :  { %5196 = vsyncpa [#allocation15], 1 }
0x136c   :  { %5197 = vsyncpa [#allocation18], 1 }
0x136d   :  { %5198 = vsyncpa [#allocation21], 1 }
0x136e   :  { %5199 = vsyncpa [#allocation24], 1 }
0x136f   :  { %5200 = vsyncpa [#allocation27], 1 }
0x1370   :  { %5201 = vsyncpa [#allocation30], 1 }
0x1371   :  { %5202 = vsyncpa [#allocation33], 1 }
0x1372   :  { %5203 = vsyncpa [#allocation36], 1 }
0x1373   :  { %5204 = vsyncpa [#allocation39], 1 }
0x1374   :  { %5205 = vsyncpa [#allocation42], 1 }
0x1375   :  { %5206 = vsyncpa [#allocation5], 1 }
0x1376   :  { %5208 = vsyncpa [#allocation5 + $0x1], 1 }
0x1377   :  { %5209 = vsyncpa [#allocation6], 1 }
0x1378   :  { %5211 = vsyncpa [#allocation6 + $0x1], 1 }

</bundles_post_ra>
